<compile_context>
chip_gen: v5e
topology: v5e:2x2
jax: 0.10.0
libtpu: 0.0.40
codegen_flags: <defaults>
</compile_context>

<pallas_src>
import functools

import jax
import jax.numpy as jnp
import numpy as np
from jax.experimental import pallas as pl
from jax.experimental.pallas import tpu as pltpu


def _reorder_gates(w, H):
    """Permute gate blocks along the last axis: PyTorch [i,f,g,o] -> [i,f,o,g]."""
    i = w[..., 0 * H:1 * H]
    f = w[..., 1 * H:2 * H]
    g = w[..., 2 * H:3 * H]
    o = w[..., 3 * H:4 * H]
    return jnp.concatenate([i, f, o, g], axis=-1)


def _largest_divisor(n, cap):
    best = 1
    for d in range(1, min(n, cap) + 1):
        if n % d == 0:
            best = d
    return best


def stacked_lstm_seq_kernel(n_layers, H, t_chunk, preact_ref, *refs):
    """One grid step == `t_chunk` timesteps of the stacked LSTM."""
    n_rest = 2 * (n_layers - 1)
    w_hh0_ref = refs[0]
    layer_refs = refs[1:1 + n_rest]           # (w_fused_l, b_l) for layers 1..n-1
    w_out_ref = refs[1 + n_rest]
    b_out_ref = refs[2 + n_rest]
    h_ref = refs[3 + n_rest]
    c_ref = refs[4 + n_rest]
    out_ref = refs[5 + n_rest]

    # state0(): zero initial hidden / cell state.
    @pl.when(pl.program_id(0) == 0)
    def _():
        h_ref[...] = jnp.zeros_like(h_ref)
        c_ref[...] = jnp.zeros_like(c_ref)

    # Load resident recurrent state and (constant) weights once per chunk.
    h = [h_ref[l] for l in range(n_layers)]
    c = [c_ref[l] for l in range(n_layers)]
    w_hh0 = w_hh0_ref[...]                                      # (H, 4H)
    w_fused = [layer_refs[2 * (l - 1)][...] for l in range(1, n_layers)]   # (2H,4H)
    b_fused = [layer_refs[2 * (l - 1) + 1][...] for l in range(1, n_layers)]  # (1,4H)

    def lstm_cell(gates, c_prev):
        # gate layout [i, f, o, g]: one contiguous sigmoid slab + one tanh slab.
        sig = jax.nn.sigmoid(gates[:, :3 * H])
        i_g = sig[:, 0 * H:1 * H]
        f_g = sig[:, 1 * H:2 * H]
        o_g = sig[:, 2 * H:3 * H]
        g_g = jnp.tanh(gates[:, 3 * H:])
        c_new = f_g * c_prev + i_g * g_g
        h_new = o_g * jnp.tanh(c_new)
        return h_new, c_new

    x = h[n_layers - 1]
    for tt in range(t_chunk):                  # static unroll over the chunk
        # Layer 0: x@W_ih0 + b0 was hoisted out of the recurrence (preact input).
        gates = preact_ref[tt] + jnp.dot(h[0], w_hh0,
                                         preferred_element_type=jnp.float32)
        h[0], c[0] = lstm_cell(gates, c[0])
        x = h[0]
        # Layers > 0: fused [x, h_prev] @ [W_ih; W_hh] single matmul.
        for l in range(1, n_layers):
            xh = jnp.concatenate([x, h[l]], axis=-1)            # (B, 2H)
            gates = (jnp.dot(xh, w_fused[l - 1],
                             preferred_element_type=jnp.float32)
                     + b_fused[l - 1])
            h[l], c[l] = lstm_cell(gates, c[l])
            x = h[l]
        # (dropout between layers is identity at p=0 / eval mode)

    # Write recurrent state back once per chunk (carried across grid steps).
    for l in range(n_layers):
        h_ref[l] = h[l]
        c_ref[l] = c[l]

    # h2o projection only matters on the final timestep (return_sequence=False).
    @pl.when(pl.program_id(0) == pl.num_programs(0) - 1)
    def _():
        out_ref[...] = (jnp.dot(x, w_out_ref[...],
                                preferred_element_type=jnp.float32)
                        + b_out_ref[...])


def sequence_model_forward(tokens, emb_table, layer_params, w_out, b_out,
                           max_chunk=16):
    """tokens: (B, T) int32.  Returns ((h, c), output) like SequenceModel.forward."""
    B, T = tokens.shape
    num_iters = T - 1                       # default: x.size(1) - 1 timesteps
    n_layers = len(layer_params)
    H = layer_params[0][1].shape[0]
    out_size = w_out.shape[1]

    if num_iters <= 0:
        # TODO(synk): PyTorch leaves `output` undefined for T<=1; return zeros here.
        h0 = jnp.zeros((n_layers, B, H), jnp.float32)
        return (h0, h0), jnp.zeros((B, out_size), jnp.float32)

    t_chunk = _largest_divisor(num_iters, max_chunk)

    # Gate-reorder to [i,f,o,g] and hoist layer-0 input matmul + bias into one
    # big time-batched matmul (produced time-major directly, no extra transpose).
    w_ih0, w_hh0, b0 = layer_params[0]
    w_ih0_r = _reorder_gates(w_ih0, H)
    w_hh0_r = _reorder_gates(w_hh0, H)
    b0_r = _reorder_gates(b0, H)

    emb_seq = emb_table[tokens[:, :num_iters]]                   # (B, T-1, in_size)
    preact0 = (jnp.einsum('bti,ig->tbg', emb_seq, w_ih0_r,
                          precision=jax.lax.Precision.HIGHEST)
               + b0_r)                                           # (T-1, B, 4H)

    inputs = [preact0, w_hh0_r]
    in_specs = [pl.BlockSpec((t_chunk, B, 4 * H), lambda t: (t, 0, 0)),
                pl.BlockSpec(w_hh0_r.shape, lambda t: (0, 0))]
    for (w_ih, w_hh, b) in layer_params[1:]:
        w_fused = jnp.concatenate(
            [_reorder_gates(w_ih, H), _reorder_gates(w_hh, H)], axis=0)  # (2H, 4H)
        b_r = _reorder_gates(b, H)
        inputs += [w_fused, b_r]
        in_specs += [pl.BlockSpec(w_fused.shape, lambda t: (0, 0)),
                     pl.BlockSpec(b_r.shape, lambda t: (0, 0))]
    inputs += [w_out, b_out]
    in_specs += [pl.BlockSpec(w_out.shape, lambda t: (0, 0)),
                 pl.BlockSpec(b_out.shape, lambda t: (0, 0))]

    out_shapes = (
        jax.ShapeDtypeStruct((n_layers, B, H), jnp.float32),   # h
        jax.ShapeDtypeStruct((n_layers, B, H), jnp.float32),   # c
        jax.ShapeDtypeStruct((B, out_size), jnp.float32),      # output
    )
    out_specs = (
        pl.BlockSpec((n_layers, B, H), lambda t: (0, 0, 0)),
        pl.BlockSpec((n_layers, B, H), lambda t: (0, 0, 0)),
        pl.BlockSpec((B, out_size), lambda t: (0, 0)),
    )

    h, c, out = pl.pallas_call(
        functools.partial(stacked_lstm_seq_kernel, n_layers, H, t_chunk),
        out_shape=out_shapes,
        grid=(num_iters // t_chunk,),
        in_specs=in_specs,
        out_specs=out_specs,
        compiler_params=pltpu.CompilerParams(
            dimension_semantics=("arbitrary",)),   # sequential recurrence
    )(*inputs)
    return (h, c), out


def reference_forward(tokens, emb_table, layer_params, w_out, b_out):
    """Pure-JAX reference mirroring the PyTorch module (for correctness check)."""
    B, T = tokens.shape
    n_layers = len(layer_params)
    H = layer_params[0][1].shape[0]
    h = jnp.zeros((n_layers, B, H), jnp.float32)
    c = jnp.zeros((n_layers, B, H), jnp.float32)
    x = None
    for t in range(T - 1):
        x = emb_table[tokens[:, t]]
        new_h, new_c = [], []
        for l, (w_ih, w_hh, b) in enumerate(layer_params):
            gates = x @ w_ih + h[l] @ w_hh + b        # PyTorch gate order [i,f,g,o]
            i_g = jax.nn.sigmoid(gates[:, 0 * H:1 * H])
            f_g = jax.nn.sigmoid(gates[:, 1 * H:2 * H])
            g_g = jnp.tanh(gates[:, 2 * H:3 * H])
            o_g = jax.nn.sigmoid(gates[:, 3 * H:4 * H])
            cn = f_g * c[l] + i_g * g_g
            hn = o_g * jnp.tanh(cn)
            new_h.append(hn)
            new_c.append(cn)
            x = hn
        h = jnp.stack(new_h)
        c = jnp.stack(new_c)
    out = x @ w_out + b_out                            # last-step output only
    return (h, c), out


if __name__ == "__main__":
    # Small shapes consistent with the module's forward.
    B, T = 8, 33         # batch, sequence length (num_iters = 32 -> 2 grid steps)
    vocab = 64
    in_size = 32         # embedding dim == RNN input dim
    rnn_size = 32
    out_size = 16
    n_layers = 2

    key = jax.random.PRNGKey(0)
    keys = jax.random.split(key, 4 + 4 * n_layers)

    tokens = jax.random.randint(keys[0], (B, T), 0, vocab, dtype=jnp.int32)
    emb_table = (0.1 * jax.random.normal(keys[1], (vocab, in_size))).astype(jnp.float32)

    layer_params = []
    for l in range(n_layers):
        fan_in = in_size if l == 0 else rnn_size
        w_ih = (0.1 * jax.random.normal(keys[4 + 4 * l + 0],
                                        (fan_in, 4 * rnn_size))).astype(jnp.float32)
        w_hh = (0.1 * jax.random.normal(keys[4 + 4 * l + 1],
                                        (rnn_size, 4 * rnn_size))).astype(jnp.float32)
        # bias_ih + bias_hh folded into one (1, 4H) bias
        b = (0.1 * jax.random.normal(keys[4 + 4 * l + 2],
                                     (1, 4 * rnn_size))).astype(jnp.float32)
        layer_params.append((w_ih, w_hh, b))

    w_out = (0.1 * jax.random.normal(keys[2], (rnn_size, out_size))).astype(jnp.float32)
    b_out = (0.1 * jax.random.normal(keys[3], (1, out_size))).astype(jnp.float32)

    (h, c), out = sequence_model_forward(tokens, emb_table, layer_params, w_out, b_out)
    jax.block_until_ready((h, c, out))

    (h_ref, c_ref), out_ref = reference_forward(tokens, emb_table, layer_params,
                                                w_out, b_out)
    np.testing.assert_allclose(np.asarray(h), np.asarray(h_ref), rtol=1e-4, atol=1e-5)
    np.testing.assert_allclose(np.asarray(c), np.asarray(c_ref), rtol=1e-4, atol=1e-5)
    np.testing.assert_allclose(np.asarray(out), np.asarray(out_ref), rtol=1e-4, atol=1e-5)

    assert h.shape == (n_layers, B, rnn_size)
    assert c.shape == (n_layers, B, rnn_size)
    assert out.shape == (B, out_size)
    print("KERNEL_OK")
</pallas_src>

<mosaic_0001>
module attributes {stable_mosaic.version = 11 : i64} {
  func.func @stacked_lstm_seq_kernel(%arg0: i32, %arg1: memref<16x8x128xf32, #tpu.memory_space<vmem>>, %arg2: memref<32x128xf32, #tpu.memory_space<vmem>>, %arg3: memref<64x128xf32, #tpu.memory_space<vmem>>, %arg4: memref<1x128xf32, #tpu.memory_space<vmem>>, %arg5: memref<32x16xf32, #tpu.memory_space<vmem>>, %arg6: memref<1x16xf32, #tpu.memory_space<vmem>>, %arg7: memref<2x8x32xf32, #tpu.memory_space<vmem>>, %arg8: memref<2x8x32xf32, #tpu.memory_space<vmem>>, %arg9: memref<8x16xf32, #tpu.memory_space<vmem>>) attributes {dimension_semantics = [#tpu.dimension_semantics<arbitrary>], iteration_bounds = array<i64: 2>, scalar_prefetch = 0 : i64, scratch_operands = 0 : i64, tpu.core_type = #tpu.core_type<tc>, window_params = [{transform_indices = @transform_0, window_bounds = array<i64: 16, 8, 128>}, {pipeline_mode = #tpu.pipeline_mode<synchronous>, transform_indices = @transform_1, window_bounds = array<i64: 32, 128>}, {pipeline_mode = #tpu.pipeline_mode<synchronous>, transform_indices = @transform_2, window_bounds = array<i64: 64, 128>}, {pipeline_mode = #tpu.pipeline_mode<synchronous>, transform_indices = @transform_3, window_bounds = array<i64: 1, 128>}, {pipeline_mode = #tpu.pipeline_mode<synchronous>, transform_indices = @transform_4, window_bounds = array<i64: 32, 16>}, {pipeline_mode = #tpu.pipeline_mode<synchronous>, transform_indices = @transform_5, window_bounds = array<i64: 1, 16>}, {pipeline_mode = #tpu.pipeline_mode<synchronous>, transform_indices = @transform_6, window_bounds = array<i64: 2, 8, 32>}, {pipeline_mode = #tpu.pipeline_mode<synchronous>, transform_indices = @transform_7, window_bounds = array<i64: 2, 8, 32>}, {pipeline_mode = #tpu.pipeline_mode<synchronous>, transform_indices = @transform_8, window_bounds = array<i64: 8, 16>}]} {
    %c0_i32 = arith.constant 0 : i32
    %0 = arith.cmpi eq, %arg0, %c0_i32 : i32
    %1 = arith.extui %0 : i1 to i32
    %c0_i32_0 = arith.constant 0 : i32
    %2 = arith.cmpi ne, %1, %c0_i32_0 : i32
    scf.if %2 {
      %cst_127 = arith.constant 0.000000e+00 : f32
      %669 = vector.broadcast %cst_127 : f32 to vector<2x8x32xf32>
      %c0_128 = arith.constant 0 : index
      %c0_129 = arith.constant 0 : index
      %c0_130 = arith.constant 0 : index
      %670 = vector.load %arg7[%c0_128, %c0_129, %c0_130] : memref<2x8x32xf32, #tpu.memory_space<vmem>>, vector<2x8x32xf32>
      tpu.vector_store %arg7[%c0_128, %c0_129, %c0_130], %669 {strides = array<i32>} : memref<2x8x32xf32, #tpu.memory_space<vmem>>, vector<2x8x32xf32>,
      %cst_131 = arith.constant 0.000000e+00 : f32
      %671 = vector.broadcast %cst_131 : f32 to vector<2x8x32xf32>
      %c0_132 = arith.constant 0 : index
      %c0_133 = arith.constant 0 : index
      %c0_134 = arith.constant 0 : index
      %672 = vector.load %arg8[%c0_132, %c0_133, %c0_134] : memref<2x8x32xf32, #tpu.memory_space<vmem>>, vector<2x8x32xf32>
      tpu.vector_store %arg8[%c0_132, %c0_133, %c0_134], %671 {strides = array<i32>} : memref<2x8x32xf32, #tpu.memory_space<vmem>>, vector<2x8x32xf32>,
    } else {
    }
    %c0 = arith.constant 0 : index
    %c0_1 = arith.constant 0 : index
    %c0_2 = arith.constant 0 : index
    %3 = vector.load %arg7[%c0, %c0_1, %c0_2] : memref<2x8x32xf32, #tpu.memory_space<vmem>>, vector<1x8x32xf32>
    %4 = vector.shape_cast %3 : vector<1x8x32xf32> to vector<8x32xf32>
    %c1 = arith.constant 1 : index
    %c0_3 = arith.constant 0 : index
    %c0_4 = arith.constant 0 : index
    %5 = vector.load %arg7[%c1, %c0_3, %c0_4] : memref<2x8x32xf32, #tpu.memory_space<vmem>>, vector<1x8x32xf32>
    %6 = vector.shape_cast %5 : vector<1x8x32xf32> to vector<8x32xf32>
    %c0_5 = arith.constant 0 : index
    %c0_6 = arith.constant 0 : index
    %c0_7 = arith.constant 0 : index
    %7 = vector.load %arg8[%c0_5, %c0_6, %c0_7] : memref<2x8x32xf32, #tpu.memory_space<vmem>>, vector<1x8x32xf32>
    %8 = vector.shape_cast %7 : vector<1x8x32xf32> to vector<8x32xf32>
    %c1_8 = arith.constant 1 : index
    %c0_9 = arith.constant 0 : index
    %c0_10 = arith.constant 0 : index
    %9 = vector.load %arg8[%c1_8, %c0_9, %c0_10] : memref<2x8x32xf32, #tpu.memory_space<vmem>>, vector<1x8x32xf32>
    %10 = vector.shape_cast %9 : vector<1x8x32xf32> to vector<8x32xf32>
    %c0_11 = arith.constant 0 : index
    %c0_12 = arith.constant 0 : index
    %11 = vector.load %arg2[%c0_11, %c0_12] : memref<32x128xf32, #tpu.memory_space<vmem>>, vector<32x128xf32>
    %c0_13 = arith.constant 0 : index
    %c0_14 = arith.constant 0 : index
    %12 = vector.load %arg3[%c0_13, %c0_14] : memref<64x128xf32, #tpu.memory_space<vmem>>, vector<64x128xf32>
    %c0_15 = arith.constant 0 : index
    %c0_16 = arith.constant 0 : index
    %13 = vector.load %arg4[%c0_15, %c0_16] : memref<1x128xf32, #tpu.memory_space<vmem>>, vector<1x128xf32>
    %c0_17 = arith.constant 0 : index
    %c0_18 = arith.constant 0 : index
    %c0_19 = arith.constant 0 : index
    %14 = vector.load %arg1[%c0_17, %c0_18, %c0_19] : memref<16x8x128xf32, #tpu.memory_space<vmem>>, vector<1x8x128xf32>
    %15 = vector.shape_cast %14 : vector<1x8x128xf32> to vector<8x128xf32>
    %cst = arith.constant dense<0.000000e+00> : vector<8x128xf32>
    %16 = tpu.matmul %4, %11, %cst {dimension_numbers = #tpu.dot_dimension_numbers<[1], [0], [0], [1], [0, 0, 1, 1], [], []>} : vector<8x32xf32>, vector<32x128xf32>, vector<8x128xf32> -> vector<8x128xf32>
    %17 = arith.addf %15, %16 : vector<8x128xf32>
    %18 = vector.extract_strided_slice %17 {offsets = [0, 0], sizes = [8, 96], strides = [1, 1]} : vector<8x128xf32> to vector<8x96xf32>
    %19 = arith.negf %18 : vector<8x96xf32>
    %20 = math.exp %19 : vector<8x96xf32>
    %cst_20 = arith.constant 1.000000e+00 : f32
    %21 = vector.broadcast %cst_20 : f32 to vector<8x96xf32>
    %22 = arith.addf %21, %20 : vector<8x96xf32>
    %23 = arith.divf %21, %22 : vector<8x96xf32>
    %24 = vector.extract_strided_slice %23 {offsets = [0, 0], sizes = [8, 32], strides = [1, 1]} : vector<8x96xf32> to vector<8x32xf32>
    %25 = vector.extract_strided_slice %23 {offsets = [0, 32], sizes = [8, 32], strides = [1, 1]} : vector<8x96xf32> to vector<8x32xf32>
    %26 = vector.extract_strided_slice %23 {offsets = [0, 64], sizes = [8, 32], strides = [1, 1]} : vector<8x96xf32> to vector<8x32xf32>
    %27 = vector.extract_strided_slice %17 {offsets = [0, 96], sizes = [8, 32], strides = [1, 1]} : vector<8x128xf32> to vector<8x32xf32>
    %28 = math.tanh %27 : vector<8x32xf32>
    %29 = arith.mulf %25, %8 : vector<8x32xf32>
    %30 = arith.mulf %24, %28 : vector<8x32xf32>
    %31 = arith.addf %29, %30 : vector<8x32xf32>
    %32 = math.tanh %31 : vector<8x32xf32>
    %33 = arith.mulf %26, %32 : vector<8x32xf32>
    %34 = tpu.concatenate %33, %6 in 1 : vector<8x32xf32>, vector<8x32xf32> -> vector<8x64xf32>
    %cst_21 = arith.constant dense<0.000000e+00> : vector<8x128xf32>
    %35 = tpu.matmul %34, %12, %cst_21 {dimension_numbers = #tpu.dot_dimension_numbers<[1], [0], [0], [1], [0, 0, 1, 1], [], []>} : vector<8x64xf32>, vector<64x128xf32>, vector<8x128xf32> -> vector<8x128xf32>
    %36 = vector.broadcast %13 : vector<1x128xf32> to vector<8x128xf32>
    %37 = arith.addf %35, %36 : vector<8x128xf32>
    %38 = vector.extract_strided_slice %37 {offsets = [0, 0], sizes = [8, 96], strides = [1, 1]} : vector<8x128xf32> to vector<8x96xf32>
    %39 = arith.negf %38 : vector<8x96xf32>
    %40 = math.exp %39 : vector<8x96xf32>
    %cst_22 = arith.constant 1.000000e+00 : f32
    %41 = vector.broadcast %cst_22 : f32 to vector<8x96xf32>
    %42 = arith.addf %41, %40 : vector<8x96xf32>
    %43 = arith.divf %41, %42 : vector<8x96xf32>
    %44 = vector.extract_strided_slice %43 {offsets = [0, 0], sizes = [8, 32], strides = [1, 1]} : vector<8x96xf32> to vector<8x32xf32>
    %45 = vector.extract_strided_slice %43 {offsets = [0, 32], sizes = [8, 32], strides = [1, 1]} : vector<8x96xf32> to vector<8x32xf32>
    %46 = vector.extract_strided_slice %43 {offsets = [0, 64], sizes = [8, 32], strides = [1, 1]} : vector<8x96xf32> to vector<8x32xf32>
    %47 = vector.extract_strided_slice %37 {offsets = [0, 96], sizes = [8, 32], strides = [1, 1]} : vector<8x128xf32> to vector<8x32xf32>
    %48 = math.tanh %47 : vector<8x32xf32>
    %49 = arith.mulf %45, %10 : vector<8x32xf32>
    %50 = arith.mulf %44, %48 : vector<8x32xf32>
    %51 = arith.addf %49, %50 : vector<8x32xf32>
    %52 = math.tanh %51 : vector<8x32xf32>
    %53 = arith.mulf %46, %52 : vector<8x32xf32>
    %c1_23 = arith.constant 1 : index
    %c0_24 = arith.constant 0 : index
    %c0_25 = arith.constant 0 : index
    %54 = vector.load %arg1[%c1_23, %c0_24, %c0_25] : memref<16x8x128xf32, #tpu.memory_space<vmem>>, vector<1x8x128xf32>
    %55 = vector.shape_cast %54 : vector<1x8x128xf32> to vector<8x128xf32>
    %cst_26 = arith.constant dense<0.000000e+00> : vector<8x128xf32>
    %56 = tpu.matmul %33, %11, %cst_26 {dimension_numbers = #tpu.dot_dimension_numbers<[1], [0], [0], [1], [0, 0, 1, 1], [], []>} : vector<8x32xf32>, vector<32x128xf32>, vector<8x128xf32> -> vector<8x128xf32>
    %57 = arith.addf %55, %56 : vector<8x128xf32>
    %58 = vector.extract_strided_slice %57 {offsets = [0, 0], sizes = [8, 96], strides = [1, 1]} : vector<8x128xf32> to vector<8x96xf32>
    %59 = arith.negf %58 : vector<8x96xf32>
    %60 = math.exp %59 : vector<8x96xf32>
    %cst_27 = arith.constant 1.000000e+00 : f32
    %61 = vector.broadcast %cst_27 : f32 to vector<8x96xf32>
    %62 = arith.addf %61, %60 : vector<8x96xf32>
    %63 = arith.divf %61, %62 : vector<8x96xf32>
    %64 = vector.extract_strided_slice %63 {offsets = [0, 0], sizes = [8, 32], strides = [1, 1]} : vector<8x96xf32> to vector<8x32xf32>
    %65 = vector.extract_strided_slice %63 {offsets = [0, 32], sizes = [8, 32], strides = [1, 1]} : vector<8x96xf32> to vector<8x32xf32>
    %66 = vector.extract_strided_slice %63 {offsets = [0, 64], sizes = [8, 32], strides = [1, 1]} : vector<8x96xf32> to vector<8x32xf32>
    %67 = vector.extract_strided_slice %57 {offsets = [0, 96], sizes = [8, 32], strides = [1, 1]} : vector<8x128xf32> to vector<8x32xf32>
    %68 = math.tanh %67 : vector<8x32xf32>
    %69 = arith.mulf %65, %31 : vector<8x32xf32>
    %70 = arith.mulf %64, %68 : vector<8x32xf32>
    %71 = arith.addf %69, %70 : vector<8x32xf32>
    %72 = math.tanh %71 : vector<8x32xf32>
    %73 = arith.mulf %66, %72 : vector<8x32xf32>
    %74 = tpu.concatenate %73, %53 in 1 : vector<8x32xf32>, vector<8x32xf32> -> vector<8x64xf32>
    %cst_28 = arith.constant dense<0.000000e+00> : vector<8x128xf32>
    %75 = tpu.matmul %74, %12, %cst_28 {dimension_numbers = #tpu.dot_dimension_numbers<[1], [0], [0], [1], [0, 0, 1, 1], [], []>} : vector<8x64xf32>, vector<64x128xf32>, vector<8x128xf32> -> vector<8x128xf32>
    %76 = vector.broadcast %13 : vector<1x128xf32> to vector<8x128xf32>
    %77 = arith.addf %75, %76 : vector<8x128xf32>
    %78 = vector.extract_strided_slice %77 {offsets = [0, 0], sizes = [8, 96], strides = [1, 1]} : vector<8x128xf32> to vector<8x96xf32>
    %79 = arith.negf %78 : vector<8x96xf32>
    %80 = math.exp %79 : vector<8x96xf32>
    %cst_29 = arith.constant 1.000000e+00 : f32
    %81 = vector.broadcast %cst_29 : f32 to vector<8x96xf32>
    %82 = arith.addf %81, %80 : vector<8x96xf32>
    %83 = arith.divf %81, %82 : vector<8x96xf32>
    %84 = vector.extract_strided_slice %83 {offsets = [0, 0], sizes = [8, 32], strides = [1, 1]} : vector<8x96xf32> to vector<8x32xf32>
    %85 = vector.extract_strided_slice %83 {offsets = [0, 32], sizes = [8, 32], strides = [1, 1]} : vector<8x96xf32> to vector<8x32xf32>
    %86 = vector.extract_strided_slice %83 {offsets = [0, 64], sizes = [8, 32], strides = [1, 1]} : vector<8x96xf32> to vector<8x32xf32>
    %87 = vector.extract_strided_slice %77 {offsets = [0, 96], sizes = [8, 32], strides = [1, 1]} : vector<8x128xf32> to vector<8x32xf32>
    %88 = math.tanh %87 : vector<8x32xf32>
    %89 = arith.mulf %85, %51 : vector<8x32xf32>
    %90 = arith.mulf %84, %88 : vector<8x32xf32>
    %91 = arith.addf %89, %90 : vector<8x32xf32>
    %92 = math.tanh %91 : vector<8x32xf32>
    %93 = arith.mulf %86, %92 : vector<8x32xf32>
    %c2 = arith.constant 2 : index
    %c0_30 = arith.constant 0 : index
    %c0_31 = arith.constant 0 : index
    %94 = vector.load %arg1[%c2, %c0_30, %c0_31] : memref<16x8x128xf32, #tpu.memory_space<vmem>>, vector<1x8x128xf32>
    %95 = vector.shape_cast %94 : vector<1x8x128xf32> to vector<8x128xf32>
    %cst_32 = arith.constant dense<0.000000e+00> : vector<8x128xf32>
    %96 = tpu.matmul %73, %11, %cst_32 {dimension_numbers = #tpu.dot_dimension_numbers<[1], [0], [0], [1], [0, 0, 1, 1], [], []>} : vector<8x32xf32>, vector<32x128xf32>, vector<8x128xf32> -> vector<8x128xf32>
    %97 = arith.addf %95, %96 : vector<8x128xf32>
    %98 = vector.extract_strided_slice %97 {offsets = [0, 0], sizes = [8, 96], strides = [1, 1]} : vector<8x128xf32> to vector<8x96xf32>
    %99 = arith.negf %98 : vector<8x96xf32>
    %100 = math.exp %99 : vector<8x96xf32>
    %cst_33 = arith.constant 1.000000e+00 : f32
    %101 = vector.broadcast %cst_33 : f32 to vector<8x96xf32>
    %102 = arith.addf %101, %100 : vector<8x96xf32>
    %103 = arith.divf %101, %102 : vector<8x96xf32>
    %104 = vector.extract_strided_slice %103 {offsets = [0, 0], sizes = [8, 32], strides = [1, 1]} : vector<8x96xf32> to vector<8x32xf32>
    %105 = vector.extract_strided_slice %103 {offsets = [0, 32], sizes = [8, 32], strides = [1, 1]} : vector<8x96xf32> to vector<8x32xf32>
    %106 = vector.extract_strided_slice %103 {offsets = [0, 64], sizes = [8, 32], strides = [1, 1]} : vector<8x96xf32> to vector<8x32xf32>
    %107 = vector.extract_strided_slice %97 {offsets = [0, 96], sizes = [8, 32], strides = [1, 1]} : vector<8x128xf32> to vector<8x32xf32>
    %108 = math.tanh %107 : vector<8x32xf32>
    %109 = arith.mulf %105, %71 : vector<8x32xf32>
    %110 = arith.mulf %104, %108 : vector<8x32xf32>
    %111 = arith.addf %109, %110 : vector<8x32xf32>
    %112 = math.tanh %111 : vector<8x32xf32>
    %113 = arith.mulf %106, %112 : vector<8x32xf32>
    %114 = tpu.concatenate %113, %93 in 1 : vector<8x32xf32>, vector<8x32xf32> -> vector<8x64xf32>
    %cst_34 = arith.constant dense<0.000000e+00> : vector<8x128xf32>
    %115 = tpu.matmul %114, %12, %cst_34 {dimension_numbers = #tpu.dot_dimension_numbers<[1], [0], [0], [1], [0, 0, 1, 1], [], []>} : vector<8x64xf32>, vector<64x128xf32>, vector<8x128xf32> -> vector<8x128xf32>
    %116 = vector.broadcast %13 : vector<1x128xf32> to vector<8x128xf32>
    %117 = arith.addf %115, %116 : vector<8x128xf32>
    %118 = vector.extract_strided_slice %117 {offsets = [0, 0], sizes = [8, 96], strides = [1, 1]} : vector<8x128xf32> to vector<8x96xf32>
    %119 = arith.negf %118 : vector<8x96xf32>
    %120 = math.exp %119 : vector<8x96xf32>
    %cst_35 = arith.constant 1.000000e+00 : f32
    %121 = vector.broadcast %cst_35 : f32 to vector<8x96xf32>
    %122 = arith.addf %121, %120 : vector<8x96xf32>
    %123 = arith.divf %121, %122 : vector<8x96xf32>
    %124 = vector.extract_strided_slice %123 {offsets = [0, 0], sizes = [8, 32], strides = [1, 1]} : vector<8x96xf32> to vector<8x32xf32>
    %125 = vector.extract_strided_slice %123 {offsets = [0, 32], sizes = [8, 32], strides = [1, 1]} : vector<8x96xf32> to vector<8x32xf32>
    %126 = vector.extract_strided_slice %123 {offsets = [0, 64], sizes = [8, 32], strides = [1, 1]} : vector<8x96xf32> to vector<8x32xf32>
    %127 = vector.extract_strided_slice %117 {offsets = [0, 96], sizes = [8, 32], strides = [1, 1]} : vector<8x128xf32> to vector<8x32xf32>
    %128 = math.tanh %127 : vector<8x32xf32>
    %129 = arith.mulf %125, %91 : vector<8x32xf32>
    %130 = arith.mulf %124, %128 : vector<8x32xf32>
    %131 = arith.addf %129, %130 : vector<8x32xf32>
    %132 = math.tanh %131 : vector<8x32xf32>
    %133 = arith.mulf %126, %132 : vector<8x32xf32>
    %c3 = arith.constant 3 : index
    %c0_36 = arith.constant 0 : index
    %c0_37 = arith.constant 0 : index
    %134 = vector.load %arg1[%c3, %c0_36, %c0_37] : memref<16x8x128xf32, #tpu.memory_space<vmem>>, vector<1x8x128xf32>
    %135 = vector.shape_cast %134 : vector<1x8x128xf32> to vector<8x128xf32>
    %cst_38 = arith.constant dense<0.000000e+00> : vector<8x128xf32>
    %136 = tpu.matmul %113, %11, %cst_38 {dimension_numbers = #tpu.dot_dimension_numbers<[1], [0], [0], [1], [0, 0, 1, 1], [], []>} : vector<8x32xf32>, vector<32x128xf32>, vector<8x128xf32> -> vector<8x128xf32>
    %137 = arith.addf %135, %136 : vector<8x128xf32>
    %138 = vector.extract_strided_slice %137 {offsets = [0, 0], sizes = [8, 96], strides = [1, 1]} : vector<8x128xf32> to vector<8x96xf32>
    %139 = arith.negf %138 : vector<8x96xf32>
    %140 = math.exp %139 : vector<8x96xf32>
    %cst_39 = arith.constant 1.000000e+00 : f32
    %141 = vector.broadcast %cst_39 : f32 to vector<8x96xf32>
    %142 = arith.addf %141, %140 : vector<8x96xf32>
    %143 = arith.divf %141, %142 : vector<8x96xf32>
    %144 = vector.extract_strided_slice %143 {offsets = [0, 0], sizes = [8, 32], strides = [1, 1]} : vector<8x96xf32> to vector<8x32xf32>
    %145 = vector.extract_strided_slice %143 {offsets = [0, 32], sizes = [8, 32], strides = [1, 1]} : vector<8x96xf32> to vector<8x32xf32>
    %146 = vector.extract_strided_slice %143 {offsets = [0, 64], sizes = [8, 32], strides = [1, 1]} : vector<8x96xf32> to vector<8x32xf32>
    %147 = vector.extract_strided_slice %137 {offsets = [0, 96], sizes = [8, 32], strides = [1, 1]} : vector<8x128xf32> to vector<8x32xf32>
    %148 = math.tanh %147 : vector<8x32xf32>
    %149 = arith.mulf %145, %111 : vector<8x32xf32>
    %150 = arith.mulf %144, %148 : vector<8x32xf32>
    %151 = arith.addf %149, %150 : vector<8x32xf32>
    %152 = math.tanh %151 : vector<8x32xf32>
    %153 = arith.mulf %146, %152 : vector<8x32xf32>
    %154 = tpu.concatenate %153, %133 in 1 : vector<8x32xf32>, vector<8x32xf32> -> vector<8x64xf32>
    %cst_40 = arith.constant dense<0.000000e+00> : vector<8x128xf32>
    %155 = tpu.matmul %154, %12, %cst_40 {dimension_numbers = #tpu.dot_dimension_numbers<[1], [0], [0], [1], [0, 0, 1, 1], [], []>} : vector<8x64xf32>, vector<64x128xf32>, vector<8x128xf32> -> vector<8x128xf32>
    %156 = vector.broadcast %13 : vector<1x128xf32> to vector<8x128xf32>
    %157 = arith.addf %155, %156 : vector<8x128xf32>
    %158 = vector.extract_strided_slice %157 {offsets = [0, 0], sizes = [8, 96], strides = [1, 1]} : vector<8x128xf32> to vector<8x96xf32>
    %159 = arith.negf %158 : vector<8x96xf32>
    %160 = math.exp %159 : vector<8x96xf32>
    %cst_41 = arith.constant 1.000000e+00 : f32
    %161 = vector.broadcast %cst_41 : f32 to vector<8x96xf32>
    %162 = arith.addf %161, %160 : vector<8x96xf32>
    %163 = arith.divf %161, %162 : vector<8x96xf32>
    %164 = vector.extract_strided_slice %163 {offsets = [0, 0], sizes = [8, 32], strides = [1, 1]} : vector<8x96xf32> to vector<8x32xf32>
    %165 = vector.extract_strided_slice %163 {offsets = [0, 32], sizes = [8, 32], strides = [1, 1]} : vector<8x96xf32> to vector<8x32xf32>
    %166 = vector.extract_strided_slice %163 {offsets = [0, 64], sizes = [8, 32], strides = [1, 1]} : vector<8x96xf32> to vector<8x32xf32>
    %167 = vector.extract_strided_slice %157 {offsets = [0, 96], sizes = [8, 32], strides = [1, 1]} : vector<8x128xf32> to vector<8x32xf32>
    %168 = math.tanh %167 : vector<8x32xf32>
    %169 = arith.mulf %165, %131 : vector<8x32xf32>
    %170 = arith.mulf %164, %168 : vector<8x32xf32>
    %171 = arith.addf %169, %170 : vector<8x32xf32>
    %172 = math.tanh %171 : vector<8x32xf32>
    %173 = arith.mulf %166, %172 : vector<8x32xf32>
    %c4 = arith.constant 4 : index
    %c0_42 = arith.constant 0 : index
    %c0_43 = arith.constant 0 : index
    %174 = vector.load %arg1[%c4, %c0_42, %c0_43] : memref<16x8x128xf32, #tpu.memory_space<vmem>>, vector<1x8x128xf32>
    %175 = vector.shape_cast %174 : vector<1x8x128xf32> to vector<8x128xf32>
    %cst_44 = arith.constant dense<0.000000e+00> : vector<8x128xf32>
    %176 = tpu.matmul %153, %11, %cst_44 {dimension_numbers = #tpu.dot_dimension_numbers<[1], [0], [0], [1], [0, 0, 1, 1], [], []>} : vector<8x32xf32>, vector<32x128xf32>, vector<8x128xf32> -> vector<8x128xf32>
    %177 = arith.addf %175, %176 : vector<8x128xf32>
    %178 = vector.extract_strided_slice %177 {offsets = [0, 0], sizes = [8, 96], strides = [1, 1]} : vector<8x128xf32> to vector<8x96xf32>
    %179 = arith.negf %178 : vector<8x96xf32>
    %180 = math.exp %179 : vector<8x96xf32>
    %cst_45 = arith.constant 1.000000e+00 : f32
    %181 = vector.broadcast %cst_45 : f32 to vector<8x96xf32>
    %182 = arith.addf %181, %180 : vector<8x96xf32>
    %183 = arith.divf %181, %182 : vector<8x96xf32>
    %184 = vector.extract_strided_slice %183 {offsets = [0, 0], sizes = [8, 32], strides = [1, 1]} : vector<8x96xf32> to vector<8x32xf32>
    %185 = vector.extract_strided_slice %183 {offsets = [0, 32], sizes = [8, 32], strides = [1, 1]} : vector<8x96xf32> to vector<8x32xf32>
    %186 = vector.extract_strided_slice %183 {offsets = [0, 64], sizes = [8, 32], strides = [1, 1]} : vector<8x96xf32> to vector<8x32xf32>
    %187 = vector.extract_strided_slice %177 {offsets = [0, 96], sizes = [8, 32], strides = [1, 1]} : vector<8x128xf32> to vector<8x32xf32>
    %188 = math.tanh %187 : vector<8x32xf32>
    %189 = arith.mulf %185, %151 : vector<8x32xf32>
    %190 = arith.mulf %184, %188 : vector<8x32xf32>
    %191 = arith.addf %189, %190 : vector<8x32xf32>
    %192 = math.tanh %191 : vector<8x32xf32>
    %193 = arith.mulf %186, %192 : vector<8x32xf32>
    %194 = tpu.concatenate %193, %173 in 1 : vector<8x32xf32>, vector<8x32xf32> -> vector<8x64xf32>
    %cst_46 = arith.constant dense<0.000000e+00> : vector<8x128xf32>
    %195 = tpu.matmul %194, %12, %cst_46 {dimension_numbers = #tpu.dot_dimension_numbers<[1], [0], [0], [1], [0, 0, 1, 1], [], []>} : vector<8x64xf32>, vector<64x128xf32>, vector<8x128xf32> -> vector<8x128xf32>
    %196 = vector.broadcast %13 : vector<1x128xf32> to vector<8x128xf32>
    %197 = arith.addf %195, %196 : vector<8x128xf32>
    %198 = vector.extract_strided_slice %197 {offsets = [0, 0], sizes = [8, 96], strides = [1, 1]} : vector<8x128xf32> to vector<8x96xf32>
    %199 = arith.negf %198 : vector<8x96xf32>
    %200 = math.exp %199 : vector<8x96xf32>
    %cst_47 = arith.constant 1.000000e+00 : f32
    %201 = vector.broadcast %cst_47 : f32 to vector<8x96xf32>
    %202 = arith.addf %201, %200 : vector<8x96xf32>
    %203 = arith.divf %201, %202 : vector<8x96xf32>
    %204 = vector.extract_strided_slice %203 {offsets = [0, 0], sizes = [8, 32], strides = [1, 1]} : vector<8x96xf32> to vector<8x32xf32>
    %205 = vector.extract_strided_slice %203 {offsets = [0, 32], sizes = [8, 32], strides = [1, 1]} : vector<8x96xf32> to vector<8x32xf32>
    %206 = vector.extract_strided_slice %203 {offsets = [0, 64], sizes = [8, 32], strides = [1, 1]} : vector<8x96xf32> to vector<8x32xf32>
    %207 = vector.extract_strided_slice %197 {offsets = [0, 96], sizes = [8, 32], strides = [1, 1]} : vector<8x128xf32> to vector<8x32xf32>
    %208 = math.tanh %207 : vector<8x32xf32>
    %209 = arith.mulf %205, %171 : vector<8x32xf32>
    %210 = arith.mulf %204, %208 : vector<8x32xf32>
    %211 = arith.addf %209, %210 : vector<8x32xf32>
    %212 = math.tanh %211 : vector<8x32xf32>
    %213 = arith.mulf %206, %212 : vector<8x32xf32>
    %c5 = arith.constant 5 : index
    %c0_48 = arith.constant 0 : index
    %c0_49 = arith.constant 0 : index
    %214 = vector.load %arg1[%c5, %c0_48, %c0_49] : memref<16x8x128xf32, #tpu.memory_space<vmem>>, vector<1x8x128xf32>
    %215 = vector.shape_cast %214 : vector<1x8x128xf32> to vector<8x128xf32>
    %cst_50 = arith.constant dense<0.000000e+00> : vector<8x128xf32>
    %216 = tpu.matmul %193, %11, %cst_50 {dimension_numbers = #tpu.dot_dimension_numbers<[1], [0], [0], [1], [0, 0, 1, 1], [], []>} : vector<8x32xf32>, vector<32x128xf32>, vector<8x128xf32> -> vector<8x128xf32>
    %217 = arith.addf %215, %216 : vector<8x128xf32>
    %218 = vector.extract_strided_slice %217 {offsets = [0, 0], sizes = [8, 96], strides = [1, 1]} : vector<8x128xf32> to vector<8x96xf32>
    %219 = arith.negf %218 : vector<8x96xf32>
    %220 = math.exp %219 : vector<8x96xf32>
    %cst_51 = arith.constant 1.000000e+00 : f32
    %221 = vector.broadcast %cst_51 : f32 to vector<8x96xf32>
    %222 = arith.addf %221, %220 : vector<8x96xf32>
    %223 = arith.divf %221, %222 : vector<8x96xf32>
    %224 = vector.extract_strided_slice %223 {offsets = [0, 0], sizes = [8, 32], strides = [1, 1]} : vector<8x96xf32> to vector<8x32xf32>
    %225 = vector.extract_strided_slice %223 {offsets = [0, 32], sizes = [8, 32], strides = [1, 1]} : vector<8x96xf32> to vector<8x32xf32>
    %226 = vector.extract_strided_slice %223 {offsets = [0, 64], sizes = [8, 32], strides = [1, 1]} : vector<8x96xf32> to vector<8x32xf32>
    %227 = vector.extract_strided_slice %217 {offsets = [0, 96], sizes = [8, 32], strides = [1, 1]} : vector<8x128xf32> to vector<8x32xf32>
    %228 = math.tanh %227 : vector<8x32xf32>
    %229 = arith.mulf %225, %191 : vector<8x32xf32>
    %230 = arith.mulf %224, %228 : vector<8x32xf32>
    %231 = arith.addf %229, %230 : vector<8x32xf32>
    %232 = math.tanh %231 : vector<8x32xf32>
    %233 = arith.mulf %226, %232 : vector<8x32xf32>
    %234 = tpu.concatenate %233, %213 in 1 : vector<8x32xf32>, vector<8x32xf32> -> vector<8x64xf32>
    %cst_52 = arith.constant dense<0.000000e+00> : vector<8x128xf32>
    %235 = tpu.matmul %234, %12, %cst_52 {dimension_numbers = #tpu.dot_dimension_numbers<[1], [0], [0], [1], [0, 0, 1, 1], [], []>} : vector<8x64xf32>, vector<64x128xf32>, vector<8x128xf32> -> vector<8x128xf32>
    %236 = vector.broadcast %13 : vector<1x128xf32> to vector<8x128xf32>
    %237 = arith.addf %235, %236 : vector<8x128xf32>
    %238 = vector.extract_strided_slice %237 {offsets = [0, 0], sizes = [8, 96], strides = [1, 1]} : vector<8x128xf32> to vector<8x96xf32>
    %239 = arith.negf %238 : vector<8x96xf32>
    %240 = math.exp %239 : vector<8x96xf32>
    %cst_53 = arith.constant 1.000000e+00 : f32
    %241 = vector.broadcast %cst_53 : f32 to vector<8x96xf32>
    %242 = arith.addf %241, %240 : vector<8x96xf32>
    %243 = arith.divf %241, %242 : vector<8x96xf32>
    %244 = vector.extract_strided_slice %243 {offsets = [0, 0], sizes = [8, 32], strides = [1, 1]} : vector<8x96xf32> to vector<8x32xf32>
    %245 = vector.extract_strided_slice %243 {offsets = [0, 32], sizes = [8, 32], strides = [1, 1]} : vector<8x96xf32> to vector<8x32xf32>
    %246 = vector.extract_strided_slice %243 {offsets = [0, 64], sizes = [8, 32], strides = [1, 1]} : vector<8x96xf32> to vector<8x32xf32>
    %247 = vector.extract_strided_slice %237 {offsets = [0, 96], sizes = [8, 32], strides = [1, 1]} : vector<8x128xf32> to vector<8x32xf32>
    %248 = math.tanh %247 : vector<8x32xf32>
    %249 = arith.mulf %245, %211 : vector<8x32xf32>
    %250 = arith.mulf %244, %248 : vector<8x32xf32>
    %251 = arith.addf %249, %250 : vector<8x32xf32>
    %252 = math.tanh %251 : vector<8x32xf32>
    %253 = arith.mulf %246, %252 : vector<8x32xf32>
    %c6 = arith.constant 6 : index
    %c0_54 = arith.constant 0 : index
    %c0_55 = arith.constant 0 : index
    %254 = vector.load %arg1[%c6, %c0_54, %c0_55] : memref<16x8x128xf32, #tpu.memory_space<vmem>>, vector<1x8x128xf32>
    %255 = vector.shape_cast %254 : vector<1x8x128xf32> to vector<8x128xf32>
    %cst_56 = arith.constant dense<0.000000e+00> : vector<8x128xf32>
    %256 = tpu.matmul %233, %11, %cst_56 {dimension_numbers = #tpu.dot_dimension_numbers<[1], [0], [0], [1], [0, 0, 1, 1], [], []>} : vector<8x32xf32>, vector<32x128xf32>, vector<8x128xf32> -> vector<8x128xf32>
    %257 = arith.addf %255, %256 : vector<8x128xf32>
    %258 = vector.extract_strided_slice %257 {offsets = [0, 0], sizes = [8, 96], strides = [1, 1]} : vector<8x128xf32> to vector<8x96xf32>
    %259 = arith.negf %258 : vector<8x96xf32>
    %260 = math.exp %259 : vector<8x96xf32>
    %cst_57 = arith.constant 1.000000e+00 : f32
    %261 = vector.broadcast %cst_57 : f32 to vector<8x96xf32>
    %262 = arith.addf %261, %260 : vector<8x96xf32>
    %263 = arith.divf %261, %262 : vector<8x96xf32>
    %264 = vector.extract_strided_slice %263 {offsets = [0, 0], sizes = [8, 32], strides = [1, 1]} : vector<8x96xf32> to vector<8x32xf32>
    %265 = vector.extract_strided_slice %263 {offsets = [0, 32], sizes = [8, 32], strides = [1, 1]} : vector<8x96xf32> to vector<8x32xf32>
    %266 = vector.extract_strided_slice %263 {offsets = [0, 64], sizes = [8, 32], strides = [1, 1]} : vector<8x96xf32> to vector<8x32xf32>
    %267 = vector.extract_strided_slice %257 {offsets = [0, 96], sizes = [8, 32], strides = [1, 1]} : vector<8x128xf32> to vector<8x32xf32>
    %268 = math.tanh %267 : vector<8x32xf32>
    %269 = arith.mulf %265, %231 : vector<8x32xf32>
    %270 = arith.mulf %264, %268 : vector<8x32xf32>
    %271 = arith.addf %269, %270 : vector<8x32xf32>
    %272 = math.tanh %271 : vector<8x32xf32>
    %273 = arith.mulf %266, %272 : vector<8x32xf32>
    %274 = tpu.concatenate %273, %253 in 1 : vector<8x32xf32>, vector<8x32xf32> -> vector<8x64xf32>
    %cst_58 = arith.constant dense<0.000000e+00> : vector<8x128xf32>
    %275 = tpu.matmul %274, %12, %cst_58 {dimension_numbers = #tpu.dot_dimension_numbers<[1], [0], [0], [1], [0, 0, 1, 1], [], []>} : vector<8x64xf32>, vector<64x128xf32>, vector<8x128xf32> -> vector<8x128xf32>
    %276 = vector.broadcast %13 : vector<1x128xf32> to vector<8x128xf32>
    %277 = arith.addf %275, %276 : vector<8x128xf32>
    %278 = vector.extract_strided_slice %277 {offsets = [0, 0], sizes = [8, 96], strides = [1, 1]} : vector<8x128xf32> to vector<8x96xf32>
    %279 = arith.negf %278 : vector<8x96xf32>
    %280 = math.exp %279 : vector<8x96xf32>
    %cst_59 = arith.constant 1.000000e+00 : f32
    %281 = vector.broadcast %cst_59 : f32 to vector<8x96xf32>
    %282 = arith.addf %281, %280 : vector<8x96xf32>
    %283 = arith.divf %281, %282 : vector<8x96xf32>
    %284 = vector.extract_strided_slice %283 {offsets = [0, 0], sizes = [8, 32], strides = [1, 1]} : vector<8x96xf32> to vector<8x32xf32>
    %285 = vector.extract_strided_slice %283 {offsets = [0, 32], sizes = [8, 32], strides = [1, 1]} : vector<8x96xf32> to vector<8x32xf32>
    %286 = vector.extract_strided_slice %283 {offsets = [0, 64], sizes = [8, 32], strides = [1, 1]} : vector<8x96xf32> to vector<8x32xf32>
    %287 = vector.extract_strided_slice %277 {offsets = [0, 96], sizes = [8, 32], strides = [1, 1]} : vector<8x128xf32> to vector<8x32xf32>
    %288 = math.tanh %287 : vector<8x32xf32>
    %289 = arith.mulf %285, %251 : vector<8x32xf32>
    %290 = arith.mulf %284, %288 : vector<8x32xf32>
    %291 = arith.addf %289, %290 : vector<8x32xf32>
    %292 = math.tanh %291 : vector<8x32xf32>
    %293 = arith.mulf %286, %292 : vector<8x32xf32>
    %c7 = arith.constant 7 : index
    %c0_60 = arith.constant 0 : index
    %c0_61 = arith.constant 0 : index
    %294 = vector.load %arg1[%c7, %c0_60, %c0_61] : memref<16x8x128xf32, #tpu.memory_space<vmem>>, vector<1x8x128xf32>
    %295 = vector.shape_cast %294 : vector<1x8x128xf32> to vector<8x128xf32>
    %cst_62 = arith.constant dense<0.000000e+00> : vector<8x128xf32>
    %296 = tpu.matmul %273, %11, %cst_62 {dimension_numbers = #tpu.dot_dimension_numbers<[1], [0], [0], [1], [0, 0, 1, 1], [], []>} : vector<8x32xf32>, vector<32x128xf32>, vector<8x128xf32> -> vector<8x128xf32>
    %297 = arith.addf %295, %296 : vector<8x128xf32>
    %298 = vector.extract_strided_slice %297 {offsets = [0, 0], sizes = [8, 96], strides = [1, 1]} : vector<8x128xf32> to vector<8x96xf32>
    %299 = arith.negf %298 : vector<8x96xf32>
    %300 = math.exp %299 : vector<8x96xf32>
    %cst_63 = arith.constant 1.000000e+00 : f32
    %301 = vector.broadcast %cst_63 : f32 to vector<8x96xf32>
    %302 = arith.addf %301, %300 : vector<8x96xf32>
    %303 = arith.divf %301, %302 : vector<8x96xf32>
    %304 = vector.extract_strided_slice %303 {offsets = [0, 0], sizes = [8, 32], strides = [1, 1]} : vector<8x96xf32> to vector<8x32xf32>
    %305 = vector.extract_strided_slice %303 {offsets = [0, 32], sizes = [8, 32], strides = [1, 1]} : vector<8x96xf32> to vector<8x32xf32>
    %306 = vector.extract_strided_slice %303 {offsets = [0, 64], sizes = [8, 32], strides = [1, 1]} : vector<8x96xf32> to vector<8x32xf32>
    %307 = vector.extract_strided_slice %297 {offsets = [0, 96], sizes = [8, 32], strides = [1, 1]} : vector<8x128xf32> to vector<8x32xf32>
    %308 = math.tanh %307 : vector<8x32xf32>
    %309 = arith.mulf %305, %271 : vector<8x32xf32>
    %310 = arith.mulf %304, %308 : vector<8x32xf32>
    %311 = arith.addf %309, %310 : vector<8x32xf32>
    %312 = math.tanh %311 : vector<8x32xf32>
    %313 = arith.mulf %306, %312 : vector<8x32xf32>
    %314 = tpu.concatenate %313, %293 in 1 : vector<8x32xf32>, vector<8x32xf32> -> vector<8x64xf32>
    %cst_64 = arith.constant dense<0.000000e+00> : vector<8x128xf32>
    %315 = tpu.matmul %314, %12, %cst_64 {dimension_numbers = #tpu.dot_dimension_numbers<[1], [0], [0], [1], [0, 0, 1, 1], [], []>} : vector<8x64xf32>, vector<64x128xf32>, vector<8x128xf32> -> vector<8x128xf32>
    %316 = vector.broadcast %13 : vector<1x128xf32> to vector<8x128xf32>
    %317 = arith.addf %315, %316 : vector<8x128xf32>
    %318 = vector.extract_strided_slice %317 {offsets = [0, 0], sizes = [8, 96], strides = [1, 1]} : vector<8x128xf32> to vector<8x96xf32>
    %319 = arith.negf %318 : vector<8x96xf32>
    %320 = math.exp %319 : vector<8x96xf32>
    %cst_65 = arith.constant 1.000000e+00 : f32
    %321 = vector.broadcast %cst_65 : f32 to vector<8x96xf32>
    %322 = arith.addf %321, %320 : vector<8x96xf32>
    %323 = arith.divf %321, %322 : vector<8x96xf32>
    %324 = vector.extract_strided_slice %323 {offsets = [0, 0], sizes = [8, 32], strides = [1, 1]} : vector<8x96xf32> to vector<8x32xf32>
    %325 = vector.extract_strided_slice %323 {offsets = [0, 32], sizes = [8, 32], strides = [1, 1]} : vector<8x96xf32> to vector<8x32xf32>
    %326 = vector.extract_strided_slice %323 {offsets = [0, 64], sizes = [8, 32], strides = [1, 1]} : vector<8x96xf32> to vector<8x32xf32>
    %327 = vector.extract_strided_slice %317 {offsets = [0, 96], sizes = [8, 32], strides = [1, 1]} : vector<8x128xf32> to vector<8x32xf32>
    %328 = math.tanh %327 : vector<8x32xf32>
    %329 = arith.mulf %325, %291 : vector<8x32xf32>
    %330 = arith.mulf %324, %328 : vector<8x32xf32>
    %331 = arith.addf %329, %330 : vector<8x32xf32>
    %332 = math.tanh %331 : vector<8x32xf32>
    %333 = arith.mulf %326, %332 : vector<8x32xf32>
    %c8 = arith.constant 8 : index
    %c0_66 = arith.constant 0 : index
    %c0_67 = arith.constant 0 : index
    %334 = vector.load %arg1[%c8, %c0_66, %c0_67] : memref<16x8x128xf32, #tpu.memory_space<vmem>>, vector<1x8x128xf32>
    %335 = vector.shape_cast %334 : vector<1x8x128xf32> to vector<8x128xf32>
    %cst_68 = arith.constant dense<0.000000e+00> : vector<8x128xf32>
    %336 = tpu.matmul %313, %11, %cst_68 {dimension_numbers = #tpu.dot_dimension_numbers<[1], [0], [0], [1], [0, 0, 1, 1], [], []>} : vector<8x32xf32>, vector<32x128xf32>, vector<8x128xf32> -> vector<8x128xf32>
    %337 = arith.addf %335, %336 : vector<8x128xf32>
    %338 = vector.extract_strided_slice %337 {offsets = [0, 0], sizes = [8, 96], strides = [1, 1]} : vector<8x128xf32> to vector<8x96xf32>
    %339 = arith.negf %338 : vector<8x96xf32>
    %340 = math.exp %339 : vector<8x96xf32>
    %cst_69 = arith.constant 1.000000e+00 : f32
    %341 = vector.broadcast %cst_69 : f32 to vector<8x96xf32>
    %342 = arith.addf %341, %340 : vector<8x96xf32>
    %343 = arith.divf %341, %342 : vector<8x96xf32>
    %344 = vector.extract_strided_slice %343 {offsets = [0, 0], sizes = [8, 32], strides = [1, 1]} : vector<8x96xf32> to vector<8x32xf32>
    %345 = vector.extract_strided_slice %343 {offsets = [0, 32], sizes = [8, 32], strides = [1, 1]} : vector<8x96xf32> to vector<8x32xf32>
    %346 = vector.extract_strided_slice %343 {offsets = [0, 64], sizes = [8, 32], strides = [1, 1]} : vector<8x96xf32> to vector<8x32xf32>
    %347 = vector.extract_strided_slice %337 {offsets = [0, 96], sizes = [8, 32], strides = [1, 1]} : vector<8x128xf32> to vector<8x32xf32>
    %348 = math.tanh %347 : vector<8x32xf32>
    %349 = arith.mulf %345, %311 : vector<8x32xf32>
    %350 = arith.mulf %344, %348 : vector<8x32xf32>
    %351 = arith.addf %349, %350 : vector<8x32xf32>
    %352 = math.tanh %351 : vector<8x32xf32>
    %353 = arith.mulf %346, %352 : vector<8x32xf32>
    %354 = tpu.concatenate %353, %333 in 1 : vector<8x32xf32>, vector<8x32xf32> -> vector<8x64xf32>
    %cst_70 = arith.constant dense<0.000000e+00> : vector<8x128xf32>
    %355 = tpu.matmul %354, %12, %cst_70 {dimension_numbers = #tpu.dot_dimension_numbers<[1], [0], [0], [1], [0, 0, 1, 1], [], []>} : vector<8x64xf32>, vector<64x128xf32>, vector<8x128xf32> -> vector<8x128xf32>
    %356 = vector.broadcast %13 : vector<1x128xf32> to vector<8x128xf32>
    %357 = arith.addf %355, %356 : vector<8x128xf32>
    %358 = vector.extract_strided_slice %357 {offsets = [0, 0], sizes = [8, 96], strides = [1, 1]} : vector<8x128xf32> to vector<8x96xf32>
    %359 = arith.negf %358 : vector<8x96xf32>
    %360 = math.exp %359 : vector<8x96xf32>
    %cst_71 = arith.constant 1.000000e+00 : f32
    %361 = vector.broadcast %cst_71 : f32 to vector<8x96xf32>
    %362 = arith.addf %361, %360 : vector<8x96xf32>
    %363 = arith.divf %361, %362 : vector<8x96xf32>
    %364 = vector.extract_strided_slice %363 {offsets = [0, 0], sizes = [8, 32], strides = [1, 1]} : vector<8x96xf32> to vector<8x32xf32>
    %365 = vector.extract_strided_slice %363 {offsets = [0, 32], sizes = [8, 32], strides = [1, 1]} : vector<8x96xf32> to vector<8x32xf32>
    %366 = vector.extract_strided_slice %363 {offsets = [0, 64], sizes = [8, 32], strides = [1, 1]} : vector<8x96xf32> to vector<8x32xf32>
    %367 = vector.extract_strided_slice %357 {offsets = [0, 96], sizes = [8, 32], strides = [1, 1]} : vector<8x128xf32> to vector<8x32xf32>
    %368 = math.tanh %367 : vector<8x32xf32>
    %369 = arith.mulf %365, %331 : vector<8x32xf32>
    %370 = arith.mulf %364, %368 : vector<8x32xf32>
    %371 = arith.addf %369, %370 : vector<8x32xf32>
    %372 = math.tanh %371 : vector<8x32xf32>
    %373 = arith.mulf %366, %372 : vector<8x32xf32>
    %c9 = arith.constant 9 : index
    %c0_72 = arith.constant 0 : index
    %c0_73 = arith.constant 0 : index
    %374 = vector.load %arg1[%c9, %c0_72, %c0_73] : memref<16x8x128xf32, #tpu.memory_space<vmem>>, vector<1x8x128xf32>
    %375 = vector.shape_cast %374 : vector<1x8x128xf32> to vector<8x128xf32>
    %cst_74 = arith.constant dense<0.000000e+00> : vector<8x128xf32>
    %376 = tpu.matmul %353, %11, %cst_74 {dimension_numbers = #tpu.dot_dimension_numbers<[1], [0], [0], [1], [0, 0, 1, 1], [], []>} : vector<8x32xf32>, vector<32x128xf32>, vector<8x128xf32> -> vector<8x128xf32>
    %377 = arith.addf %375, %376 : vector<8x128xf32>
    %378 = vector.extract_strided_slice %377 {offsets = [0, 0], sizes = [8, 96], strides = [1, 1]} : vector<8x128xf32> to vector<8x96xf32>
    %379 = arith.negf %378 : vector<8x96xf32>
    %380 = math.exp %379 : vector<8x96xf32>
    %cst_75 = arith.constant 1.000000e+00 : f32
    %381 = vector.broadcast %cst_75 : f32 to vector<8x96xf32>
    %382 = arith.addf %381, %380 : vector<8x96xf32>
    %383 = arith.divf %381, %382 : vector<8x96xf32>
    %384 = vector.extract_strided_slice %383 {offsets = [0, 0], sizes = [8, 32], strides = [1, 1]} : vector<8x96xf32> to vector<8x32xf32>
    %385 = vector.extract_strided_slice %383 {offsets = [0, 32], sizes = [8, 32], strides = [1, 1]} : vector<8x96xf32> to vector<8x32xf32>
    %386 = vector.extract_strided_slice %383 {offsets = [0, 64], sizes = [8, 32], strides = [1, 1]} : vector<8x96xf32> to vector<8x32xf32>
    %387 = vector.extract_strided_slice %377 {offsets = [0, 96], sizes = [8, 32], strides = [1, 1]} : vector<8x128xf32> to vector<8x32xf32>
    %388 = math.tanh %387 : vector<8x32xf32>
    %389 = arith.mulf %385, %351 : vector<8x32xf32>
    %390 = arith.mulf %384, %388 : vector<8x32xf32>
    %391 = arith.addf %389, %390 : vector<8x32xf32>
    %392 = math.tanh %391 : vector<8x32xf32>
    %393 = arith.mulf %386, %392 : vector<8x32xf32>
    %394 = tpu.concatenate %393, %373 in 1 : vector<8x32xf32>, vector<8x32xf32> -> vector<8x64xf32>
    %cst_76 = arith.constant dense<0.000000e+00> : vector<8x128xf32>
    %395 = tpu.matmul %394, %12, %cst_76 {dimension_numbers = #tpu.dot_dimension_numbers<[1], [0], [0], [1], [0, 0, 1, 1], [], []>} : vector<8x64xf32>, vector<64x128xf32>, vector<8x128xf32> -> vector<8x128xf32>
    %396 = vector.broadcast %13 : vector<1x128xf32> to vector<8x128xf32>
    %397 = arith.addf %395, %396 : vector<8x128xf32>
    %398 = vector.extract_strided_slice %397 {offsets = [0, 0], sizes = [8, 96], strides = [1, 1]} : vector<8x128xf32> to vector<8x96xf32>
    %399 = arith.negf %398 : vector<8x96xf32>
    %400 = math.exp %399 : vector<8x96xf32>
    %cst_77 = arith.constant 1.000000e+00 : f32
    %401 = vector.broadcast %cst_77 : f32 to vector<8x96xf32>
    %402 = arith.addf %401, %400 : vector<8x96xf32>
    %403 = arith.divf %401, %402 : vector<8x96xf32>
    %404 = vector.extract_strided_slice %403 {offsets = [0, 0], sizes = [8, 32], strides = [1, 1]} : vector<8x96xf32> to vector<8x32xf32>
    %405 = vector.extract_strided_slice %403 {offsets = [0, 32], sizes = [8, 32], strides = [1, 1]} : vector<8x96xf32> to vector<8x32xf32>
    %406 = vector.extract_strided_slice %403 {offsets = [0, 64], sizes = [8, 32], strides = [1, 1]} : vector<8x96xf32> to vector<8x32xf32>
    %407 = vector.extract_strided_slice %397 {offsets = [0, 96], sizes = [8, 32], strides = [1, 1]} : vector<8x128xf32> to vector<8x32xf32>
    %408 = math.tanh %407 : vector<8x32xf32>
    %409 = arith.mulf %405, %371 : vector<8x32xf32>
    %410 = arith.mulf %404, %408 : vector<8x32xf32>
    %411 = arith.addf %409, %410 : vector<8x32xf32>
    %412 = math.tanh %411 : vector<8x32xf32>
    %413 = arith.mulf %406, %412 : vector<8x32xf32>
    %c10 = arith.constant 10 : index
    %c0_78 = arith.constant 0 : index
    %c0_79 = arith.constant 0 : index
    %414 = vector.load %arg1[%c10, %c0_78, %c0_79] : memref<16x8x128xf32, #tpu.memory_space<vmem>>, vector<1x8x128xf32>
    %415 = vector.shape_cast %414 : vector<1x8x128xf32> to vector<8x128xf32>
    %cst_80 = arith.constant dense<0.000000e+00> : vector<8x128xf32>
    %416 = tpu.matmul %393, %11, %cst_80 {dimension_numbers = #tpu.dot_dimension_numbers<[1], [0], [0], [1], [0, 0, 1, 1], [], []>} : vector<8x32xf32>, vector<32x128xf32>, vector<8x128xf32> -> vector<8x128xf32>
    %417 = arith.addf %415, %416 : vector<8x128xf32>
    %418 = vector.extract_strided_slice %417 {offsets = [0, 0], sizes = [8, 96], strides = [1, 1]} : vector<8x128xf32> to vector<8x96xf32>
    %419 = arith.negf %418 : vector<8x96xf32>
    %420 = math.exp %419 : vector<8x96xf32>
    %cst_81 = arith.constant 1.000000e+00 : f32
    %421 = vector.broadcast %cst_81 : f32 to vector<8x96xf32>
    %422 = arith.addf %421, %420 : vector<8x96xf32>
    %423 = arith.divf %421, %422 : vector<8x96xf32>
    %424 = vector.extract_strided_slice %423 {offsets = [0, 0], sizes = [8, 32], strides = [1, 1]} : vector<8x96xf32> to vector<8x32xf32>
    %425 = vector.extract_strided_slice %423 {offsets = [0, 32], sizes = [8, 32], strides = [1, 1]} : vector<8x96xf32> to vector<8x32xf32>
    %426 = vector.extract_strided_slice %423 {offsets = [0, 64], sizes = [8, 32], strides = [1, 1]} : vector<8x96xf32> to vector<8x32xf32>
    %427 = vector.extract_strided_slice %417 {offsets = [0, 96], sizes = [8, 32], strides = [1, 1]} : vector<8x128xf32> to vector<8x32xf32>
    %428 = math.tanh %427 : vector<8x32xf32>
    %429 = arith.mulf %425, %391 : vector<8x32xf32>
    %430 = arith.mulf %424, %428 : vector<8x32xf32>
    %431 = arith.addf %429, %430 : vector<8x32xf32>
    %432 = math.tanh %431 : vector<8x32xf32>
    %433 = arith.mulf %426, %432 : vector<8x32xf32>
    %434 = tpu.concatenate %433, %413 in 1 : vector<8x32xf32>, vector<8x32xf32> -> vector<8x64xf32>
    %cst_82 = arith.constant dense<0.000000e+00> : vector<8x128xf32>
    %435 = tpu.matmul %434, %12, %cst_82 {dimension_numbers = #tpu.dot_dimension_numbers<[1], [0], [0], [1], [0, 0, 1, 1], [], []>} : vector<8x64xf32>, vector<64x128xf32>, vector<8x128xf32> -> vector<8x128xf32>
    %436 = vector.broadcast %13 : vector<1x128xf32> to vector<8x128xf32>
    %437 = arith.addf %435, %436 : vector<8x128xf32>
    %438 = vector.extract_strided_slice %437 {offsets = [0, 0], sizes = [8, 96], strides = [1, 1]} : vector<8x128xf32> to vector<8x96xf32>
    %439 = arith.negf %438 : vector<8x96xf32>
    %440 = math.exp %439 : vector<8x96xf32>
    %cst_83 = arith.constant 1.000000e+00 : f32
    %441 = vector.broadcast %cst_83 : f32 to vector<8x96xf32>
    %442 = arith.addf %441, %440 : vector<8x96xf32>
    %443 = arith.divf %441, %442 : vector<8x96xf32>
    %444 = vector.extract_strided_slice %443 {offsets = [0, 0], sizes = [8, 32], strides = [1, 1]} : vector<8x96xf32> to vector<8x32xf32>
    %445 = vector.extract_strided_slice %443 {offsets = [0, 32], sizes = [8, 32], strides = [1, 1]} : vector<8x96xf32> to vector<8x32xf32>
    %446 = vector.extract_strided_slice %443 {offsets = [0, 64], sizes = [8, 32], strides = [1, 1]} : vector<8x96xf32> to vector<8x32xf32>
    %447 = vector.extract_strided_slice %437 {offsets = [0, 96], sizes = [8, 32], strides = [1, 1]} : vector<8x128xf32> to vector<8x32xf32>
    %448 = math.tanh %447 : vector<8x32xf32>
    %449 = arith.mulf %445, %411 : vector<8x32xf32>
    %450 = arith.mulf %444, %448 : vector<8x32xf32>
    %451 = arith.addf %449, %450 : vector<8x32xf32>
    %452 = math.tanh %451 : vector<8x32xf32>
    %453 = arith.mulf %446, %452 : vector<8x32xf32>
    %c11 = arith.constant 11 : index
    %c0_84 = arith.constant 0 : index
    %c0_85 = arith.constant 0 : index
    %454 = vector.load %arg1[%c11, %c0_84, %c0_85] : memref<16x8x128xf32, #tpu.memory_space<vmem>>, vector<1x8x128xf32>
    %455 = vector.shape_cast %454 : vector<1x8x128xf32> to vector<8x128xf32>
    %cst_86 = arith.constant dense<0.000000e+00> : vector<8x128xf32>
    %456 = tpu.matmul %433, %11, %cst_86 {dimension_numbers = #tpu.dot_dimension_numbers<[1], [0], [0], [1], [0, 0, 1, 1], [], []>} : vector<8x32xf32>, vector<32x128xf32>, vector<8x128xf32> -> vector<8x128xf32>
    %457 = arith.addf %455, %456 : vector<8x128xf32>
    %458 = vector.extract_strided_slice %457 {offsets = [0, 0], sizes = [8, 96], strides = [1, 1]} : vector<8x128xf32> to vector<8x96xf32>
    %459 = arith.negf %458 : vector<8x96xf32>
    %460 = math.exp %459 : vector<8x96xf32>
    %cst_87 = arith.constant 1.000000e+00 : f32
    %461 = vector.broadcast %cst_87 : f32 to vector<8x96xf32>
    %462 = arith.addf %461, %460 : vector<8x96xf32>
    %463 = arith.divf %461, %462 : vector<8x96xf32>
    %464 = vector.extract_strided_slice %463 {offsets = [0, 0], sizes = [8, 32], strides = [1, 1]} : vector<8x96xf32> to vector<8x32xf32>
    %465 = vector.extract_strided_slice %463 {offsets = [0, 32], sizes = [8, 32], strides = [1, 1]} : vector<8x96xf32> to vector<8x32xf32>
    %466 = vector.extract_strided_slice %463 {offsets = [0, 64], sizes = [8, 32], strides = [1, 1]} : vector<8x96xf32> to vector<8x32xf32>
    %467 = vector.extract_strided_slice %457 {offsets = [0, 96], sizes = [8, 32], strides = [1, 1]} : vector<8x128xf32> to vector<8x32xf32>
    %468 = math.tanh %467 : vector<8x32xf32>
    %469 = arith.mulf %465, %431 : vector<8x32xf32>
    %470 = arith.mulf %464, %468 : vector<8x32xf32>
    %471 = arith.addf %469, %470 : vector<8x32xf32>
    %472 = math.tanh %471 : vector<8x32xf32>
    %473 = arith.mulf %466, %472 : vector<8x32xf32>
    %474 = tpu.concatenate %473, %453 in 1 : vector<8x32xf32>, vector<8x32xf32> -> vector<8x64xf32>
    %cst_88 = arith.constant dense<0.000000e+00> : vector<8x128xf32>
    %475 = tpu.matmul %474, %12, %cst_88 {dimension_numbers = #tpu.dot_dimension_numbers<[1], [0], [0], [1], [0, 0, 1, 1], [], []>} : vector<8x64xf32>, vector<64x128xf32>, vector<8x128xf32> -> vector<8x128xf32>
    %476 = vector.broadcast %13 : vector<1x128xf32> to vector<8x128xf32>
    %477 = arith.addf %475, %476 : vector<8x128xf32>
    %478 = vector.extract_strided_slice %477 {offsets = [0, 0], sizes = [8, 96], strides = [1, 1]} : vector<8x128xf32> to vector<8x96xf32>
    %479 = arith.negf %478 : vector<8x96xf32>
    %480 = math.exp %479 : vector<8x96xf32>
    %cst_89 = arith.constant 1.000000e+00 : f32
    %481 = vector.broadcast %cst_89 : f32 to vector<8x96xf32>
    %482 = arith.addf %481, %480 : vector<8x96xf32>
    %483 = arith.divf %481, %482 : vector<8x96xf32>
    %484 = vector.extract_strided_slice %483 {offsets = [0, 0], sizes = [8, 32], strides = [1, 1]} : vector<8x96xf32> to vector<8x32xf32>
    %485 = vector.extract_strided_slice %483 {offsets = [0, 32], sizes = [8, 32], strides = [1, 1]} : vector<8x96xf32> to vector<8x32xf32>
    %486 = vector.extract_strided_slice %483 {offsets = [0, 64], sizes = [8, 32], strides = [1, 1]} : vector<8x96xf32> to vector<8x32xf32>
    %487 = vector.extract_strided_slice %477 {offsets = [0, 96], sizes = [8, 32], strides = [1, 1]} : vector<8x128xf32> to vector<8x32xf32>
    %488 = math.tanh %487 : vector<8x32xf32>
    %489 = arith.mulf %485, %451 : vector<8x32xf32>
    %490 = arith.mulf %484, %488 : vector<8x32xf32>
    %491 = arith.addf %489, %490 : vector<8x32xf32>
    %492 = math.tanh %491 : vector<8x32xf32>
    %493 = arith.mulf %486, %492 : vector<8x32xf32>
    %c12 = arith.constant 12 : index
    %c0_90 = arith.constant 0 : index
    %c0_91 = arith.constant 0 : index
    %494 = vector.load %arg1[%c12, %c0_90, %c0_91] : memref<16x8x128xf32, #tpu.memory_space<vmem>>, vector<1x8x128xf32>
    %495 = vector.shape_cast %494 : vector<1x8x128xf32> to vector<8x128xf32>
    %cst_92 = arith.constant dense<0.000000e+00> : vector<8x128xf32>
    %496 = tpu.matmul %473, %11, %cst_92 {dimension_numbers = #tpu.dot_dimension_numbers<[1], [0], [0], [1], [0, 0, 1, 1], [], []>} : vector<8x32xf32>, vector<32x128xf32>, vector<8x128xf32> -> vector<8x128xf32>
    %497 = arith.addf %495, %496 : vector<8x128xf32>
    %498 = vector.extract_strided_slice %497 {offsets = [0, 0], sizes = [8, 96], strides = [1, 1]} : vector<8x128xf32> to vector<8x96xf32>
    %499 = arith.negf %498 : vector<8x96xf32>
    %500 = math.exp %499 : vector<8x96xf32>
    %cst_93 = arith.constant 1.000000e+00 : f32
    %501 = vector.broadcast %cst_93 : f32 to vector<8x96xf32>
    %502 = arith.addf %501, %500 : vector<8x96xf32>
    %503 = arith.divf %501, %502 : vector<8x96xf32>
    %504 = vector.extract_strided_slice %503 {offsets = [0, 0], sizes = [8, 32], strides = [1, 1]} : vector<8x96xf32> to vector<8x32xf32>
    %505 = vector.extract_strided_slice %503 {offsets = [0, 32], sizes = [8, 32], strides = [1, 1]} : vector<8x96xf32> to vector<8x32xf32>
    %506 = vector.extract_strided_slice %503 {offsets = [0, 64], sizes = [8, 32], strides = [1, 1]} : vector<8x96xf32> to vector<8x32xf32>
    %507 = vector.extract_strided_slice %497 {offsets = [0, 96], sizes = [8, 32], strides = [1, 1]} : vector<8x128xf32> to vector<8x32xf32>
    %508 = math.tanh %507 : vector<8x32xf32>
    %509 = arith.mulf %505, %471 : vector<8x32xf32>
    %510 = arith.mulf %504, %508 : vector<8x32xf32>
    %511 = arith.addf %509, %510 : vector<8x32xf32>
    %512 = math.tanh %511 : vector<8x32xf32>
    %513 = arith.mulf %506, %512 : vector<8x32xf32>
    %514 = tpu.concatenate %513, %493 in 1 : vector<8x32xf32>, vector<8x32xf32> -> vector<8x64xf32>
    %cst_94 = arith.constant dense<0.000000e+00> : vector<8x128xf32>
    %515 = tpu.matmul %514, %12, %cst_94 {dimension_numbers = #tpu.dot_dimension_numbers<[1], [0], [0], [1], [0, 0, 1, 1], [], []>} : vector<8x64xf32>, vector<64x128xf32>, vector<8x128xf32> -> vector<8x128xf32>
    %516 = vector.broadcast %13 : vector<1x128xf32> to vector<8x128xf32>
    %517 = arith.addf %515, %516 : vector<8x128xf32>
    %518 = vector.extract_strided_slice %517 {offsets = [0, 0], sizes = [8, 96], strides = [1, 1]} : vector<8x128xf32> to vector<8x96xf32>
    %519 = arith.negf %518 : vector<8x96xf32>
    %520 = math.exp %519 : vector<8x96xf32>
    %cst_95 = arith.constant 1.000000e+00 : f32
    %521 = vector.broadcast %cst_95 : f32 to vector<8x96xf32>
    %522 = arith.addf %521, %520 : vector<8x96xf32>
    %523 = arith.divf %521, %522 : vector<8x96xf32>
    %524 = vector.extract_strided_slice %523 {offsets = [0, 0], sizes = [8, 32], strides = [1, 1]} : vector<8x96xf32> to vector<8x32xf32>
    %525 = vector.extract_strided_slice %523 {offsets = [0, 32], sizes = [8, 32], strides = [1, 1]} : vector<8x96xf32> to vector<8x32xf32>
    %526 = vector.extract_strided_slice %523 {offsets = [0, 64], sizes = [8, 32], strides = [1, 1]} : vector<8x96xf32> to vector<8x32xf32>
    %527 = vector.extract_strided_slice %517 {offsets = [0, 96], sizes = [8, 32], strides = [1, 1]} : vector<8x128xf32> to vector<8x32xf32>
    %528 = math.tanh %527 : vector<8x32xf32>
    %529 = arith.mulf %525, %491 : vector<8x32xf32>
    %530 = arith.mulf %524, %528 : vector<8x32xf32>
    %531 = arith.addf %529, %530 : vector<8x32xf32>
    %532 = math.tanh %531 : vector<8x32xf32>
    %533 = arith.mulf %526, %532 : vector<8x32xf32>
    %c13 = arith.constant 13 : index
    %c0_96 = arith.constant 0 : index
    %c0_97 = arith.constant 0 : index
    %534 = vector.load %arg1[%c13, %c0_96, %c0_97] : memref<16x8x128xf32, #tpu.memory_space<vmem>>, vector<1x8x128xf32>
    %535 = vector.shape_cast %534 : vector<1x8x128xf32> to vector<8x128xf32>
    %cst_98 = arith.constant dense<0.000000e+00> : vector<8x128xf32>
    %536 = tpu.matmul %513, %11, %cst_98 {dimension_numbers = #tpu.dot_dimension_numbers<[1], [0], [0], [1], [0, 0, 1, 1], [], []>} : vector<8x32xf32>, vector<32x128xf32>, vector<8x128xf32> -> vector<8x128xf32>
    %537 = arith.addf %535, %536 : vector<8x128xf32>
    %538 = vector.extract_strided_slice %537 {offsets = [0, 0], sizes = [8, 96], strides = [1, 1]} : vector<8x128xf32> to vector<8x96xf32>
    %539 = arith.negf %538 : vector<8x96xf32>
    %540 = math.exp %539 : vector<8x96xf32>
    %cst_99 = arith.constant 1.000000e+00 : f32
    %541 = vector.broadcast %cst_99 : f32 to vector<8x96xf32>
    %542 = arith.addf %541, %540 : vector<8x96xf32>
    %543 = arith.divf %541, %542 : vector<8x96xf32>
    %544 = vector.extract_strided_slice %543 {offsets = [0, 0], sizes = [8, 32], strides = [1, 1]} : vector<8x96xf32> to vector<8x32xf32>
    %545 = vector.extract_strided_slice %543 {offsets = [0, 32], sizes = [8, 32], strides = [1, 1]} : vector<8x96xf32> to vector<8x32xf32>
    %546 = vector.extract_strided_slice %543 {offsets = [0, 64], sizes = [8, 32], strides = [1, 1]} : vector<8x96xf32> to vector<8x32xf32>
    %547 = vector.extract_strided_slice %537 {offsets = [0, 96], sizes = [8, 32], strides = [1, 1]} : vector<8x128xf32> to vector<8x32xf32>
    %548 = math.tanh %547 : vector<8x32xf32>
    %549 = arith.mulf %545, %511 : vector<8x32xf32>
    %550 = arith.mulf %544, %548 : vector<8x32xf32>
    %551 = arith.addf %549, %550 : vector<8x32xf32>
    %552 = math.tanh %551 : vector<8x32xf32>
    %553 = arith.mulf %546, %552 : vector<8x32xf32>
    %554 = tpu.concatenate %553, %533 in 1 : vector<8x32xf32>, vector<8x32xf32> -> vector<8x64xf32>
    %cst_100 = arith.constant dense<0.000000e+00> : vector<8x128xf32>
    %555 = tpu.matmul %554, %12, %cst_100 {dimension_numbers = #tpu.dot_dimension_numbers<[1], [0], [0], [1], [0, 0, 1, 1], [], []>} : vector<8x64xf32>, vector<64x128xf32>, vector<8x128xf32> -> vector<8x128xf32>
    %556 = vector.broadcast %13 : vector<1x128xf32> to vector<8x128xf32>
    %557 = arith.addf %555, %556 : vector<8x128xf32>
    %558 = vector.extract_strided_slice %557 {offsets = [0, 0], sizes = [8, 96], strides = [1, 1]} : vector<8x128xf32> to vector<8x96xf32>
    %559 = arith.negf %558 : vector<8x96xf32>
    %560 = math.exp %559 : vector<8x96xf32>
    %cst_101 = arith.constant 1.000000e+00 : f32
    %561 = vector.broadcast %cst_101 : f32 to vector<8x96xf32>
    %562 = arith.addf %561, %560 : vector<8x96xf32>
    %563 = arith.divf %561, %562 : vector<8x96xf32>
    %564 = vector.extract_strided_slice %563 {offsets = [0, 0], sizes = [8, 32], strides = [1, 1]} : vector<8x96xf32> to vector<8x32xf32>
    %565 = vector.extract_strided_slice %563 {offsets = [0, 32], sizes = [8, 32], strides = [1, 1]} : vector<8x96xf32> to vector<8x32xf32>
    %566 = vector.extract_strided_slice %563 {offsets = [0, 64], sizes = [8, 32], strides = [1, 1]} : vector<8x96xf32> to vector<8x32xf32>
    %567 = vector.extract_strided_slice %557 {offsets = [0, 96], sizes = [8, 32], strides = [1, 1]} : vector<8x128xf32> to vector<8x32xf32>
    %568 = math.tanh %567 : vector<8x32xf32>
    %569 = arith.mulf %565, %531 : vector<8x32xf32>
    %570 = arith.mulf %564, %568 : vector<8x32xf32>
    %571 = arith.addf %569, %570 : vector<8x32xf32>
    %572 = math.tanh %571 : vector<8x32xf32>
    %573 = arith.mulf %566, %572 : vector<8x32xf32>
    %c14 = arith.constant 14 : index
    %c0_102 = arith.constant 0 : index
    %c0_103 = arith.constant 0 : index
    %574 = vector.load %arg1[%c14, %c0_102, %c0_103] : memref<16x8x128xf32, #tpu.memory_space<vmem>>, vector<1x8x128xf32>
    %575 = vector.shape_cast %574 : vector<1x8x128xf32> to vector<8x128xf32>
    %cst_104 = arith.constant dense<0.000000e+00> : vector<8x128xf32>
    %576 = tpu.matmul %553, %11, %cst_104 {dimension_numbers = #tpu.dot_dimension_numbers<[1], [0], [0], [1], [0, 0, 1, 1], [], []>} : vector<8x32xf32>, vector<32x128xf32>, vector<8x128xf32> -> vector<8x128xf32>
    %577 = arith.addf %575, %576 : vector<8x128xf32>
    %578 = vector.extract_strided_slice %577 {offsets = [0, 0], sizes = [8, 96], strides = [1, 1]} : vector<8x128xf32> to vector<8x96xf32>
    %579 = arith.negf %578 : vector<8x96xf32>
    %580 = math.exp %579 : vector<8x96xf32>
    %cst_105 = arith.constant 1.000000e+00 : f32
    %581 = vector.broadcast %cst_105 : f32 to vector<8x96xf32>
    %582 = arith.addf %581, %580 : vector<8x96xf32>
    %583 = arith.divf %581, %582 : vector<8x96xf32>
    %584 = vector.extract_strided_slice %583 {offsets = [0, 0], sizes = [8, 32], strides = [1, 1]} : vector<8x96xf32> to vector<8x32xf32>
    %585 = vector.extract_strided_slice %583 {offsets = [0, 32], sizes = [8, 32], strides = [1, 1]} : vector<8x96xf32> to vector<8x32xf32>
    %586 = vector.extract_strided_slice %583 {offsets = [0, 64], sizes = [8, 32], strides = [1, 1]} : vector<8x96xf32> to vector<8x32xf32>
    %587 = vector.extract_strided_slice %577 {offsets = [0, 96], sizes = [8, 32], strides = [1, 1]} : vector<8x128xf32> to vector<8x32xf32>
    %588 = math.tanh %587 : vector<8x32xf32>
    %589 = arith.mulf %585, %551 : vector<8x32xf32>
    %590 = arith.mulf %584, %588 : vector<8x32xf32>
    %591 = arith.addf %589, %590 : vector<8x32xf32>
    %592 = math.tanh %591 : vector<8x32xf32>
    %593 = arith.mulf %586, %592 : vector<8x32xf32>
    %594 = tpu.concatenate %593, %573 in 1 : vector<8x32xf32>, vector<8x32xf32> -> vector<8x64xf32>
    %cst_106 = arith.constant dense<0.000000e+00> : vector<8x128xf32>
    %595 = tpu.matmul %594, %12, %cst_106 {dimension_numbers = #tpu.dot_dimension_numbers<[1], [0], [0], [1], [0, 0, 1, 1], [], []>} : vector<8x64xf32>, vector<64x128xf32>, vector<8x128xf32> -> vector<8x128xf32>
    %596 = vector.broadcast %13 : vector<1x128xf32> to vector<8x128xf32>
    %597 = arith.addf %595, %596 : vector<8x128xf32>
    %598 = vector.extract_strided_slice %597 {offsets = [0, 0], sizes = [8, 96], strides = [1, 1]} : vector<8x128xf32> to vector<8x96xf32>
    %599 = arith.negf %598 : vector<8x96xf32>
    %600 = math.exp %599 : vector<8x96xf32>
    %cst_107 = arith.constant 1.000000e+00 : f32
    %601 = vector.broadcast %cst_107 : f32 to vector<8x96xf32>
    %602 = arith.addf %601, %600 : vector<8x96xf32>
    %603 = arith.divf %601, %602 : vector<8x96xf32>
    %604 = vector.extract_strided_slice %603 {offsets = [0, 0], sizes = [8, 32], strides = [1, 1]} : vector<8x96xf32> to vector<8x32xf32>
    %605 = vector.extract_strided_slice %603 {offsets = [0, 32], sizes = [8, 32], strides = [1, 1]} : vector<8x96xf32> to vector<8x32xf32>
    %606 = vector.extract_strided_slice %603 {offsets = [0, 64], sizes = [8, 32], strides = [1, 1]} : vector<8x96xf32> to vector<8x32xf32>
    %607 = vector.extract_strided_slice %597 {offsets = [0, 96], sizes = [8, 32], strides = [1, 1]} : vector<8x128xf32> to vector<8x32xf32>
    %608 = math.tanh %607 : vector<8x32xf32>
    %609 = arith.mulf %605, %571 : vector<8x32xf32>
    %610 = arith.mulf %604, %608 : vector<8x32xf32>
    %611 = arith.addf %609, %610 : vector<8x32xf32>
    %612 = math.tanh %611 : vector<8x32xf32>
    %613 = arith.mulf %606, %612 : vector<8x32xf32>
    %c15 = arith.constant 15 : index
    %c0_108 = arith.constant 0 : index
    %c0_109 = arith.constant 0 : index
    %614 = vector.load %arg1[%c15, %c0_108, %c0_109] : memref<16x8x128xf32, #tpu.memory_space<vmem>>, vector<1x8x128xf32>
    %615 = vector.shape_cast %614 : vector<1x8x128xf32> to vector<8x128xf32>
    %cst_110 = arith.constant dense<0.000000e+00> : vector<8x128xf32>
    %616 = tpu.matmul %593, %11, %cst_110 {dimension_numbers = #tpu.dot_dimension_numbers<[1], [0], [0], [1], [0, 0, 1, 1], [], []>} : vector<8x32xf32>, vector<32x128xf32>, vector<8x128xf32> -> vector<8x128xf32>
    %617 = arith.addf %615, %616 : vector<8x128xf32>
    %618 = vector.extract_strided_slice %617 {offsets = [0, 0], sizes = [8, 96], strides = [1, 1]} : vector<8x128xf32> to vector<8x96xf32>
    %619 = arith.negf %618 : vector<8x96xf32>
    %620 = math.exp %619 : vector<8x96xf32>
    %cst_111 = arith.constant 1.000000e+00 : f32
    %621 = vector.broadcast %cst_111 : f32 to vector<8x96xf32>
    %622 = arith.addf %621, %620 : vector<8x96xf32>
    %623 = arith.divf %621, %622 : vector<8x96xf32>
    %624 = vector.extract_strided_slice %623 {offsets = [0, 0], sizes = [8, 32], strides = [1, 1]} : vector<8x96xf32> to vector<8x32xf32>
    %625 = vector.extract_strided_slice %623 {offsets = [0, 32], sizes = [8, 32], strides = [1, 1]} : vector<8x96xf32> to vector<8x32xf32>
    %626 = vector.extract_strided_slice %623 {offsets = [0, 64], sizes = [8, 32], strides = [1, 1]} : vector<8x96xf32> to vector<8x32xf32>
    %627 = vector.extract_strided_slice %617 {offsets = [0, 96], sizes = [8, 32], strides = [1, 1]} : vector<8x128xf32> to vector<8x32xf32>
    %628 = math.tanh %627 : vector<8x32xf32>
    %629 = arith.mulf %625, %591 : vector<8x32xf32>
    %630 = arith.mulf %624, %628 : vector<8x32xf32>
    %631 = arith.addf %629, %630 : vector<8x32xf32>
    %632 = math.tanh %631 : vector<8x32xf32>
    %633 = arith.mulf %626, %632 : vector<8x32xf32>
    %634 = tpu.concatenate %633, %613 in 1 : vector<8x32xf32>, vector<8x32xf32> -> vector<8x64xf32>
    %cst_112 = arith.constant dense<0.000000e+00> : vector<8x128xf32>
    %635 = tpu.matmul %634, %12, %cst_112 {dimension_numbers = #tpu.dot_dimension_numbers<[1], [0], [0], [1], [0, 0, 1, 1], [], []>} : vector<8x64xf32>, vector<64x128xf32>, vector<8x128xf32> -> vector<8x128xf32>
    %636 = vector.broadcast %13 : vector<1x128xf32> to vector<8x128xf32>
    %637 = arith.addf %635, %636 : vector<8x128xf32>
    %638 = vector.extract_strided_slice %637 {offsets = [0, 0], sizes = [8, 96], strides = [1, 1]} : vector<8x128xf32> to vector<8x96xf32>
    %639 = arith.negf %638 : vector<8x96xf32>
    %640 = math.exp %639 : vector<8x96xf32>
    %cst_113 = arith.constant 1.000000e+00 : f32
    %641 = vector.broadcast %cst_113 : f32 to vector<8x96xf32>
    %642 = arith.addf %641, %640 : vector<8x96xf32>
    %643 = arith.divf %641, %642 : vector<8x96xf32>
    %644 = vector.extract_strided_slice %643 {offsets = [0, 0], sizes = [8, 32], strides = [1, 1]} : vector<8x96xf32> to vector<8x32xf32>
    %645 = vector.extract_strided_slice %643 {offsets = [0, 32], sizes = [8, 32], strides = [1, 1]} : vector<8x96xf32> to vector<8x32xf32>
    %646 = vector.extract_strided_slice %643 {offsets = [0, 64], sizes = [8, 32], strides = [1, 1]} : vector<8x96xf32> to vector<8x32xf32>
    %647 = vector.extract_strided_slice %637 {offsets = [0, 96], sizes = [8, 32], strides = [1, 1]} : vector<8x128xf32> to vector<8x32xf32>
    %648 = math.tanh %647 : vector<8x32xf32>
    %649 = arith.mulf %645, %611 : vector<8x32xf32>
    %650 = arith.mulf %644, %648 : vector<8x32xf32>
    %651 = arith.addf %649, %650 : vector<8x32xf32>
    %652 = math.tanh %651 : vector<8x32xf32>
    %653 = arith.mulf %646, %652 : vector<8x32xf32>
    %c0_114 = arith.constant 0 : index
    %c0_115 = arith.constant 0 : index
    %c0_116 = arith.constant 0 : index
    %654 = vector.load %arg7[%c0_114, %c0_115, %c0_116] : memref<2x8x32xf32, #tpu.memory_space<vmem>>, vector<1x8x32xf32>
    %655 = vector.shape_cast %654 : vector<1x8x32xf32> to vector<8x32xf32>
    %656 = vector.shape_cast %633 : vector<8x32xf32> to vector<1x8x32xf32>
    tpu.vector_store %arg7[%c0_114, %c0_115, %c0_116], %656 {strides = array<i32>} : memref<2x8x32xf32, #tpu.memory_space<vmem>>, vector<1x8x32xf32>,
    %c0_117 = arith.constant 0 : index
    %c0_118 = arith.constant 0 : index
    %c0_119 = arith.constant 0 : index
    %657 = vector.load %arg8[%c0_117, %c0_118, %c0_119] : memref<2x8x32xf32, #tpu.memory_space<vmem>>, vector<1x8x32xf32>
    %658 = vector.shape_cast %657 : vector<1x8x32xf32> to vector<8x32xf32>
    %659 = vector.shape_cast %631 : vector<8x32xf32> to vector<1x8x32xf32>
    tpu.vector_store %arg8[%c0_117, %c0_118, %c0_119], %659 {strides = array<i32>} : memref<2x8x32xf32, #tpu.memory_space<vmem>>, vector<1x8x32xf32>,
    %c1_120 = arith.constant 1 : index
    %c0_121 = arith.constant 0 : index
    %c0_122 = arith.constant 0 : index
    %660 = vector.load %arg7[%c1_120, %c0_121, %c0_122] : memref<2x8x32xf32, #tpu.memory_space<vmem>>, vector<1x8x32xf32>
    %661 = vector.shape_cast %660 : vector<1x8x32xf32> to vector<8x32xf32>
    %662 = vector.shape_cast %653 : vector<8x32xf32> to vector<1x8x32xf32>
    tpu.vector_store %arg7[%c1_120, %c0_121, %c0_122], %662 {strides = array<i32>} : memref<2x8x32xf32, #tpu.memory_space<vmem>>, vector<1x8x32xf32>,
    %c1_123 = arith.constant 1 : index
    %c0_124 = arith.constant 0 : index
    %c0_125 = arith.constant 0 : index
    %663 = vector.load %arg8[%c1_123, %c0_124, %c0_125] : memref<2x8x32xf32, #tpu.memory_space<vmem>>, vector<1x8x32xf32>
    %664 = vector.shape_cast %663 : vector<1x8x32xf32> to vector<8x32xf32>
    %665 = vector.shape_cast %651 : vector<8x32xf32> to vector<1x8x32xf32>
    tpu.vector_store %arg8[%c1_123, %c0_124, %c0_125], %665 {strides = array<i32>} : memref<2x8x32xf32, #tpu.memory_space<vmem>>, vector<1x8x32xf32>,
    %c1_i32 = arith.constant 1 : i32
    %666 = arith.cmpi eq, %arg0, %c1_i32 : i32
    %667 = arith.extui %666 : i1 to i32
    %c0_i32_126 = arith.constant 0 : i32
    %668 = arith.cmpi ne, %667, %c0_i32_126 : i32
    scf.if %668 {
      %c0_127 = arith.constant 0 : index
      %c0_128 = arith.constant 0 : index
      %669 = vector.load %arg5[%c0_127, %c0_128] : memref<32x16xf32, #tpu.memory_space<vmem>>, vector<32x16xf32>
      %cst_129 = arith.constant dense<0.000000e+00> : vector<8x16xf32>
      %670 = tpu.matmul %653, %669, %cst_129 {dimension_numbers = #tpu.dot_dimension_numbers<[1], [0], [0], [1], [0, 0, 1, 1], [], []>} : vector<8x32xf32>, vector<32x16xf32>, vector<8x16xf32> -> vector<8x16xf32>
      %c0_130 = arith.constant 0 : index
      %c0_131 = arith.constant 0 : index
      %671 = vector.load %arg6[%c0_130, %c0_131] : memref<1x16xf32, #tpu.memory_space<vmem>>, vector<1x16xf32>
      %672 = vector.broadcast %671 : vector<1x16xf32> to vector<8x16xf32>
      %673 = arith.addf %670, %672 : vector<8x16xf32>
      %c0_132 = arith.constant 0 : index
      %c0_133 = arith.constant 0 : index
      %674 = vector.load %arg9[%c0_132, %c0_133] : memref<8x16xf32, #tpu.memory_space<vmem>>, vector<8x16xf32>
      tpu.vector_store %arg9[%c0_132, %c0_133], %673 {strides = array<i32>} : memref<8x16xf32, #tpu.memory_space<vmem>>, vector<8x16xf32>,
    } else {
    }
    return
  }
  func.func @transform_0(%arg0: i32) -> (i32, i32, i32) {
    %c0_i32 = arith.constant 0 : i32
    %c0_i32_0 = arith.constant 0 : i32
    %c0_i32_1 = arith.constant 0 : i32
    return %arg0, %c0_i32, %c0_i32_0 : i32, i32, i32
  }
  func.func @transform_1(%arg0: i32) -> (i32, i32) {
    %c0_i32 = arith.constant 0 : i32
    %c0_i32_0 = arith.constant 0 : i32
    %c0_i32_1 = arith.constant 0 : i32
    return %c0_i32, %c0_i32_0 : i32, i32
  }
  func.func @transform_2(%arg0: i32) -> (i32, i32) {
    %c0_i32 = arith.constant 0 : i32
    %c0_i32_0 = arith.constant 0 : i32
    %c0_i32_1 = arith.constant 0 : i32
    return %c0_i32, %c0_i32_0 : i32, i32
  }
  func.func @transform_3(%arg0: i32) -> (i32, i32) {
    %c0_i32 = arith.constant 0 : i32
    %c0_i32_0 = arith.constant 0 : i32
    %c0_i32_1 = arith.constant 0 : i32
    return %c0_i32, %c0_i32_0 : i32, i32
  }
  func.func @transform_4(%arg0: i32) -> (i32, i32) {
    %c0_i32 = arith.constant 0 : i32
    %c0_i32_0 = arith.constant 0 : i32
    %c0_i32_1 = arith.constant 0 : i32
    return %c0_i32, %c0_i32_0 : i32, i32
  }
  func.func @transform_5(%arg0: i32) -> (i32, i32) {
    %c0_i32 = arith.constant 0 : i32
    %c0_i32_0 = arith.constant 0 : i32
    %c0_i32_1 = arith.constant 0 : i32
    return %c0_i32, %c0_i32_0 : i32, i32
  }
  func.func @transform_6(%arg0: i32) -> (i32, i32, i32) {
    %c0_i32 = arith.constant 0 : i32
    %c0_i32_0 = arith.constant 0 : i32
    %c0_i32_1 = arith.constant 0 : i32
    %c0_i32_2 = arith.constant 0 : i32
    return %c0_i32, %c0_i32_0, %c0_i32_1 : i32, i32, i32
  }
  func.func @transform_7(%arg0: i32) -> (i32, i32, i32) {
    %c0_i32 = arith.constant 0 : i32
    %c0_i32_0 = arith.constant 0 : i32
    %c0_i32_1 = arith.constant 0 : i32
    %c0_i32_2 = arith.constant 0 : i32
    return %c0_i32, %c0_i32_0, %c0_i32_1 : i32, i32, i32
  }
  func.func @transform_8(%arg0: i32) -> (i32, i32) {
    %c0_i32 = arith.constant 0 : i32
    %c0_i32_0 = arith.constant 0 : i32
    %c0_i32_1 = arith.constant 0 : i32
    return %c0_i32, %c0_i32_0 : i32, i32
  }
}

</mosaic_0001>

<bundles_post_ra>
// kernel: tpu_custom_call.1
= control target key start
LH: loop header
LB: loop body
LE: loop exit
PB: predicated region body
PF: predicated region fallthrough
CT: control target
= control target key end

     0   :  { %s4100_s0 = inlined_call_operand.hbm [shape: f32[32,8,128], index: 0, kind: input, shape index: {}]   ;;  %s4101_s1 = inlined_call_operand.vmem [shape: f32[32,128], index: 1, kind: input, shape index: {}]   ;;  %s4102_s2 = inlined_call_operand.hbm [shape: f32[64,128], index: 2, kind: input, shape index: {}]   ;;  %s4103_s3 = inlined_call_operand.vmem [shape: f32[1,128], index: 3, kind: input, shape index: {}]   ;;  %s4104_s4 = inlined_call_operand.vmem [shape: f32[32,16], index: 4, kind: input, shape index: {}]   ;;  %s4105_s5 = inlined_call_operand.vmem [shape: f32[1,16], index: 5, kind: input, shape index: {}]   ;;  %s4106_s6 = inlined_call_operand.hbm [shape: f32[2,8,32], index: 6, kind: output, shape index: {0}]   ;;  %s4107_s7 = inlined_call_operand.hbm [shape: f32[2,8,32], index: 7, kind: output, shape index: {1}]   ;;  %s4108_s8 = inlined_call_operand.hbm [shape: f32[8,16], index: 8, kind: output, shape index: {2}]  }
   0x1   :  { %4109 = sst [smem:[#allocation15_spill]] %s4102_s2 }
   0x2   :  { %14 = vsyncpa [#allocation3], 0 }
   0x3   :  { %16 = vsyncpa [#allocation3 + $0x1], 0 }
   0x4   :  { %17 = vsyncpa [#allocation6], 0 }
   0x5   :  { %18 = vsyncpa [#allocation4], 0 }
   0x6   :  { %19 = vsyncpa [#allocation9], 0  ;;  %s3341_s27 = smov 0   ;;  %s3343_s28 = smov 0  }
   0x7   :  { %s3345_s29 = smov 0   ;;  %s3347_s30 = smov 0  }
   0x8 LB: > { %s3360_s9 = sadd.s32 4294967295, %s3282_s30   ;;  %p45_p0 = scmp.ne.s32.totalorder %s3274_s28, %s3270_s27  ;;  %s3282_s30 = sphi %s3347_s30, %s4117_s30   ;;  %s3278_s29 = sphi %s3345_s29, %s4116_s29   ;;  %s3274_s28 = sphi %s3343_s28, %s4115_s28   ;;  %s3270_s27 = sphi %s3341_s27, %s4114_s27  }
   0x9   : > { %p46_p1 = scmp.eq.s32.totalorder %s3360_s9, 0  ;;  %p2638_p2 = scmp.ge.s32.totalorder %s3282_s30, 1 }
   0xa   : > { %p224_p3 = scmp.lt.s32.totalorder %s3282_s30, 3  ;;  %p2639_p4 = scmp.ne.s32.totalorder %s3360_s9, 0 }
   0xb   : > { %p3369_p5 = por %p46_p1, %p45_p0  ;;  %s4111_s2 = sld [smem:[#allocation15_spill]] }
   0xc   : > { %p3376_p6 = pnand %p2638_p2, %p224_p3  ;;  %s3284_s15 = smov [#allocation5]  }
   0xd   : > { %s240_s16 = sshll.u32 %s3284_s15, 4  ;;  %s3385_s17 = sadd.s32 1, %s3282_s30   ;;  %s241_s16 = int_to_ptr.vmem [resolvable:$true] %s240_s16 }
   0xe   : > { %p2756_p7 = pneg %p3376_p6  ;;  %s3285_s18 = smov 128  }
   0xf   : > { %s3286_s19 = smov 8   ;;  %s29_s20 = ssub.s32 %s3282_s30, %s3385_s17 }
  0x10   : > { %p2757_p8 = pnand %p2756_p7, %p46_p1  ;;  %s32_s21 = sadd.s32 1, %s3278_s29 }
  0x11   : > { %s238_s13 = sshll.u32 %s4111_s2, 4  ;;  %p30_p9 = scmp.eq.s32.totalorder %s29_s20, 0  ;;  %s239_s13 = int_to_ptr.hbm [resolvable:$true] %s238_s13 }
  0x12   : > { %2759 = dma.hbm_to_vmem [thread:$0]  (!%p2757_p8), %s239_s13, 1024, %s241_s16, [#allocation6], %s3285_s18, %s3285_s18, %s3286_s19  }
  0x13   : > { %p39_p10 = scmp.ne.s32.totalorder %s3278_s29, %s3274_s28  ;;  %p40_p11 = scmp.eq.s32.totalorder %s3282_s30, 0 }
  0x14   : > { %p2765_p12 = scmp.lt.s32.totalorder %s3282_s30, 2  ;;  %s263_s23 = sand.u32 1, %s3278_s29  }
  0x15   : > { %s3398_s22 = scalar_select %p30_p9, %s3278_s29, %s32_s21  }
  0x16   : > { %p41_p13 = por %p40_p11, %p39_p10  ;;  %s2641_s24 = sshll.u32 %s263_s23, 7 }
  0x17   : > { %s2737_s25 = sshll.u32 %s3282_s30, 7  ;;  %s267_s12 = scalar_lea.vmem [#allocation2], %s2641_s24 }
  0x18   : > { %s272_s11 = scalar_lea.hbm %s4100_s0, %s2737_s25  ;;  %s275_s15 = sshll.u32 %s267_s12, 4  ;;  %s276_s15 = int_to_ptr.vmem [resolvable:$true] %s275_s15 }
  0x19   : > { %s273_s2 = sshll.u32 %s272_s11, 4  ;;  %p3405_p0 = pnand %p2765_p12, %p41_p13  ;;  %s274_s2 = int_to_ptr.hbm [resolvable:$true] %s273_s2 }
  0x1a   : > { %s264_s16 = scalar_lea.sflag [#allocation3], %s263_s23  ;;  %s3122_s20 = sshra.s32 %s274_s2, 4  ;;  %s3123_s20 = int_to_ptr.hbm [resolvable:$true] %s3122_s20 }
  0x1b   : > { %s3124_s21 = scalar_lea.hbm %s3123_s20, 128  ;;  %p3126_p3 = pneg %p3405_p0 }
  0x1c   : > { %p3125_p2 = scmp.ne.s32.totalorder %s3123_s20, %s3124_s21  ;;  %s3129_s25 = scalar_lea.hbm %s4100_s0, 256 }
  0x1d   : > { %p3130_p9 = scmp.lt.s32.totalorder %s3123_s20, %s4100_s0  ;;  %p3131_p10 = scmp.lt.s32.totalorder %s3129_s25, %s3124_s21 }
  0x1e   : > { %p3127_p7 = pnand %p3126_p3, %p3125_p2 }
  0x1f   : > { %p3132_p11 = por %p3131_p10, %p3130_p9 }
  0x20   : > { %p3128_p8 = pneg %p3127_p7 }
  0x22   : > { %p3133_p12 = pnand %p3132_p11, %p3128_p8 }
  0x24   : > { %3136 = shalt.err (!%p3133_p12)
}
  0x25   : > { %2763 = dma.hbm_to_vmem [thread:$0]  (!%p3405_p0), %s274_s2, 2048, %s276_s15, %s264_s16, %s3285_s18, %s3285_s18, %s3286_s19  }
  0x26   : > { %287 = sbr.rel (%p3376_p6) target bundleno = 10123 (0x278b), region = 44  ;;  %s289_s23 = sand.u32 (!%p3376_p6), 1, %s3274_s28  }
  0x27   : > { %s2645_s11 = sshll.u32 (!%p3376_p6), %s289_s23, 7  ;;  %s290_s12 = scalar_lea.sflag (!%p3376_p6), [#allocation3], %s289_s23 }
  0x28   : > { %s3425_s30 = scalar_lea.vmem (!%p3376_p6), [#allocation2], %s2645_s11 }
  0x2b   : > { %3253 = dma.done.wait (%p3369_p5), %s290_s12, 2048  }
  0x2c   : > { %3255 = vsyncadd (%p3369_p5), %s290_s12, 4294965248 }
  0x2d   : > { %3257 = dma.done.wait (%p46_p1), [#allocation6], 1024  }
  0x2e   : > { %3259 = vsyncadd (%p46_p1), [#allocation6], 4294966272  ;;  %331 = sbr.rel (%p2639_p4) target bundleno = 56 (0x38), region = 56 }
  0x33   : > { %vm332_vm0 = vcmask 261120   ;;  %v3287_v0 = vmov 0.0  }
  0x34   : > { %333 = vst.msk [vmem:[#allocation7] sm:$0xff] %vm332_vm0, %v3287_v0 }
  0x35   : > { %334 = vst.msk [vmem:[#allocation7 + $0x8] sm:$0xff] %vm332_vm0, %v3287_v0 }
  0x36   : > { %335 = vst.msk [vmem:[#allocation8] sm:$0xff] %vm332_vm0, %v3287_v0 }
  0x37   : > { %336 = vst.msk [vmem:[#allocation8 + $0x8] sm:$0xff] %vm332_vm0, %v3287_v0 }
  0x38 PF: > { %v3440_v1 = vld [vmem:[%s4101_s1 + $0x18] sm:$0xff]  ;;  %v3445_v2 = vld [vmem:[%s4101_s1 + $0x10] sm:$0xff]  ;;  %v3452_v3 = vld [vmem:[%s4101_s1 + $0x8] sm:$0xff]  ;;  %vm357_vm1 = vcmask 261120   ;;  %s3288_s20 = smov 32   ;;  %s3289_s21 = smov 64  }
  0x39   : > { %373 = vmatpush.msra.mxu0 %v3440_v1  ;;  %516 = vmatpush.msra.mxu2 %v3440_v1  ;;  %v3459_v4 = vld [vmem:[%s4101_s1] sm:$0xff]  ;;  %v3482_v31 = vld [vmem:[#allocation5 + $0x38] sm:$0xff]  ;;  %v3484_v32 = vld [vmem:[#allocation5 + $0x30] sm:$0xff]  ;;  %vm435_vm6 = vcmask 523264   ;;  %s3290_s26 = smov 96   ;;  %p2727_p1 = scmp.ne.s32.totalorder %s3360_s9, 1 }
  0x3a   : > { %v356_v6 = vld [vmem:[%s3425_s30] sm:$0xff]  ;;  %447 = vmatpush.msra.mxu1 %v3482_v31  ;;  %582 = vmatpush.msra.mxu3 %v3482_v31  ;;  %v3488_v33 = vld [vmem:[#allocation5 + $0x28] sm:$0xff]  ;;  %v3502_v38 = vld [vmem:[#allocation5 + $0x18] sm:$0xff] }
  0x3b   : > { %374 = vmatpush.msra.mxu0 %v3445_v2  ;;  %517 = vmatpush.msra.mxu2 %v3445_v2  ;;  %v337_v5 = vld [vmem:[#allocation7] sm:$0xff]  ;;  %v3505_v39 = vld [vmem:[#allocation5 + $0x10] sm:$0xff]  ;;  %v3510_v40 = vld [vmem:[#allocation5 + $0x8] sm:$0xff] }
  0x3c   : > { %448 = vmatpush.msra.mxu1 %v3484_v32  ;;  %583 = vmatpush.msra.mxu3 %v3484_v32  ;;  %v339_v36 = vld [vmem:[#allocation7 + $0x8] sm:$0xff]  ;;  %v3499_v37 = vld [vmem:[#allocation5 + $0x20] sm:$0xff] }
  0x3d   : > { %375 = vmatpush.msra.mxu0 %v3452_v3  ;;  %518 = vmatpush.msra.mxu2 %v3452_v3  ;;  %v340_v10 = vld [vmem:[#allocation8] sm:$0xff]  ;;  %v3518_v41 = vld [vmem:[#allocation5] sm:$0xff]  ;;  %v2652_v46 = vld [vmem:[%s3425_s30 + $0x8] sm:$0xff] }
  0x3e   : > { %449 = vmatpush.msra.mxu1 %v3488_v33  ;;  %584 = vmatpush.msra.mxu3 %v3488_v33  ;;  %v342_v42 = vld [vmem:[#allocation8 + $0x8] sm:$0xff]  ;;  %v3556_v48 = vld [vmem:[%s4103_s3] ss:$0 sm:$0xff] }
  0x3f   : > { %376 = vmatpush.msra.mxu0 %v3459_v4  ;;  %519 = vmatpush.msra.mxu2 %v3459_v4 }
  0x40   : > { %2648 = vmatmul.msk.f32.vlgmr.msra.gmra.mxu0 %vm357_vm1, %v337_v5  ;;  %450 = vmatpush.msra.mxu1 %v3499_v37 }
  0x41   : > { %647 = vmatpush.msrb.mxu0 %v3440_v1  ;;  %713 = vmatpush.msrb.mxu2 %v3482_v31 }
  0x42   : > { %585 = vmatpush.msra.mxu3 %v3499_v37  ;;  %451 = vmatpush.msra.mxu1 %v3502_v38 }
  0x43   : > { %648 = vmatpush.msrb.mxu0 %v3445_v2  ;;  %714 = vmatpush.msrb.mxu2 %v3484_v32 }
  0x44   : > { %586 = vmatpush.msra.mxu3 %v3502_v38  ;;  %452 = vmatpush.msra.mxu1 %v3505_v39 }
  0x45   : > { %649 = vmatpush.msrb.mxu0 %v3452_v3  ;;  %715 = vmatpush.msrb.mxu2 %v3488_v33 }
  0x46   : > { %587 = vmatpush.msra.mxu3 %v3505_v39  ;;  %453 = vmatpush.msra.mxu1 %v3510_v40 }
  0x47   : > { %650 = vmatpush.msrb.mxu0 %v3459_v4  ;;  %716 = vmatpush.msrb.mxu2 %v3499_v37 }
  0x48   : > { %588 = vmatpush.msra.mxu3 %v3510_v40  ;;  %454 = vmatpush.msra.mxu1 %v3518_v41 }
  0x49   : > { %778 = vmatpush.msra.mxu0 %v3440_v1  ;;  %717 = vmatpush.msrb.mxu2 %v3502_v38 }
  0x4a   : > { %589 = vmatpush.msra.mxu3 %v3518_v41  ;;  %844 = vmatpush.msrb.mxu1 %v3482_v31 }
  0x4b   : > { %779 = vmatpush.msra.mxu0 %v3445_v2  ;;  %718 = vmatpush.msrb.mxu2 %v3505_v39 }
  0x4c   : > { %909 = vmatpush.msrb.mxu3 %v3440_v1  ;;  %845 = vmatpush.msrb.mxu1 %v3484_v32 }
  0x4d   : > { %780 = vmatpush.msra.mxu0 %v3452_v3  ;;  %719 = vmatpush.msrb.mxu2 %v3510_v40 }
  0x4e   : > { %910 = vmatpush.msrb.mxu3 %v3445_v2  ;;  %846 = vmatpush.msrb.mxu1 %v3488_v33 }
  0x4f   : > { %781 = vmatpush.msra.mxu0 %v3459_v4  ;;  %720 = vmatpush.msrb.mxu2 %v3518_v41 }
  0x50   : > { %911 = vmatpush.msrb.mxu3 %v3452_v3  ;;  %847 = vmatpush.msrb.mxu1 %v3499_v37 }
  0x52   : > { %912 = vmatpush.msrb.mxu3 %v3459_v4  ;;  %848 = vmatpush.msrb.mxu1 %v3502_v38 }
  0x54   : > { %849 = vmatpush.msrb.mxu1 %v3505_v39 }
  0x56   : > { %850 = vmatpush.msrb.mxu1 %v3510_v40 }
  0x58   : > { %851 = vmatpush.msrb.mxu1 %v3518_v41 }
  0xbd   : > { %v378_v7 = vpop.f32.mrf.mxu0 }
  0xbe   : > { %v381_v8 = vadd.f32 %v378_v7, %v356_v6 }
  0xc0   : > { %2818 = vtanh.f32 %v381_v8  ;;  %v2649_v11 = vmul.f32 -1.442695, %v381_v8 }
  0xc2   : > { %2820 = vpow2.f32 %v2649_v11 }
  0xc6   : > { %v2819_v9 = vpop.eup %2818 }
  0xc7   : > { %408 = vrot.lane.b32.xlu0 %v2819_v9, %s3288_s20 }
  0xc8   : > { %v2821_v12 = vpop.eup %2820 }
  0xc9   : > { %v385_v13 = vadd.f32 1.0, %v2821_v12 }
  0xcb   : > { %2822 = vrcp.f32 %v385_v13  ;;  %v397_v19 = vand.u32 2147483648, %v385_v13  ;;  %vm391_vm3 = vweird.f32 %v385_v13  ;;  %v395_v20 = vand.u32 2147483647, %v385_v13 }
  0xcd   : > { %v398_v22 = vor.u32 1.1754944e-38, %v397_v19  ;;  %vm396_vm5 = vcmp.eq.f32.partialorder %v395_v20, 8.507059e+37 }
  0xcf   : > { %403 = vrot.lane.b32.xlu0 %v340_v10, %s3288_s20 }
  0xd1   : > { %v2823_v14 = vpop.eup %2822 }
  0xd2   : > { %v387_v15 = vmul.f32 %v2823_v14, %v385_v13  ;;  %vm392_vm2 = vweird.f32 %v2823_v14 }
  0xd3   : > { %vm393_vm4 = vmor %vm391_vm3, %vm392_vm2 }
  0xd4   : > { %v388_v16 = vsub.f32 1.0, %v387_v15 }
  0xd6   : > { %v389_v17 = vmul.f32 %v2823_v14, %v388_v16 }
  0xd8   : > { %v390_v18 = vadd.f32 %v2823_v14, %v389_v17 }
  0xda   : > { %v394_v21 = vsel %vm393_vm4, %v2823_v14, %v390_v18 }
  0xdb   : > { %v399_v24 = vsel %vm396_vm5, %v398_v22, %v394_v21 }
 0x139   : > { %v409_v23 = vpop.permute.xlu0 %408 }
 0x13a   : > { %v411_v25 = vmul.f32 %v409_v23, %v399_v24 }
 0x13c   : > { %413 = vrot.lane.b32.xlu1 %v411_v25, %s3288_s20 }
 0x141   : > { %v404_v26 = vpop.permute.xlu0 %403 }
 0x142   : > { %v406_v27 = vmul.f32 %v404_v26, %v399_v24 }
 0x1ae   : > { %v414_v28 = vpop.permute.xlu1 %413 }
 0x1af   : > { %v3478_v29 = vadd.f32 %v414_v28, %v406_v27 }
 0x1b1   : > { %2824 = vtanh.f32 %v3478_v29 }
 0x1b7   : > { %v2825_v30 = vpop.eup %2824 }
 0x1b8   : > { %419 = vrot.lane.b32.xlu1 %v2825_v30, %s3288_s20 }
 0x22a   : > { %v420_v34 = vpop.permute.xlu1 %419 }
 0x22b   : > { %v422_v35 = vmul.f32 %v420_v34, %v399_v24 }
 0x22d   : > { %424 = vrot.lane.b32.xlu2 %v422_v35, %s3289_s21 }
 0x235   : > { %428 = vrot.lane.b32.xlu2 %v339_v36, %s3288_s20 }
 0x23d   : > { %480 = vrot.lane.b32.xlu2 %v342_v42, %s3288_s20 }
 0x287   : > { %v425_v43 = vpop.permute.xlu2 %424 }
 0x288   : > { %2653 = vmatmul.msk.f32.vlgmr.msra.gmra.mxu2 %vm357_vm1, %v425_v43 }
 0x289   : > { %1040 = vmatpush.msra.mxu2 %v3440_v1 }
 0x28b   : > { %1041 = vmatpush.msra.mxu2 %v3445_v2 }
 0x28d   : > { %1042 = vmatpush.msra.mxu2 %v3452_v3 }
 0x28f   : > { %v429_v44 = vpop.permute.xlu2 %428  ;;  %1043 = vmatpush.msra.mxu2 %v3459_v4 }
 0x290   : > { %v431_v45 = vsel %vm357_vm1, %v425_v43, %v429_v44 }
 0x291   : > { %2650 = vmatmul.msk.f32.vlgmr.msra.gmra.mxu1 %vm435_vm6, %v431_v45 }
 0x292   : > { %1368 = vmatpush.msra.mxu1 %v3482_v31 }
 0x294   : > { %1369 = vmatpush.msra.mxu1 %v3484_v32 }
 0x296   : > { %1370 = vmatpush.msra.mxu1 %v3488_v33 }
 0x297   : > { %v481_v24 = vpop.permute.xlu2 %480 }
 0x298   : > { %1371 = vmatpush.msra.mxu1 %v3499_v37 }
 0x29a   : > { %1372 = vmatpush.msra.mxu1 %v3502_v38 }
 0x29c   : > { %1373 = vmatpush.msra.mxu1 %v3505_v39 }
 0x29e   : > { %1374 = vmatpush.msra.mxu1 %v3510_v40 }
 0x2a0   : > { %1375 = vmatpush.msra.mxu1 %v3518_v41 }
 0x30b   : > { %v521_v47 = vpop.f32.mrf.mxu2 }
 0x30c   : > { %v524_v49 = vadd.f32 %v2652_v46, %v521_v47 }
 0x30e   : > { %2826 = vtanh.f32 %v524_v49  ;;  %v456_v50 = vpop.f32.mrf.mxu1  ;;  %v2654_v54 = vmul.f32 -1.442695, %v524_v49  ;;  %v2657_v49 = vld [vmem:[%s3425_s30 + $0x10] sm:$0xff] }
 0x30f   : > { %v457_v51 = vadd.f32 %v3556_v48, %v456_v50 }
 0x311   : > { %2828 = vtanh.f32 %v457_v51  ;;  %v2651_v55 = vmul.f32 -1.442695, %v457_v51 }
 0x312   : > { %2830 = vpow2.f32 %v2654_v54 }
 0x313   : > { %2832 = vpow2.f32 %v2651_v55 }
 0x314   : > { %v2827_v52 = vpop.eup %2826 }
 0x315   : > { %547 = vrot.lane.b32.xlu1 %v2827_v52, %s3288_s20 }
 0x317   : > { %v2829_v53 = vpop.eup %2828 }
 0x318   : > { %485 = vrot.lane.b32.xlu0 %v2829_v53, %s3288_s20  ;;  %v2831_v56 = vpop.eup %2830 }
 0x319   : > { %v2833_v57 = vpop.eup %2832  ;;  %v528_v58 = vadd.f32 1.0, %v2831_v56 }
 0x31a   : > { %v462_v59 = vadd.f32 1.0, %v2833_v57 }
 0x31b   : > { %2834 = vrcp.f32 %v528_v58  ;;  %v540_v9 = vand.u32 2147483648, %v528_v58  ;;  %vm534_vm8 = vweird.f32 %v528_v58  ;;  %v538_v10 = vand.u32 2147483647, %v528_v58 }
 0x31c   : > { %2836 = vrcp.f32 %v462_v59  ;;  %v474_v12 = vand.u32 2147483648, %v462_v59  ;;  %vm468_vm11 = vweird.f32 %v462_v59  ;;  %v472_v14 = vand.u32 2147483647, %v462_v59 }
 0x31d   : > { %v541_v15 = vor.u32 1.1754944e-38, %v540_v9  ;;  %vm539_vm13 = vcmp.eq.f32.partialorder %v538_v10, 8.507059e+37 }
 0x31e   : > { %v475_v19 = vor.u32 1.1754944e-38, %v474_v12  ;;  %vm473_vm14 = vcmp.eq.f32.partialorder %v472_v14, 8.507059e+37 }
 0x321   : > { %v2835_v60 = vpop.eup %2834 }
 0x322   : > { %v2837_v61 = vpop.eup %2836  ;;  %v530_v62 = vmul.f32 %v2835_v60, %v528_v58  ;;  %vm535_vm7 = vweird.f32 %v2835_v60 }
 0x323   : > { %v464_v63 = vmul.f32 %v2837_v61, %v462_v59  ;;  %vm469_vm9 = vweird.f32 %v2837_v61  ;;  %vm536_vm10 = vmor %vm534_vm8, %vm535_vm7 }
 0x324   : > { %v531_v0 = vsub.f32 1.0, %v530_v62  ;;  %vm470_vm12 = vmor %vm468_vm11, %vm469_vm9 }
 0x325   : > { %v465_v5 = vsub.f32 1.0, %v464_v63 }
 0x326   : > { %v532_v6 = vmul.f32 %v2835_v60, %v531_v0 }
 0x327   : > { %v466_v7 = vmul.f32 %v2837_v61, %v465_v5 }
 0x328   : > { %v533_v8 = vadd.f32 %v2835_v60, %v532_v6 }
 0x329   : > { %v467_v11 = vadd.f32 %v2837_v61, %v466_v7 }
 0x32a   : > { %v537_v13 = vsel %vm536_vm10, %v2835_v60, %v533_v8 }
 0x32b   : > { %v471_v16 = vsel %vm470_vm12, %v2837_v61, %v467_v11  ;;  %v542_v18 = vsel %vm539_vm13, %v541_v15, %v537_v13 }
 0x32c   : > { %v476_v21 = vsel %vm473_vm14, %v475_v19, %v471_v16  ;;  %v545_v25 = vmul.f32 %v542_v18, %v3478_v29 }
 0x32d   : > { %v483_v28 = vmul.f32 %v481_v24, %v476_v21 }
 0x387   : > { %v548_v17 = vpop.permute.xlu1 %547 }
 0x388   : > { %v550_v20 = vmul.f32 %v548_v17, %v542_v18 }
 0x38a   : > { %552 = vrot.lane.b32.xlu1 %v550_v20, %s3288_s20  ;;  %v486_v22 = vpop.permute.xlu0 %485 }
 0x38b   : > { %v488_v23 = vmul.f32 %v486_v22, %v476_v21 }
 0x38d   : > { %490 = vrot.lane.b32.xlu0 %v488_v23, %s3288_s20 }
 0x3fc   : > { %v553_v26 = vpop.permute.xlu1 %552 }
 0x3fd   : > { %v3564_v27 = vadd.f32 %v553_v26, %v545_v25 }
 0x3ff   : > { %2838 = vtanh.f32 %v3564_v27  ;;  %v491_v30 = vpop.permute.xlu0 %490 }
 0x400   : > { %v3567_v34 = vadd.f32 %v491_v30, %v483_v28 }
 0x402   : > { %2840 = vtanh.f32 %v3567_v34 }
 0x405   : > { %v2839_v35 = vpop.eup %2838 }
 0x406   : > { %558 = vrot.lane.b32.xlu0 %v2839_v35, %s3288_s20 }
 0x408   : > { %v2841_v36 = vpop.eup %2840 }
 0x409   : > { %496 = vrot.lane.b32.xlu2 %v2841_v36, %s3288_s20 }
 0x463   : > { %v497_v42 = vpop.permute.xlu2 %496 }
 0x464   : > { %v499_v43 = vmul.f32 %v497_v42, %v476_v21 }
 0x466   : > { %567 = vrot.lane.b32.xlu2 %v499_v43, %s3290_s26 }
 0x478   : > { %v559_v29 = vpop.permute.xlu0 %558 }
 0x479   : > { %v561_v44 = vmul.f32 %v559_v29, %v542_v18 }
 0x47b   : > { %563 = vrot.lane.b32.xlu1 %v561_v44, %s3289_s21 }
 0x4c0   : > { %v568_v45 = vpop.permute.xlu2 %567 }
 0x4ed   : > { %v564_v46 = vpop.permute.xlu1 %563 }
 0x4ee   : > { %2658 = vmatmul.msk.f32.vlgmr.msrb.gmra.mxu0 %vm357_vm1, %v564_v46  ;;  %v570_v47 = vsel %vm357_vm1, %v564_v46, %v568_v45 }
 0x4ef   : > { %2655 = vmatmul.msk.f32.vlgmr.msra.gmra.mxu3 %vm435_vm6, %v570_v47  ;;  %975 = vmatpush.msrb.mxu0 %v3482_v31 }
 0x4f0   : > { %1106 = vmatpush.msra.mxu3 %v3482_v31 }
 0x4f1   : > { %976 = vmatpush.msrb.mxu0 %v3484_v32 }
 0x4f2   : > { %1107 = vmatpush.msra.mxu3 %v3484_v32 }
 0x4f3   : > { %977 = vmatpush.msrb.mxu0 %v3488_v33 }
 0x4f4   : > { %1108 = vmatpush.msra.mxu3 %v3488_v33 }
 0x4f5   : > { %978 = vmatpush.msrb.mxu0 %v3499_v37 }
 0x4f6   : > { %1109 = vmatpush.msra.mxu3 %v3499_v37 }
 0x4f7   : > { %979 = vmatpush.msrb.mxu0 %v3502_v38 }
 0x4f8   : > { %1110 = vmatpush.msra.mxu3 %v3502_v38 }
 0x4f9   : > { %980 = vmatpush.msrb.mxu0 %v3505_v39 }
 0x4fa   : > { %1111 = vmatpush.msra.mxu3 %v3505_v39 }
 0x4fb   : > { %981 = vmatpush.msrb.mxu0 %v3510_v40 }
 0x4fc   : > { %1112 = vmatpush.msra.mxu3 %v3510_v40 }
 0x4fd   : > { %982 = vmatpush.msrb.mxu0 %v3518_v41 }
 0x4fe   : > { %1113 = vmatpush.msra.mxu3 %v3518_v41 }
 0x56b   : > { %v652_v50 = vpop.f32.mrf.mxu0 }
 0x56c   : > { %v655_v51 = vadd.f32 %v2657_v49, %v652_v50  ;;  %v2662_v50 = vld [vmem:[%s3425_s30 + $0x18] sm:$0xff] }
 0x56e   : > { %2842 = vtanh.f32 %v655_v51  ;;  %v2659_v56 = vmul.f32 -1.442695, %v655_v51 }
 0x572   : > { %v591_v52 = vpop.f32.mrf.mxu3 }
 0x573   : > { %v592_v53 = vadd.f32 %v3556_v48, %v591_v52 }
 0x574   : > { %v2843_v54 = vpop.eup %2842 }
 0x575   : > { %2844 = vtanh.f32 %v592_v53  ;;  %678 = vrot.lane.b32.xlu0 %v2843_v54, %s3288_s20  ;;  %v2656_v57 = vmul.f32 -1.442695, %v592_v53 }
 0x576   : > { %2846 = vpow2.f32 %v2659_v56 }
 0x577   : > { %2848 = vpow2.f32 %v2656_v57 }
 0x57b   : > { %v2845_v55 = vpop.eup %2844 }
 0x57c   : > { %616 = vrot.lane.b32.xlu1 %v2845_v55, %s3288_s20  ;;  %v2847_v58 = vpop.eup %2846 }
 0x57d   : > { %v659_v59 = vadd.f32 1.0, %v2847_v58  ;;  %v2849_v60 = vpop.eup %2848 }
 0x57e   : > { %v597_v61 = vadd.f32 1.0, %v2849_v60 }
 0x57f   : > { %2850 = vrcp.f32 %v659_v59  ;;  %v671_v10 = vand.u32 2147483648, %v659_v59  ;;  %vm665_vm0 = vweird.f32 %v659_v59  ;;  %v669_v11 = vand.u32 2147483647, %v659_v59 }
 0x580   : > { %2852 = vrcp.f32 %v597_v61  ;;  %v609_v19 = vand.u32 2147483648, %v597_v61  ;;  %vm603_vm5 = vweird.f32 %v597_v61  ;;  %v607_v20 = vand.u32 2147483647, %v597_v61 }
 0x581   : > { %v672_v14 = vor.u32 1.1754944e-38, %v671_v10  ;;  %vm670_vm3 = vcmp.eq.f32.partialorder %v669_v11, 8.507059e+37 }
 0x582   : > { %v610_v22 = vor.u32 1.1754944e-38, %v609_v19  ;;  %vm608_vm8 = vcmp.eq.f32.partialorder %v607_v20, 8.507059e+37 }
 0x585   : > { %v2851_v62 = vpop.eup %2850 }
 0x586   : > { %v661_v63 = vmul.f32 %v2851_v62, %v659_v59  ;;  %v2853_v0 = vpop.eup %2852  ;;  %vm666_vm15 = vweird.f32 %v2851_v62 }
 0x587   : > { %v599_v6 = vmul.f32 %v2853_v0, %v597_v61  ;;  %vm667_vm2 = vmor %vm665_vm0, %vm666_vm15  ;;  %vm604_vm4 = vweird.f32 %v2853_v0 }
 0x588   : > { %v662_v5 = vsub.f32 1.0, %v661_v63  ;;  %vm605_vm7 = vmor %vm603_vm5, %vm604_vm4 }
 0x589   : > { %v600_v8 = vsub.f32 1.0, %v599_v6 }
 0x58a   : > { %v663_v7 = vmul.f32 %v2851_v62, %v662_v5 }
 0x58b   : > { %v601_v12 = vmul.f32 %v2853_v0, %v600_v8 }
 0x58c   : > { %v664_v9 = vadd.f32 %v2851_v62, %v663_v7 }
 0x58d   : > { %v602_v17 = vadd.f32 %v2853_v0, %v601_v12 }
 0x58e   : > { %v668_v13 = vsel %vm667_vm2, %v2851_v62, %v664_v9 }
 0x58f   : > { %v673_v16 = vsel %vm670_vm3, %v672_v14, %v668_v13  ;;  %v606_v21 = vsel %vm605_vm7, %v2853_v0, %v602_v17 }
 0x590   : > { %v611_v24 = vsel %vm608_vm8, %v610_v22, %v606_v21  ;;  %v676_v26 = vmul.f32 %v673_v16, %v3564_v27 }
 0x591   : > { %v614_v36 = vmul.f32 %v611_v24, %v3567_v34 }
 0x5e7   : > { %v679_v15 = vpop.permute.xlu0 %678 }
 0x5e8   : > { %v681_v18 = vmul.f32 %v679_v15, %v673_v16 }
 0x5ea   : > { %683 = vrot.lane.b32.xlu2 %v681_v18, %s3288_s20 }
 0x5ee   : > { %v617_v23 = vpop.permute.xlu1 %616 }
 0x5ef   : > { %v619_v25 = vmul.f32 %v617_v23, %v611_v24 }
 0x5f1   : > { %621 = vrot.lane.b32.xlu0 %v619_v25, %s3288_s20 }
 0x644   : > { %v684_v28 = vpop.permute.xlu2 %683 }
 0x645   : > { %v3600_v30 = vadd.f32 %v684_v28, %v676_v26 }
 0x647   : > { %2854 = vtanh.f32 %v3600_v30 }
 0x64d   : > { %v2855_v35 = vpop.eup %2854 }
 0x64e   : > { %689 = vrot.lane.b32.xlu1 %v2855_v35, %s3288_s20 }
 0x663   : > { %v622_v42 = vpop.permute.xlu0 %621 }
 0x664   : > { %v3605_v43 = vadd.f32 %v622_v42, %v614_v36 }
 0x666   : > { %2856 = vtanh.f32 %v3605_v43 }
 0x66c   : > { %v2857_v29 = vpop.eup %2856 }
 0x66d   : > { %627 = vrot.lane.b32.xlu2 %v2857_v29, %s3288_s20 }
 0x6c0   : > { %v690_v44 = vpop.permute.xlu1 %689 }
 0x6c1   : > { %v692_v27 = vmul.f32 %v690_v44, %v673_v16 }
 0x6c3   : > { %694 = vrot.lane.b32.xlu0 %v692_v27, %s3289_s21 }
 0x6c7   : > { %v628_v45 = vpop.permute.xlu2 %627 }
 0x6c8   : > { %v630_v46 = vmul.f32 %v628_v45, %v611_v24 }
 0x6ca   : > { %698 = vrot.lane.b32.xlu1 %v630_v46, %s3290_s26 }
 0x735   : > { %v695_v47 = vpop.permute.xlu0 %694 }
 0x736   : > { %2663 = vmatmul.msk.f32.vlgmr.msra.gmra.mxu0 %vm357_vm1, %v695_v47 }
 0x737   : > { %1302 = vmatpush.msra.mxu0 %v3440_v1 }
 0x739   : > { %1303 = vmatpush.msra.mxu0 %v3445_v2 }
 0x73b   : > { %1304 = vmatpush.msra.mxu0 %v3452_v3 }
 0x73c   : > { %v699_v34 = vpop.permute.xlu1 %698 }
 0x73d   : > { %v701_v49 = vsel %vm357_vm1, %v695_v47, %v699_v34  ;;  %1305 = vmatpush.msra.mxu0 %v3459_v4 }
 0x73e   : > { %2660 = vmatmul.msk.f32.vlgmr.msrb.gmra.mxu2 %vm435_vm6, %v701_v49 }
 0x73f   : > { %1237 = vmatpush.msrb.mxu2 %v3482_v31 }
 0x741   : > { %1238 = vmatpush.msrb.mxu2 %v3484_v32 }
 0x743   : > { %1239 = vmatpush.msrb.mxu2 %v3488_v33 }
 0x745   : > { %1240 = vmatpush.msrb.mxu2 %v3499_v37 }
 0x747   : > { %1241 = vmatpush.msrb.mxu2 %v3502_v38 }
 0x749   : > { %1242 = vmatpush.msrb.mxu2 %v3505_v39 }
 0x74b   : > { %1243 = vmatpush.msrb.mxu2 %v3510_v40 }
 0x74d   : > { %1244 = vmatpush.msrb.mxu2 %v3518_v41 }
 0x7b3   : > { %v783_v51 = vpop.f32.mrf.mxu0 }
 0x7b4   : > { %v786_v52 = vadd.f32 %v2662_v50, %v783_v51  ;;  %v2667_v51 = vld [vmem:[%s3425_s30 + $0x20] sm:$0xff] }
 0x7b6   : > { %2858 = vtanh.f32 %v786_v52  ;;  %v2664_v57 = vmul.f32 -1.442695, %v786_v52 }
 0x7bc   : > { %v2859_v53 = vpop.eup %2858 }
 0x7bd   : > { %809 = vrot.lane.b32.xlu2 %v2859_v53, %s3288_s20 }
 0x7c1   : > { %v722_v54 = vpop.f32.mrf.mxu2 }
 0x7c2   : > { %v723_v55 = vadd.f32 %v3556_v48, %v722_v54 }
 0x7c4   : > { %2860 = vtanh.f32 %v723_v55  ;;  %v2661_v0 = vmul.f32 -1.442695, %v723_v55 }
 0x7c5   : > { %2862 = vpow2.f32 %v2664_v57 }
 0x7ca   : > { %v2861_v56 = vpop.eup %2860 }
 0x7cb   : > { %747 = vrot.lane.b32.xlu0 %v2861_v56, %s3288_s20  ;;  %v2863_v58 = vpop.eup %2862 }
 0x7cc   : > { %v790_v59 = vadd.f32 1.0, %v2863_v58 }
 0x7ce   : > { %2864 = vrcp.f32 %v790_v59  ;;  %v802_v6 = vand.u32 2147483648, %v790_v59  ;;  %vm796_vm10 = vweird.f32 %v790_v59  ;;  %v800_v7 = vand.u32 2147483647, %v790_v59 }
 0x7cf   : > { %2866 = vpow2.f32 %v2661_v0 }
 0x7d0   : > { %v803_v9 = vor.u32 1.1754944e-38, %v802_v6  ;;  %vm801_vm12 = vcmp.eq.f32.partialorder %v800_v7, 8.507059e+37 }
 0x7d4   : > { %v2865_v60 = vpop.eup %2864 }
 0x7d5   : > { %v792_v61 = vmul.f32 %v2865_v60, %v790_v59  ;;  %vm797_vm9 = vweird.f32 %v2865_v60  ;;  %v2867_v13 = vpop.eup %2866 }
 0x7d6   : > { %vm798_vm11 = vmor %vm796_vm10, %vm797_vm9  ;;  %v728_v14 = vadd.f32 1.0, %v2867_v13 }
 0x7d7   : > { %v793_v62 = vsub.f32 1.0, %v792_v61 }
 0x7d8   : > { %2868 = vrcp.f32 %v728_v14  ;;  %v740_v20 = vand.u32 2147483648, %v728_v14  ;;  %vm734_vm14 = vweird.f32 %v728_v14  ;;  %v738_v21 = vand.u32 2147483647, %v728_v14 }
 0x7d9   : > { %v794_v63 = vmul.f32 %v2865_v60, %v793_v62 }
 0x7da   : > { %v741_v23 = vor.u32 1.1754944e-38, %v740_v20  ;;  %vm739_vm0 = vcmp.eq.f32.partialorder %v738_v21, 8.507059e+37 }
 0x7db   : > { %v795_v5 = vadd.f32 %v2865_v60, %v794_v63 }
 0x7dd   : > { %v799_v8 = vsel %vm798_vm11, %v2865_v60, %v795_v5 }
 0x7de   : > { %v804_v10 = vsel %vm801_vm12, %v803_v9, %v799_v8  ;;  %v2869_v15 = vpop.eup %2868 }
 0x7df   : > { %v730_v16 = vmul.f32 %v2869_v15, %v728_v14  ;;  %vm735_vm13 = vweird.f32 %v2869_v15  ;;  %v807_v28 = vmul.f32 %v804_v10, %v3600_v30 }
 0x7e0   : > { %vm736_vm15 = vmor %vm734_vm14, %vm735_vm13 }
 0x7e1   : > { %v731_v17 = vsub.f32 1.0, %v730_v16 }
 0x7e3   : > { %v732_v18 = vmul.f32 %v2869_v15, %v731_v17 }
 0x7e5   : > { %v733_v19 = vadd.f32 %v2869_v15, %v732_v18 }
 0x7e7   : > { %v737_v22 = vsel %vm736_vm15, %v2869_v15, %v733_v19 }
 0x7e8   : > { %v742_v25 = vsel %vm739_vm0, %v741_v23, %v737_v22 }
 0x7e9   : > { %v745_v29 = vmul.f32 %v742_v25, %v3605_v43 }
 0x817   : > { %v810_v11 = vpop.permute.xlu2 %809 }
 0x818   : > { %v812_v12 = vmul.f32 %v810_v11, %v804_v10 }
 0x81a   : > { %814 = vrot.lane.b32.xlu1 %v812_v12, %s3288_s20 }
 0x83d   : > { %v748_v24 = vpop.permute.xlu0 %747 }
 0x83e   : > { %v750_v26 = vmul.f32 %v748_v24, %v742_v25 }
 0x840   : > { %752 = vrot.lane.b32.xlu2 %v750_v26, %s3288_s20 }
 0x88c   : > { %v815_v35 = vpop.permute.xlu1 %814 }
 0x88d   : > { %v3633_v36 = vadd.f32 %v815_v35, %v807_v28 }
 0x88f   : > { %2870 = vtanh.f32 %v3633_v36 }
 0x895   : > { %v2871_v42 = vpop.eup %2870 }
 0x896   : > { %820 = vrot.lane.b32.xlu0 %v2871_v42, %s3288_s20 }
 0x89a   : > { %v753_v44 = vpop.permute.xlu2 %752 }
 0x89b   : > { %v3638_v27 = vadd.f32 %v753_v44, %v745_v29 }
 0x89d   : > { %2872 = vtanh.f32 %v3638_v27 }
 0x8a3   : > { %v2873_v45 = vpop.eup %2872 }
 0x8a4   : > { %758 = vrot.lane.b32.xlu1 %v2873_v45, %s3288_s20 }
 0x908   : > { %v821_v46 = vpop.permute.xlu0 %820 }
 0x909   : > { %v823_v30 = vmul.f32 %v821_v46, %v804_v10 }
 0x90b   : > { %825 = vrot.lane.b32.xlu2 %v823_v30, %s3289_s21 }
 0x916   : > { %v759_v47 = vpop.permute.xlu1 %758 }
 0x917   : > { %v761_v34 = vmul.f32 %v759_v47, %v742_v25 }
 0x919   : > { %829 = vrot.lane.b32.xlu0 %v761_v34, %s3290_s26 }
 0x965   : > { %v826_v49 = vpop.permute.xlu2 %825 }
 0x966   : > { %2668 = vmatmul.msk.f32.vlgmr.msrb.gmra.mxu3 %vm357_vm1, %v826_v49 }
 0x967   : > { %1171 = vmatpush.msrb.mxu3 %v3440_v1 }
 0x969   : > { %1172 = vmatpush.msrb.mxu3 %v3445_v2 }
 0x96b   : > { %1173 = vmatpush.msrb.mxu3 %v3452_v3 }
 0x96d   : > { %1174 = vmatpush.msrb.mxu3 %v3459_v4 }
 0x98b   : > { %v830_v43 = vpop.permute.xlu0 %829 }
 0x98c   : > { %v832_v50 = vsel %vm357_vm1, %v826_v49, %v830_v43 }
 0x98d   : > { %2665 = vmatmul.msk.f32.vlgmr.msrb.gmra.mxu1 %vm435_vm6, %v832_v50 }
 0x98e   : > { %1695 = vmatpush.msrb.mxu1 %v3440_v1 }
 0x990   : > { %1696 = vmatpush.msrb.mxu1 %v3445_v2 }
 0x992   : > { %1697 = vmatpush.msrb.mxu1 %v3452_v3 }
 0x994   : > { %1698 = vmatpush.msrb.mxu1 %v3459_v4 }
 0x9e9   : > { %v914_v52 = vpop.f32.mrf.mxu3 }
 0x9ea   : > { %v917_v53 = vadd.f32 %v2667_v51, %v914_v52 }
 0x9ec   : > { %2874 = vtanh.f32 %v917_v53  ;;  %v2669_v58 = vmul.f32 -1.442695, %v917_v53 }
 0x9f2   : > { %v2875_v54 = vpop.eup %2874 }
 0x9f3   : > { %940 = vrot.lane.b32.xlu1 %v2875_v54, %s3288_s20 }
 0xa0a   : > { %v853_v55 = vpop.f32.mrf.mxu1 }
 0xa0b   : > { %v854_v56 = vadd.f32 %v3556_v48, %v853_v55 }
 0xa0d   : > { %2876 = vtanh.f32 %v854_v56  ;;  %v2666_v59 = vmul.f32 -1.442695, %v854_v56 }
 0xa0e   : > { %2878 = vpow2.f32 %v2669_v58 }
 0xa0f   : > { %2880 = vpow2.f32 %v2666_v59 }
 0xa13   : > { %v2877_v57 = vpop.eup %2876 }
 0xa14   : > { %878 = vrot.lane.b32.xlu2 %v2877_v57, %s3288_s20  ;;  %v2879_v60 = vpop.eup %2878 }
 0xa15   : > { %v921_v61 = vadd.f32 1.0, %v2879_v60  ;;  %v2881_v62 = vpop.eup %2880 }
 0xa16   : > { %v859_v63 = vadd.f32 1.0, %v2881_v62 }
 0xa17   : > { %2882 = vrcp.f32 %v921_v61  ;;  %v933_v11 = vand.u32 2147483648, %v921_v61  ;;  %vm927_vm3 = vweird.f32 %v921_v61  ;;  %v931_v13 = vand.u32 2147483647, %v921_v61 }
 0xa18   : > { %2884 = vrcp.f32 %v859_v63  ;;  %v871_v21 = vand.u32 2147483648, %v859_v63  ;;  %vm865_vm8 = vweird.f32 %v859_v63  ;;  %v869_v22 = vand.u32 2147483647, %v859_v63 }
 0xa19   : > { %v934_v15 = vor.u32 1.1754944e-38, %v933_v11  ;;  %vm932_vm5 = vcmp.eq.f32.partialorder %v931_v13, 8.507059e+37 }
 0xa1a   : > { %v872_v24 = vor.u32 1.1754944e-38, %v871_v21  ;;  %vm870_vm10 = vcmp.eq.f32.partialorder %v869_v22, 8.507059e+37 }
 0xa1d   : > { %v2883_v0 = vpop.eup %2882 }
 0xa1e   : > { %v923_v5 = vmul.f32 %v2883_v0, %v921_v61  ;;  %v2885_v7 = vpop.eup %2884  ;;  %vm928_vm2 = vweird.f32 %v2883_v0 }
 0xa1f   : > { %v861_v9 = vmul.f32 %v2885_v7, %v859_v63  ;;  %vm929_vm4 = vmor %vm927_vm3, %vm928_vm2  ;;  %vm866_vm7 = vweird.f32 %v2885_v7 }
 0xa20   : > { %v924_v6 = vsub.f32 1.0, %v923_v5  ;;  %vm867_vm9 = vmor %vm865_vm8, %vm866_vm7 }
 0xa21   : > { %v862_v12 = vsub.f32 1.0, %v861_v9 }
 0xa22   : > { %v925_v8 = vmul.f32 %v2883_v0, %v924_v6 }
 0xa23   : > { %v863_v16 = vmul.f32 %v2885_v7, %v862_v12 }
 0xa24   : > { %v926_v10 = vadd.f32 %v2883_v0, %v925_v8 }
 0xa25   : > { %v864_v20 = vadd.f32 %v2885_v7, %v863_v16 }
 0xa26   : > { %v930_v14 = vsel %vm929_vm4, %v2883_v0, %v926_v10 }
 0xa27   : > { %v935_v18 = vsel %vm932_vm5, %v934_v15, %v930_v14  ;;  %v868_v23 = vsel %vm867_vm9, %v2885_v7, %v864_v20 }
 0xa28   : > { %v873_v26 = vsel %vm870_vm10, %v872_v24, %v868_v23  ;;  %v938_v35 = vmul.f32 %v935_v18, %v3633_v36 }
 0xa29   : > { %v876_v44 = vmul.f32 %v873_v26, %v3638_v27 }
 0xa65   : > { %v941_v17 = vpop.permute.xlu1 %940 }
 0xa66   : > { %v943_v19 = vmul.f32 %v941_v17, %v935_v18 }
 0xa68   : > { %945 = vrot.lane.b32.xlu0 %v943_v19, %s3288_s20 }
 0xa6e   : > { %v879_v25 = vpop.permute.xlu2 %878 }
 0xa6f   : > { %v881_v28 = vmul.f32 %v879_v25, %v873_v26 }
 0xa71   : > { %883 = vrot.lane.b32.xlu1 %v881_v28, %s3288_s20 }
 0xada   : > { %v946_v42 = vpop.permute.xlu0 %945 }
 0xadb   : > { %v3662_v29 = vadd.f32 %v946_v42, %v938_v35 }
 0xadd   : > { %2886 = vtanh.f32 %v3662_v29 }
 0xae3   : > { %v2887_v45 = vpop.eup %2886  ;;  %v884_v46 = vpop.permute.xlu1 %883 }
 0xae4   : > { %v3666_v30 = vadd.f32 %v884_v46, %v876_v44  ;;  %951 = vrot.lane.b32.xlu2 %v2887_v45, %s3288_s20 }
 0xae6   : > { %2888 = vtanh.f32 %v3666_v30 }
 0xaec   : > { %v2889_v47 = vpop.eup %2888 }
 0xaed   : > { %889 = vrot.lane.b32.xlu0 %v2889_v47, %s3288_s20 }
 0xb3e   : > { %v952_v34 = vpop.permute.xlu2 %951 }
 0xb3f   : > { %v954_v36 = vmul.f32 %v952_v34, %v935_v18 }
 0xb41   : > { %956 = vrot.lane.b32.xlu1 %v954_v36, %s3289_s21  ;;  %v3711_v36 = vld [vmem:[%s4101_s1 + $0x18] sm:$0xff] }
 0xb5f   : > { %v890_v49 = vpop.permute.xlu0 %889 }
 0xb60   : > { %v892_v43 = vmul.f32 %v890_v49, %v873_v26  ;;  %v3717_v49 = vld [vmem:[%s4101_s1 + $0x10] sm:$0xff] }
 0xb62   : > { %960 = vrot.lane.b32.xlu2 %v892_v43, %s3290_s26  ;;  %v3723_v43 = vld [vmem:[%s4101_s1 + $0x8] sm:$0xff] }
 0xbb3   : > { %v957_v27 = vpop.permute.xlu1 %956 }
 0xbb4   : > { %2673 = vmatmul.msk.f32.vlgmr.msra.gmra.mxu2 %vm357_vm1, %v957_v27 }
 0xbb5   : > { %1564 = vmatpush.msra.mxu2 %v3440_v1  ;;  %v2672_v1 = vld [vmem:[%s3425_s30 + $0x28] sm:$0xff] }
 0xbb7   : > { %1565 = vmatpush.msra.mxu2 %v3445_v2 }
 0xbb9   : > { %1566 = vmatpush.msra.mxu2 %v3452_v3 }
 0xbbb   : > { %1567 = vmatpush.msra.mxu2 %v3459_v4 }
 0xbbc   : > { %v961_v50 = vpop.permute.xlu2 %960 }
 0xbbd   : > { %v963_v51 = vsel %vm357_vm1, %v957_v27, %v961_v50  ;;  %v3729_v27 = vld [vmem:[%s4101_s1] sm:$0xff]  ;;  %v3733_v50 = vld [vmem:[#allocation5 + $0x38] sm:$0xff] }
 0xbbe   : > { %2670 = vmatmul.msk.f32.vlgmr.msrb.gmra.mxu0 %vm435_vm6, %v963_v51  ;;  %v3736_v51 = vld [vmem:[#allocation5 + $0x30] sm:$0xff] }
 0xbbf   : > { %1499 = vmatpush.msrb.mxu0 %v3482_v31 }
 0xbc1   : > { %1500 = vmatpush.msrb.mxu0 %v3484_v32 }
 0xbc3   : > { %1501 = vmatpush.msrb.mxu0 %v3488_v33 }
 0xbc5   : > { %1502 = vmatpush.msrb.mxu0 %v3499_v37 }
 0xbc7   : > { %1503 = vmatpush.msrb.mxu0 %v3502_v38 }
 0xbc9   : > { %1504 = vmatpush.msrb.mxu0 %v3505_v39 }
 0xbcb   : > { %1505 = vmatpush.msrb.mxu0 %v3510_v40 }
 0xbcd   : > { %1506 = vmatpush.msrb.mxu0 %v3518_v41 }
 0xc37   : > { %v1045_v2 = vpop.f32.mrf.mxu2 }
 0xc38   : > { %v1048_v3 = vadd.f32 %v2672_v1, %v1045_v2  ;;  %v3739_v1 = vld [vmem:[#allocation5 + $0x28] sm:$0xff] }
 0xc3a   : > { %2890 = vtanh.f32 %v1048_v3  ;;  %v2674_v52 = vmul.f32 -1.442695, %v1048_v3 }
 0xc3b   : > { %v984_v4 = vpop.f32.mrf.mxu0 }
 0xc3c   : > { %v985_v31 = vadd.f32 %v3556_v48, %v984_v4  ;;  %v2677_v4 = vld [vmem:[%s3425_s30 + $0x30] sm:$0xff] }
 0xc3e   : > { %2892 = vtanh.f32 %v985_v31  ;;  %v2671_v53 = vmul.f32 -1.442695, %v985_v31 }
 0xc3f   : > { %2894 = vpow2.f32 %v2674_v52 }
 0xc40   : > { %v2891_v32 = vpop.eup %2890  ;;  %2896 = vpow2.f32 %v2671_v53 }
 0xc41   : > { %1071 = vrot.lane.b32.xlu1 %v2891_v32, %s3288_s20 }
 0xc44   : > { %v2893_v33 = vpop.eup %2892 }
 0xc45   : > { %1009 = vrot.lane.b32.xlu0 %v2893_v33, %s3288_s20  ;;  %v2895_v54 = vpop.eup %2894 }
 0xc46   : > { %v1052_v55 = vadd.f32 1.0, %v2895_v54  ;;  %v2897_v56 = vpop.eup %2896 }
 0xc47   : > { %v990_v57 = vadd.f32 1.0, %v2897_v56 }
 0xc48   : > { %2898 = vrcp.f32 %v1052_v55  ;;  %v1064_v7 = vand.u32 2147483648, %v1052_v55  ;;  %vm1058_vm12 = vweird.f32 %v1052_v55  ;;  %v1062_v8 = vand.u32 2147483647, %v1052_v55 }
 0xc49   : > { %2900 = vrcp.f32 %v990_v57  ;;  %v1002_v12 = vand.u32 2147483648, %v990_v57  ;;  %vm996_vm0 = vweird.f32 %v990_v57  ;;  %v1000_v13 = vand.u32 2147483647, %v990_v57 }
 0xc4a   : > { %v1065_v11 = vor.u32 1.1754944e-38, %v1064_v7  ;;  %vm1063_vm15 = vcmp.eq.f32.partialorder %v1062_v8, 8.507059e+37 }
 0xc4b   : > { %v1003_v18 = vor.u32 1.1754944e-38, %v1002_v12  ;;  %vm1001_vm3 = vcmp.eq.f32.partialorder %v1000_v13, 8.507059e+37 }
 0xc4e   : > { %v2899_v58 = vpop.eup %2898 }
 0xc4f   : > { %v1054_v59 = vmul.f32 %v2899_v58, %v1052_v55  ;;  %v2901_v60 = vpop.eup %2900  ;;  %vm1059_vm11 = vweird.f32 %v2899_v58 }
 0xc50   : > { %v992_v62 = vmul.f32 %v2901_v60, %v990_v57  ;;  %vm1060_vm13 = vmor %vm1058_vm12, %vm1059_vm11  ;;  %vm997_vm14 = vweird.f32 %v2901_v60 }
 0xc51   : > { %v1055_v61 = vsub.f32 1.0, %v1054_v59  ;;  %vm998_vm2 = vmor %vm996_vm0, %vm997_vm14 }
 0xc52   : > { %v993_v0 = vsub.f32 1.0, %v992_v62 }
 0xc53   : > { %v1056_v63 = vmul.f32 %v2899_v58, %v1055_v61 }
 0xc54   : > { %v994_v6 = vmul.f32 %v2901_v60, %v993_v0 }
 0xc55   : > { %v1057_v5 = vadd.f32 %v2899_v58, %v1056_v63 }
 0xc56   : > { %v995_v10 = vadd.f32 %v2901_v60, %v994_v6 }
 0xc57   : > { %v1061_v9 = vsel %vm1060_vm13, %v2899_v58, %v1057_v5 }
 0xc58   : > { %v1066_v15 = vsel %vm1063_vm15, %v1065_v11, %v1061_v9  ;;  %v999_v17 = vsel %vm998_vm2, %v2901_v60, %v995_v10 }
 0xc59   : > { %v1004_v20 = vsel %vm1001_vm3, %v1003_v18, %v999_v17  ;;  %v1069_v26 = vmul.f32 %v1066_v15, %v3662_v29 }
 0xc5a   : > { %v1007_v22 = vmul.f32 %v1004_v20, %v3666_v30 }
 0xcb3   : > { %v1072_v14 = vpop.permute.xlu1 %1071 }
 0xcb4   : > { %v1074_v16 = vmul.f32 %v1072_v14, %v1066_v15 }
 0xcb6   : > { %1076 = vrot.lane.b32.xlu0 %v1074_v16, %s3288_s20 }
 0xcb7   : > { %v1010_v19 = vpop.permute.xlu0 %1009 }
 0xcb8   : > { %v1012_v21 = vmul.f32 %v1010_v19, %v1004_v20 }
 0xcba   : > { %1014 = vrot.lane.b32.xlu2 %v1012_v21, %s3288_s20 }
 0xd14   : > { %v1015_v23 = vpop.permute.xlu2 %1014 }
 0xd15   : > { %v3695_v24 = vadd.f32 %v1015_v23, %v1007_v22 }
 0xd17   : > { %2902 = vtanh.f32 %v3695_v24 }
 0xd1d   : > { %v2903_v25 = vpop.eup %2902 }
 0xd1e   : > { %1020 = vrot.lane.b32.xlu1 %v2903_v25, %s3288_s20 }
 0xd28   : > { %v1077_v28 = vpop.permute.xlu0 %1076 }
 0xd29   : > { %v3700_v35 = vadd.f32 %v1077_v28, %v1069_v26 }
 0xd2b   : > { %2904 = vtanh.f32 %v3700_v35 }
 0xd31   : > { %v2905_v42 = vpop.eup %2904 }
 0xd32   : > { %1082 = vrot.lane.b32.xlu2 %v2905_v42, %s3288_s20 }
 0xd8c   : > { %v1083_v44 = vpop.permute.xlu2 %1082 }
 0xd8d   : > { %v1085_v45 = vmul.f32 %v1083_v44, %v1066_v15 }
 0xd8f   : > { %1087 = vrot.lane.b32.xlu0 %v1085_v45, %s3289_s21 }
 0xd90   : > { %v1021_v46 = vpop.permute.xlu1 %1020 }
 0xd91   : > { %v1023_v30 = vmul.f32 %v1021_v46, %v1004_v20  ;;  %v3775_v46 = vld [vmem:[#allocation5 + $0x20] sm:$0xff] }
 0xd93   : > { %1091 = vrot.lane.b32.xlu1 %v1023_v30, %s3290_s26  ;;  %v3778_v30 = vld [vmem:[#allocation5 + $0x18] sm:$0xff] }
 0xe01   : > { %v1088_v47 = vpop.permute.xlu0 %1087 }
 0xe05   : > { %v1092_v34 = vpop.permute.xlu1 %1091 }
 0xe06   : > { %v1094_v29 = vsel %vm357_vm1, %v1088_v47, %v1092_v34  ;;  %v3784_v34 = vld [vmem:[#allocation5 + $0x8] sm:$0xff] }
 0xe07   : > { %2675 = vmatmul.msk.f32.vlgmr.msra.gmra.mxu3 %vm435_vm6, %v1094_v29  ;;  %v3787_v29 = vld [vmem:[#allocation5] sm:$0xff] }
 0xe08   : > { %1433 = vmatpush.msra.mxu3 %v3711_v36 }
 0xe0a   : > { %1434 = vmatpush.msra.mxu3 %v3717_v49 }
 0xe0c   : > { %1435 = vmatpush.msra.mxu3 %v3723_v43 }
 0xe0e   : > { %1436 = vmatpush.msra.mxu3 %v3729_v27 }
 0xe0f   : > { %2678 = vmatmul.msk.f32.vlgmr.msrb.gmra.mxu3 %vm357_vm1, %v1088_v47  ;;  %v3781_v47 = vld [vmem:[#allocation5 + $0x10] sm:$0xff] }
 0xe10   : > { %1630 = vmatpush.msrb.mxu3 %v3733_v50 }
 0xe12   : > { %1631 = vmatpush.msrb.mxu3 %v3736_v51 }
 0xe14   : > { %1632 = vmatpush.msrb.mxu3 %v3739_v1 }
 0xe16   : > { %1633 = vmatpush.msrb.mxu3 %v3499_v37 }
 0xe18   : > { %1634 = vmatpush.msrb.mxu3 %v3502_v38 }
 0xe1a   : > { %1635 = vmatpush.msrb.mxu3 %v3505_v39 }
 0xe1c   : > { %1636 = vmatpush.msrb.mxu3 %v3510_v40 }
 0xe1e   : > { %1637 = vmatpush.msrb.mxu3 %v3518_v41 }
 0xe8a   : > { %v1115_v2 = vpop.f32.mrf.mxu3 }
 0xe8b   : > { %v1116_v3 = vadd.f32 %v3556_v48, %v1115_v2  ;;  %v2682_v2 = vld [vmem:[%s3425_s30 + $0x38] sm:$0xff] }
 0xe8d   : > { %2906 = vtanh.f32 %v1116_v3  ;;  %v2676_v52 = vmul.f32 -1.442695, %v1116_v3 }
 0xe92   : > { %v1176_v31 = vpop.f32.mrf.mxu3 }
 0xe93   : > { %v2907_v32 = vpop.eup %2906  ;;  %v1179_v33 = vadd.f32 %v2677_v4, %v1176_v31 }
 0xe94   : > { %1140 = vrot.lane.b32.xlu0 %v2907_v32, %s3288_s20 }
 0xe95   : > { %2908 = vtanh.f32 %v1179_v33  ;;  %v2679_v38 = vmul.f32 -1.442695, %v1179_v33  ;;  %v3795_v33 = vld [vmem:[%s4103_s3] ss:$0 sm:$0xff] }
 0xe97   : > { %2910 = vpow2.f32 %v2679_v38 }
 0xe9b   : > { %v2909_v37 = vpop.eup %2908 }
 0xe9c   : > { %1202 = vrot.lane.b32.xlu2 %v2909_v37, %s3288_s20 }
 0xe9d   : > { %v2911_v39 = vpop.eup %2910 }
 0xe9e   : > { %v1183_v40 = vadd.f32 1.0, %v2911_v39 }
 0xea0   : > { %2912 = vrcp.f32 %v1183_v40  ;;  %v1195_v59 = vand.u32 2147483648, %v1183_v40  ;;  %vm1189_vm5 = vweird.f32 %v1183_v40  ;;  %v1193_v60 = vand.u32 2147483647, %v1183_v40 }
 0xea1   : > { %2914 = vpow2.f32 %v2676_v52 }
 0xea2   : > { %v1196_v63 = vor.u32 1.1754944e-38, %v1195_v59  ;;  %vm1194_vm8 = vcmp.eq.f32.partialorder %v1193_v60, 8.507059e+37 }
 0xea6   : > { %v2913_v41 = vpop.eup %2912 }
 0xea7   : > { %v2915_v48 = vpop.eup %2914  ;;  %v1185_v53 = vmul.f32 %v2913_v41, %v1183_v40  ;;  %vm1190_vm4 = vweird.f32 %v2913_v41 }
 0xea8   : > { %v1121_v54 = vadd.f32 1.0, %v2915_v48  ;;  %vm1191_vm7 = vmor %vm1189_vm5, %vm1190_vm4 }
 0xea9   : > { %v1186_v55 = vsub.f32 1.0, %v1185_v53 }
 0xeaa   : > { %2916 = vrcp.f32 %v1121_v54  ;;  %v1133_v10 = vand.u32 2147483648, %v1121_v54  ;;  %vm1127_vm10 = vweird.f32 %v1121_v54  ;;  %v1131_v11 = vand.u32 2147483647, %v1121_v54 }
 0xeab   : > { %v1187_v56 = vmul.f32 %v2913_v41, %v1186_v55 }
 0xeac   : > { %v1134_v13 = vor.u32 1.1754944e-38, %v1133_v10  ;;  %vm1132_vm12 = vcmp.eq.f32.partialorder %v1131_v11, 8.507059e+37 }
 0xead   : > { %v1188_v57 = vadd.f32 %v2913_v41, %v1187_v56 }
 0xeaf   : > { %v1192_v61 = vsel %vm1191_vm7, %v2913_v41, %v1188_v57 }
 0xeb0   : > { %v2917_v58 = vpop.eup %2916  ;;  %v1197_v5 = vsel %vm1194_vm8, %v1196_v63, %v1192_v61 }
 0xeb1   : > { %v1123_v62 = vmul.f32 %v2917_v58, %v1121_v54  ;;  %vm1128_vm9 = vweird.f32 %v2917_v58  ;;  %v1200_v20 = vmul.f32 %v1197_v5, %v3700_v35 }
 0xeb2   : > { %vm1129_vm11 = vmor %vm1127_vm10, %vm1128_vm9 }
 0xeb3   : > { %v1124_v7 = vsub.f32 1.0, %v1123_v62 }
 0xeb5   : > { %v1125_v8 = vmul.f32 %v2917_v58, %v1124_v7 }
 0xeb7   : > { %v1126_v9 = vadd.f32 %v2917_v58, %v1125_v8 }
 0xeb9   : > { %v1130_v12 = vsel %vm1129_vm11, %v2917_v58, %v1126_v9 }
 0xeba   : > { %v1135_v15 = vsel %vm1132_vm12, %v1134_v13, %v1130_v12 }
 0xebb   : > { %v1138_v17 = vmul.f32 %v1135_v15, %v3695_v24 }
 0xef6   : > { %v1203_v0 = vpop.permute.xlu2 %1202 }
 0xef7   : > { %v1205_v6 = vmul.f32 %v1203_v0, %v1197_v5 }
 0xef9   : > { %1207 = vrot.lane.b32.xlu1 %v1205_v6, %s3288_s20 }
 0xf06   : > { %v1141_v14 = vpop.permute.xlu0 %1140 }
 0xf07   : > { %v1143_v16 = vmul.f32 %v1141_v14, %v1135_v15 }
 0xf09   : > { %1145 = vrot.lane.b32.xlu2 %v1143_v16, %s3288_s20 }
 0xf63   : > { %v1146_v18 = vpop.permute.xlu2 %1145 }
 0xf64   : > { %v3754_v19 = vadd.f32 %v1146_v18, %v1138_v17 }
 0xf66   : > { %2918 = vtanh.f32 %v3754_v19 }
 0xf6b   : > { %v1208_v21 = vpop.permute.xlu1 %1207 }
 0xf6c   : > { %v2919_v22 = vpop.eup %2918  ;;  %v3758_v23 = vadd.f32 %v1208_v21, %v1200_v20 }
 0xf6d   : > { %1151 = vrot.lane.b32.xlu1 %v2919_v22, %s3288_s20 }
 0xf6e   : > { %2920 = vtanh.f32 %v3758_v23 }
 0xf74   : > { %v2921_v25 = vpop.eup %2920 }
 0xf75   : > { %1213 = vrot.lane.b32.xlu0 %v2921_v25, %s3288_s20 }
 0xfdf   : > { %v1152_v26 = vpop.permute.xlu1 %1151 }
 0xfe0   : > { %v1154_v24 = vmul.f32 %v1152_v26, %v1135_v15 }
 0xfe2   : > { %1222 = vrot.lane.b32.xlu0 %v1154_v24, %s3290_s26 }
 0xfe7   : > { %v1214_v28 = vpop.permute.xlu0 %1213 }
 0xfe8   : > { %v1216_v42 = vmul.f32 %v1214_v28, %v1197_v5 }
 0xfea   : > { %1218 = vrot.lane.b32.xlu2 %v1216_v42, %s3289_s21 }
0x1044   : > { %v1219_v35 = vpop.permute.xlu2 %1218 }
0x1045   : > { %2683 = vmatmul.msk.f32.vlgmr.msra.gmra.mxu0 %vm357_vm1, %v1219_v35 }
0x1046   : > { %1826 = vmatpush.msra.mxu0 %v3711_v36 }
0x1048   : > { %1827 = vmatpush.msra.mxu0 %v3717_v49 }
0x104a   : > { %1828 = vmatpush.msra.mxu0 %v3723_v43 }
0x104c   : > { %1829 = vmatpush.msra.mxu0 %v3729_v27 }
0x1054   : > { %v1223_v44 = vpop.permute.xlu0 %1222 }
0x1055   : > { %v1225_v45 = vsel %vm357_vm1, %v1219_v35, %v1223_v44 }
0x1056   : > { %2680 = vmatmul.msk.f32.vlgmr.msrb.gmra.mxu2 %vm435_vm6, %v1225_v45 }
0x1057   : > { %1761 = vmatpush.msrb.mxu2 %v3733_v50 }
0x1059   : > { %1762 = vmatpush.msrb.mxu2 %v3736_v51 }
0x105b   : > { %1763 = vmatpush.msrb.mxu2 %v3739_v1 }
0x105d   : > { %1764 = vmatpush.msrb.mxu2 %v3775_v46 }
0x105f   : > { %1765 = vmatpush.msrb.mxu2 %v3778_v30 }
0x1061   : > { %1766 = vmatpush.msrb.mxu2 %v3781_v47 }
0x1063   : > { %1767 = vmatpush.msrb.mxu2 %v3784_v34 }
0x1065   : > { %1768 = vmatpush.msrb.mxu2 %v3787_v29 }
0x10c2   : > { %v1307_v3 = vpop.f32.mrf.mxu0 }
0x10c3   : > { %v1310_v4 = vadd.f32 %v2682_v2, %v1307_v3 }
0x10c5   : > { %2922 = vtanh.f32 %v1310_v4  ;;  %v2684_v40 = vmul.f32 -1.442695, %v1310_v4 }
0x10cb   : > { %v2923_v31 = vpop.eup %2922 }
0x10cc   : > { %1333 = vrot.lane.b32.xlu1 %v2923_v31, %s3288_s20  ;;  %v2687_v31 = vld [vmem:[%s3425_s30 + $0x40] sm:$0xff] }
0x10d9   : > { %v1246_v32 = vpop.f32.mrf.mxu2 }
0x10da   : > { %v1247_v37 = vadd.f32 %v3795_v33, %v1246_v32 }
0x10dc   : > { %2924 = vtanh.f32 %v1247_v37  ;;  %v2681_v39 = vmul.f32 -1.442695, %v1247_v37 }
0x10de   : > { %2926 = vpow2.f32 %v2681_v39 }
0x10df   : > { %2928 = vpow2.f32 %v2684_v40 }
0x10e2   : > { %v2925_v38 = vpop.eup %2924 }
0x10e3   : > { %1271 = vrot.lane.b32.xlu2 %v2925_v38, %s3288_s20 }
0x10e4   : > { %v2927_v52 = vpop.eup %2926 }
0x10e5   : > { %v2929_v41 = vpop.eup %2928  ;;  %v1252_v48 = vadd.f32 1.0, %v2927_v52 }
0x10e6   : > { %v1314_v53 = vadd.f32 1.0, %v2929_v41 }
0x10e7   : > { %2930 = vrcp.f32 %v1252_v48  ;;  %v1264_v63 = vand.u32 2147483648, %v1252_v48  ;;  %vm1258_vm15 = vweird.f32 %v1252_v48  ;;  %v1262_v5 = vand.u32 2147483647, %v1252_v48 }
0x10e8   : > { %2932 = vrcp.f32 %v1314_v53  ;;  %v1326_v6 = vand.u32 2147483648, %v1314_v53  ;;  %vm1320_vm2 = vweird.f32 %v1314_v53  ;;  %v1324_v7 = vand.u32 2147483647, %v1314_v53 }
0x10e9   : > { %v1265_v9 = vor.u32 1.1754944e-38, %v1264_v63  ;;  %vm1263_vm4 = vcmp.eq.f32.partialorder %v1262_v5, 8.507059e+37 }
0x10ea   : > { %v1327_v11 = vor.u32 1.1754944e-38, %v1326_v6  ;;  %vm1325_vm5 = vcmp.eq.f32.partialorder %v1324_v7, 8.507059e+37 }
0x10ed   : > { %v2931_v54 = vpop.eup %2930 }
0x10ee   : > { %v2933_v55 = vpop.eup %2932  ;;  %v1254_v56 = vmul.f32 %v2931_v54, %v1252_v48  ;;  %vm1259_vm13 = vweird.f32 %v2931_v54 }
0x10ef   : > { %v1316_v57 = vmul.f32 %v2933_v55, %v1314_v53  ;;  %vm1321_vm14 = vweird.f32 %v2933_v55  ;;  %vm1260_vm0 = vmor %vm1258_vm15, %vm1259_vm13 }
0x10f0   : > { %v1255_v58 = vsub.f32 1.0, %v1254_v56  ;;  %vm1322_vm3 = vmor %vm1320_vm2, %vm1321_vm14 }
0x10f1   : > { %v1317_v59 = vsub.f32 1.0, %v1316_v57 }
0x10f2   : > { %v1256_v60 = vmul.f32 %v2931_v54, %v1255_v58 }
0x10f3   : > { %v1318_v61 = vmul.f32 %v2933_v55, %v1317_v59 }
0x10f4   : > { %v1257_v62 = vadd.f32 %v2931_v54, %v1256_v60 }
0x10f5   : > { %v1319_v0 = vadd.f32 %v2933_v55, %v1318_v61 }
0x10f6   : > { %v1261_v8 = vsel %vm1260_vm0, %v2931_v54, %v1257_v62 }
0x10f7   : > { %v1323_v10 = vsel %vm1322_vm3, %v2933_v55, %v1319_v0  ;;  %v1266_v13 = vsel %vm1263_vm4, %v1265_v9, %v1261_v8 }
0x10f8   : > { %v1328_v15 = vsel %vm1325_vm5, %v1327_v11, %v1323_v10  ;;  %v1269_v18 = vmul.f32 %v1266_v13, %v3754_v19 }
0x10f9   : > { %v1331_v21 = vmul.f32 %v1328_v15, %v3758_v23 }
0x113d   : > { %v1272_v12 = vpop.permute.xlu2 %1271 }
0x113e   : > { %v1274_v14 = vmul.f32 %v1272_v12, %v1266_v13  ;;  %v1334_v16 = vpop.permute.xlu1 %1333 }
0x113f   : > { %v1336_v17 = vmul.f32 %v1334_v16, %v1328_v15 }
0x1140   : > { %1276 = vrot.lane.b32.xlu1 %v1274_v14, %s3288_s20 }
0x1141   : > { %1338 = vrot.lane.b32.xlu0 %v1336_v17, %s3288_s20 }
0x11b2   : > { %v1277_v20 = vpop.permute.xlu1 %1276 }
0x11b3   : > { %v3803_v22 = vadd.f32 %v1277_v20, %v1269_v18  ;;  %v1339_v25 = vpop.permute.xlu0 %1338 }
0x11b4   : > { %v3805_v26 = vadd.f32 %v1339_v25, %v1331_v21 }
0x11b5   : > { %2934 = vtanh.f32 %v3803_v22 }
0x11b6   : > { %2936 = vtanh.f32 %v3805_v26 }
0x11bb   : > { %v2935_v24 = vpop.eup %2934 }
0x11bc   : > { %v2937_v28 = vpop.eup %2936  ;;  %1282 = vrot.lane.b32.xlu0 %v2935_v24, %s3288_s20 }
0x11bd   : > { %1344 = vrot.lane.b32.xlu2 %v2937_v28, %s3288_s20 }
0x1217   : > { %v1345_v42 = vpop.permute.xlu2 %1344 }
0x1218   : > { %v1347_v19 = vmul.f32 %v1345_v42, %v1328_v15 }
0x121a   : > { %1349 = vrot.lane.b32.xlu1 %v1347_v19, %s3289_s21 }
0x122e   : > { %v1283_v23 = vpop.permute.xlu0 %1282 }
0x122f   : > { %v1285_v35 = vmul.f32 %v1283_v23, %v1266_v13 }
0x1231   : > { %1353 = vrot.lane.b32.xlu2 %v1285_v35, %s3290_s26 }
0x128b   : > { %v1354_v44 = vpop.permute.xlu2 %1353 }
0x128c   : > { %v1350_v45 = vpop.permute.xlu1 %1349 }
0x128d   : > { %v1356_v2 = vsel %vm357_vm1, %v1350_v45, %v1354_v44  ;;  %2688 = vmatmul.msk.f32.vlgmr.msra.gmra.mxu3 %vm357_vm1, %v1350_v45 }
0x128e   : > { %2685 = vmatmul.msk.f32.vlgmr.msra.gmra.mxu1 %vm435_vm6, %v1356_v2  ;;  %1957 = vmatpush.msra.mxu3 %v3711_v36 }
0x128f   : > { %1892 = vmatpush.msra.mxu1 %v3733_v50 }
0x1290   : > { %1958 = vmatpush.msra.mxu3 %v3717_v49 }
0x1291   : > { %1893 = vmatpush.msra.mxu1 %v3736_v51 }
0x1292   : > { %1959 = vmatpush.msra.mxu3 %v3723_v43 }
0x1293   : > { %1894 = vmatpush.msra.mxu1 %v3739_v1 }
0x1294   : > { %1960 = vmatpush.msra.mxu3 %v3729_v27 }
0x1295   : > { %1895 = vmatpush.msra.mxu1 %v3775_v46 }
0x1297   : > { %1896 = vmatpush.msra.mxu1 %v3778_v30 }
0x1299   : > { %1897 = vmatpush.msra.mxu1 %v3781_v47 }
0x129b   : > { %1898 = vmatpush.msra.mxu1 %v3784_v34 }
0x129d   : > { %1899 = vmatpush.msra.mxu1 %v3787_v29 }
0x130b   : > { %v1377_v3 = vpop.f32.mrf.mxu1 }
0x130c   : > { %v1378_v4 = vadd.f32 %v3795_v33, %v1377_v3 }
0x130e   : > { %2938 = vtanh.f32 %v1378_v4  ;;  %v2686_v40 = vmul.f32 -1.442695, %v1378_v4 }
0x1310   : > { %v1438_v32 = vpop.f32.mrf.mxu3 }
0x1311   : > { %v1441_v37 = vadd.f32 %v2687_v31, %v1438_v32  ;;  %v2692_v32 = vld [vmem:[%s3425_s30 + $0x48] sm:$0xff] }
0x1313   : > { %2940 = vtanh.f32 %v1441_v37  ;;  %v2689_v52 = vmul.f32 -1.442695, %v1441_v37 }
0x1314   : > { %v2939_v38 = vpop.eup %2938  ;;  %2942 = vpow2.f32 %v2686_v40 }
0x1315   : > { %1402 = vrot.lane.b32.xlu1 %v2939_v38, %s3288_s20  ;;  %2944 = vpow2.f32 %v2689_v52 }
0x1319   : > { %v2941_v39 = vpop.eup %2940 }
0x131a   : > { %1464 = vrot.lane.b32.xlu0 %v2941_v39, %s3288_s20  ;;  %v2943_v41 = vpop.eup %2942 }
0x131b   : > { %v1383_v48 = vadd.f32 1.0, %v2943_v41  ;;  %v2945_v53 = vpop.eup %2944 }
0x131c   : > { %v1445_v54 = vadd.f32 1.0, %v2945_v53 }
0x131d   : > { %2946 = vrcp.f32 %v1383_v48  ;;  %v1395_v63 = vand.u32 2147483648, %v1383_v48  ;;  %vm1389_vm8 = vweird.f32 %v1383_v48  ;;  %v1393_v5 = vand.u32 2147483647, %v1383_v48 }
0x131e   : > { %2948 = vrcp.f32 %v1445_v54  ;;  %v1457_v9 = vand.u32 2147483648, %v1445_v54  ;;  %vm1451_vm12 = vweird.f32 %v1445_v54  ;;  %v1455_v12 = vand.u32 2147483647, %v1445_v54 }
0x131f   : > { %v1396_v7 = vor.u32 1.1754944e-38, %v1395_v63  ;;  %vm1394_vm11 = vcmp.eq.f32.partialorder %v1393_v5, 8.507059e+37 }
0x1320   : > { %v1458_v15 = vor.u32 1.1754944e-38, %v1457_v9  ;;  %vm1456_vm14 = vcmp.eq.f32.partialorder %v1455_v12, 8.507059e+37 }
0x1323   : > { %v2947_v55 = vpop.eup %2946 }
0x1324   : > { %v1385_v56 = vmul.f32 %v2947_v55, %v1383_v48  ;;  %v2949_v57 = vpop.eup %2948  ;;  %vm1390_vm7 = vweird.f32 %v2947_v55 }
0x1325   : > { %v1447_v59 = vmul.f32 %v2949_v57, %v1445_v54  ;;  %vm1391_vm9 = vmor %vm1389_vm8, %vm1390_vm7  ;;  %vm1452_vm10 = vweird.f32 %v2949_v57 }
0x1326   : > { %v1386_v58 = vsub.f32 1.0, %v1385_v56  ;;  %vm1453_vm13 = vmor %vm1451_vm12, %vm1452_vm10 }
0x1327   : > { %v1448_v61 = vsub.f32 1.0, %v1447_v59 }
0x1328   : > { %v1387_v60 = vmul.f32 %v2947_v55, %v1386_v58 }
0x1329   : > { %v1449_v0 = vmul.f32 %v2949_v57, %v1448_v61 }
0x132a   : > { %v1388_v62 = vadd.f32 %v2947_v55, %v1387_v60 }
0x132b   : > { %v1450_v8 = vadd.f32 %v2949_v57, %v1449_v0 }
0x132c   : > { %v1392_v6 = vsel %vm1391_vm9, %v2947_v55, %v1388_v62 }
0x132d   : > { %v1397_v11 = vsel %vm1394_vm11, %v1396_v7, %v1392_v6  ;;  %v1454_v14 = vsel %vm1453_vm13, %v2949_v57, %v1450_v8 }
0x132e   : > { %v1459_v17 = vsel %vm1456_vm14, %v1458_v15, %v1454_v14  ;;  %v1400_v28 = vmul.f32 %v1397_v11, %v3803_v22 }
0x132f   : > { %v1462_v20 = vmul.f32 %v1459_v17, %v3805_v26 }
0x1387   : > { %v1403_v10 = vpop.permute.xlu1 %1402 }
0x1388   : > { %v1405_v13 = vmul.f32 %v1403_v10, %v1397_v11 }
0x138a   : > { %1407 = vrot.lane.b32.xlu0 %v1405_v13, %s3288_s20 }
0x138c   : > { %v1465_v16 = vpop.permute.xlu0 %1464 }
0x138d   : > { %v1467_v18 = vmul.f32 %v1465_v16, %v1459_v17 }
0x138f   : > { %1469 = vrot.lane.b32.xlu2 %v1467_v18, %s3288_s20 }
0x13e9   : > { %v1470_v21 = vpop.permute.xlu2 %1469 }
0x13ea   : > { %v3835_v25 = vadd.f32 %v1470_v21, %v1462_v20 }
0x13ec   : > { %2950 = vtanh.f32 %v3835_v25 }
0x13f2   : > { %v2951_v24 = vpop.eup %2950 }
0x13f3   : > { %1475 = vrot.lane.b32.xlu1 %v2951_v24, %s3288_s20 }
0x13fc   : > { %v1408_v42 = vpop.permute.xlu0 %1407 }
0x13fd   : > { %v3840_v19 = vadd.f32 %v1408_v42, %v1400_v28 }
0x13ff   : > { %2952 = vtanh.f32 %v3840_v19 }
0x1405   : > { %v2953_v23 = vpop.eup %2952 }
0x1406   : > { %1413 = vrot.lane.b32.xlu2 %v2953_v23, %s3288_s20 }
0x1460   : > { %v1414_v35 = vpop.permute.xlu2 %1413 }
0x1461   : > { %v1416_v26 = vmul.f32 %v1414_v35, %v1397_v11 }
0x1463   : > { %1484 = vrot.lane.b32.xlu1 %v1416_v26, %s3290_s26 }
0x1465   : > { %v1476_v44 = vpop.permute.xlu1 %1475 }
0x1466   : > { %v1478_v45 = vmul.f32 %v1476_v44, %v1459_v17 }
0x1468   : > { %1480 = vrot.lane.b32.xlu0 %v1478_v45, %s3289_s21 }
0x14d5   : > { %v1485_v2 = vpop.permute.xlu1 %1484 }
0x14da   : > { %v1481_v3 = vpop.permute.xlu0 %1480 }
0x14db   : > { %v1487_v22 = vsel %vm357_vm1, %v1481_v3, %v1485_v2  ;;  %2693 = vmatmul.msk.f32.vlgmr.msra.gmra.mxu2 %vm357_vm1, %v1481_v3 }
0x14dc   : > { %2690 = vmatmul.msk.f32.vlgmr.msrb.gmra.mxu0 %vm435_vm6, %v1487_v22  ;;  %2088 = vmatpush.msra.mxu2 %v3711_v36 }
0x14dd   : > { %2023 = vmatpush.msrb.mxu0 %v3733_v50 }
0x14de   : > { %2089 = vmatpush.msra.mxu2 %v3717_v49 }
0x14df   : > { %2024 = vmatpush.msrb.mxu0 %v3736_v51 }
0x14e0   : > { %2090 = vmatpush.msra.mxu2 %v3723_v43 }
0x14e1   : > { %2025 = vmatpush.msrb.mxu0 %v3739_v1 }
0x14e2   : > { %2091 = vmatpush.msra.mxu2 %v3729_v27 }
0x14e3   : > { %2026 = vmatpush.msrb.mxu0 %v3775_v46 }
0x14e5   : > { %2027 = vmatpush.msrb.mxu0 %v3778_v30 }
0x14e7   : > { %2028 = vmatpush.msrb.mxu0 %v3781_v47 }
0x14e9   : > { %2029 = vmatpush.msrb.mxu0 %v3784_v34 }
0x14eb   : > { %2030 = vmatpush.msrb.mxu0 %v3787_v29 }
0x1559   : > { %v1508_v4 = vpop.f32.mrf.mxu0 }
0x155a   : > { %v1509_v31 = vadd.f32 %v3795_v33, %v1508_v4 }
0x155c   : > { %2954 = vtanh.f32 %v1509_v31  ;;  %v2691_v52 = vmul.f32 -1.442695, %v1509_v31  ;;  %v2697_v31 = vld [vmem:[%s3425_s30 + $0x50] sm:$0xff] }
0x155e   : > { %v1569_v37 = vpop.f32.mrf.mxu2 }
0x155f   : > { %v1572_v38 = vadd.f32 %v2692_v32, %v1569_v37 }
0x1561   : > { %2956 = vtanh.f32 %v1572_v38  ;;  %v2694_v55 = vmul.f32 -1.442695, %v1572_v38 }
0x1562   : > { %v2955_v39 = vpop.eup %2954  ;;  %2958 = vpow2.f32 %v2691_v52 }
0x1563   : > { %1533 = vrot.lane.b32.xlu2 %v2955_v39, %s3288_s20 }
0x1567   : > { %v2957_v40 = vpop.eup %2956 }
0x1568   : > { %1595 = vrot.lane.b32.xlu0 %v2957_v40, %s3288_s20  ;;  %v2959_v41 = vpop.eup %2958 }
0x1569   : > { %v1514_v48 = vadd.f32 1.0, %v2959_v41 }
0x156b   : > { %2960 = vrcp.f32 %v1514_v48  ;;  %v1526_v60 = vand.u32 2147483648, %v1514_v48  ;;  %vm1520_vm0 = vweird.f32 %v1514_v48  ;;  %v1524_v61 = vand.u32 2147483647, %v1514_v48 }
0x156c   : > { %2962 = vpow2.f32 %v2694_v55 }
0x156d   : > { %v1527_v0 = vor.u32 1.1754944e-38, %v1526_v60  ;;  %vm1525_vm3 = vcmp.eq.f32.partialorder %v1524_v61, 8.507059e+37 }
0x1571   : > { %v2961_v53 = vpop.eup %2960 }
0x1572   : > { %v1516_v54 = vmul.f32 %v2961_v53, %v1514_v48  ;;  %vm1521_vm15 = vweird.f32 %v2961_v53  ;;  %v2963_v59 = vpop.eup %2962 }
0x1573   : > { %vm1522_vm2 = vmor %vm1520_vm0, %vm1521_vm15  ;;  %v1576_v62 = vadd.f32 1.0, %v2963_v59 }
0x1574   : > { %v1517_v56 = vsub.f32 1.0, %v1516_v54 }
0x1575   : > { %2964 = vrcp.f32 %v1576_v62  ;;  %v1588_v13 = vand.u32 2147483648, %v1576_v62  ;;  %vm1582_vm5 = vweird.f32 %v1576_v62  ;;  %v1586_v14 = vand.u32 2147483647, %v1576_v62 }
0x1576   : > { %v1518_v57 = vmul.f32 %v2961_v53, %v1517_v56 }
0x1577   : > { %v1589_v16 = vor.u32 1.1754944e-38, %v1588_v13  ;;  %vm1587_vm8 = vcmp.eq.f32.partialorder %v1586_v14, 8.507059e+37 }
0x1578   : > { %v1519_v58 = vadd.f32 %v2961_v53, %v1518_v57 }
0x157a   : > { %v1523_v63 = vsel %vm1522_vm2, %v2961_v53, %v1519_v58 }
0x157b   : > { %v1528_v6 = vsel %vm1525_vm3, %v1527_v0, %v1523_v63  ;;  %v2965_v8 = vpop.eup %2964 }
0x157c   : > { %v1578_v9 = vmul.f32 %v2965_v8, %v1576_v62  ;;  %vm1583_vm4 = vweird.f32 %v2965_v8  ;;  %v1531_v21 = vmul.f32 %v1528_v6, %v3840_v19 }
0x157d   : > { %vm1584_vm7 = vmor %vm1582_vm5, %vm1583_vm4 }
0x157e   : > { %v1579_v10 = vsub.f32 1.0, %v1578_v9 }
0x1580   : > { %v1580_v11 = vmul.f32 %v2965_v8, %v1579_v10 }
0x1582   : > { %v1581_v12 = vadd.f32 %v2965_v8, %v1580_v11 }
0x1584   : > { %v1585_v15 = vsel %vm1584_vm7, %v2965_v8, %v1581_v12 }
0x1585   : > { %v1590_v18 = vsel %vm1587_vm8, %v1589_v16, %v1585_v15 }
0x1586   : > { %v1593_v42 = vmul.f32 %v1590_v18, %v3835_v25 }
0x15bd   : > { %v1534_v5 = vpop.permute.xlu2 %1533 }
0x15be   : > { %v1536_v7 = vmul.f32 %v1534_v5, %v1528_v6 }
0x15c0   : > { %1538 = vrot.lane.b32.xlu1 %v1536_v7, %s3288_s20 }
0x15da   : > { %v1596_v17 = vpop.permute.xlu0 %1595 }
0x15db   : > { %v1598_v20 = vmul.f32 %v1596_v17, %v1590_v18 }
0x15dd   : > { %1600 = vrot.lane.b32.xlu2 %v1598_v20, %s3288_s20 }
0x1632   : > { %v1539_v24 = vpop.permute.xlu1 %1538 }
0x1633   : > { %v3868_v28 = vadd.f32 %v1539_v24, %v1531_v21 }
0x1635   : > { %2966 = vtanh.f32 %v3868_v28 }
0x1637   : > { %v1601_v23 = vpop.permute.xlu2 %1600 }
0x1638   : > { %v3872_v35 = vadd.f32 %v1601_v23, %v1593_v42 }
0x163a   : > { %2968 = vtanh.f32 %v3872_v35 }
0x163b   : > { %v2967_v26 = vpop.eup %2966 }
0x163c   : > { %1544 = vrot.lane.b32.xlu0 %v2967_v26, %s3288_s20 }
0x1640   : > { %v2969_v44 = vpop.eup %2968 }
0x1641   : > { %1606 = vrot.lane.b32.xlu1 %v2969_v44, %s3288_s20 }
0x16ae   : > { %v1545_v45 = vpop.permute.xlu0 %1544 }
0x16af   : > { %v1547_v19 = vmul.f32 %v1545_v45, %v1528_v6 }
0x16b1   : > { %1615 = vrot.lane.b32.xlu0 %v1547_v19, %s3290_s26 }
0x16b3   : > { %v1607_v2 = vpop.permute.xlu1 %1606 }
0x16b4   : > { %v1609_v3 = vmul.f32 %v1607_v2, %v1590_v18 }
0x16b6   : > { %1611 = vrot.lane.b32.xlu2 %v1609_v3, %s3289_s21 }
0x1710   : > { %v1612_v25 = vpop.permute.xlu2 %1611 }
0x1711   : > { %2698 = vmatmul.msk.f32.vlgmr.msrb.gmra.mxu1 %vm357_vm1, %v1612_v25 }
0x1712   : > { %2219 = vmatpush.msrb.mxu1 %v3711_v36 }
0x1714   : > { %2220 = vmatpush.msrb.mxu1 %v3717_v49 }
0x1716   : > { %2221 = vmatpush.msrb.mxu1 %v3723_v43 }
0x1718   : > { %2222 = vmatpush.msrb.mxu1 %v3729_v27 }
0x1723   : > { %v1616_v22 = vpop.permute.xlu0 %1615 }
0x1724   : > { %v1618_v4 = vsel %vm357_vm1, %v1612_v25, %v1616_v22 }
0x1725   : > { %2695 = vmatmul.msk.f32.vlgmr.msrb.gmra.mxu3 %vm435_vm6, %v1618_v4 }
0x1726   : > { %2154 = vmatpush.msrb.mxu3 %v3733_v50 }
0x1728   : > { %2155 = vmatpush.msrb.mxu3 %v3736_v51 }
0x172a   : > { %2156 = vmatpush.msrb.mxu3 %v3739_v1 }
0x172c   : > { %2157 = vmatpush.msrb.mxu3 %v3775_v46 }
0x172e   : > { %2158 = vmatpush.msrb.mxu3 %v3778_v30 }
0x1730   : > { %2159 = vmatpush.msrb.mxu3 %v3781_v47 }
0x1732   : > { %2160 = vmatpush.msrb.mxu3 %v3784_v34 }
0x1734   : > { %2161 = vmatpush.msrb.mxu3 %v3787_v29 }
0x178e   : > { %v1700_v32 = vpop.f32.mrf.mxu1 }
0x178f   : > { %v1703_v37 = vadd.f32 %v2697_v31, %v1700_v32 }
0x1791   : > { %2970 = vtanh.f32 %v1703_v37  ;;  %v2699_v41 = vmul.f32 -1.442695, %v1703_v37 }
0x1797   : > { %v2971_v38 = vpop.eup %2970 }
0x1798   : > { %1726 = vrot.lane.b32.xlu1 %v2971_v38, %s3288_s20 }
0x17a8   : > { %v1639_v39 = vpop.f32.mrf.mxu3 }
0x17a9   : > { %v1640_v40 = vadd.f32 %v3795_v33, %v1639_v39 }
0x17ab   : > { %2972 = vtanh.f32 %v1640_v40  ;;  %v2696_v48 = vmul.f32 -1.442695, %v1640_v40 }
0x17ac   : > { %2974 = vpow2.f32 %v2699_v41 }
0x17ad   : > { %2976 = vpow2.f32 %v2696_v48 }
0x17b1   : > { %v2973_v52 = vpop.eup %2972 }
0x17b2   : > { %1664 = vrot.lane.b32.xlu2 %v2973_v52, %s3288_s20  ;;  %v2975_v53 = vpop.eup %2974 }
0x17b3   : > { %v2977_v54 = vpop.eup %2976  ;;  %v1707_v55 = vadd.f32 1.0, %v2975_v53 }
0x17b4   : > { %v1645_v56 = vadd.f32 1.0, %v2977_v54 }
0x17b5   : > { %2978 = vrcp.f32 %v1707_v55  ;;  %v1719_v6 = vand.u32 2147483648, %v1707_v55  ;;  %vm1713_vm10 = vweird.f32 %v1707_v55  ;;  %v1717_v7 = vand.u32 2147483647, %v1707_v55 }
0x17b6   : > { %2980 = vrcp.f32 %v1645_v56  ;;  %v1657_v9 = vand.u32 2147483648, %v1645_v56  ;;  %vm1651_vm13 = vweird.f32 %v1645_v56  ;;  %v1655_v11 = vand.u32 2147483647, %v1645_v56 }
0x17b7   : > { %v1720_v12 = vor.u32 1.1754944e-38, %v1719_v6  ;;  %vm1718_vm15 = vcmp.eq.f32.partialorder %v1717_v7, 8.507059e+37 }
0x17b8   : > { %v1658_v16 = vor.u32 1.1754944e-38, %v1657_v9  ;;  %vm1656_vm0 = vcmp.eq.f32.partialorder %v1655_v11, 8.507059e+37 }
0x17bb   : > { %v2979_v57 = vpop.eup %2978 }
0x17bc   : > { %v2981_v58 = vpop.eup %2980  ;;  %v1709_v59 = vmul.f32 %v2979_v57, %v1707_v55  ;;  %vm1714_vm9 = vweird.f32 %v2979_v57 }
0x17bd   : > { %v1647_v60 = vmul.f32 %v2981_v58, %v1645_v56  ;;  %vm1652_vm11 = vweird.f32 %v2981_v58  ;;  %vm1715_vm12 = vmor %vm1713_vm10, %vm1714_vm9 }
0x17be   : > { %v1710_v61 = vsub.f32 1.0, %v1709_v59  ;;  %vm1653_vm14 = vmor %vm1651_vm13, %vm1652_vm11 }
0x17bf   : > { %v1648_v62 = vsub.f32 1.0, %v1647_v60 }
0x17c0   : > { %v1711_v63 = vmul.f32 %v2979_v57, %v1710_v61 }
0x17c1   : > { %v1649_v0 = vmul.f32 %v2981_v58, %v1648_v62 }
0x17c2   : > { %v1712_v5 = vadd.f32 %v2979_v57, %v1711_v63 }
0x17c3   : > { %v1650_v8 = vadd.f32 %v2981_v58, %v1649_v0 }
0x17c4   : > { %v1716_v10 = vsel %vm1715_vm12, %v2979_v57, %v1712_v5 }
0x17c5   : > { %v1654_v13 = vsel %vm1653_vm14, %v2981_v58, %v1650_v8  ;;  %v1721_v15 = vsel %vm1718_vm15, %v1720_v12, %v1716_v10 }
0x17c6   : > { %v1659_v20 = vsel %vm1656_vm0, %v1658_v16, %v1654_v13  ;;  %v1724_v24 = vmul.f32 %v1721_v15, %v3872_v35 }
0x17c7   : > { %v1662_v26 = vmul.f32 %v1659_v20, %v3868_v28 }
0x180a   : > { %v1727_v14 = vpop.permute.xlu1 %1726 }
0x180b   : > { %v1729_v17 = vmul.f32 %v1727_v14, %v1721_v15 }
0x180c   : > { %v1665_v18 = vpop.permute.xlu2 %1664 }
0x180d   : > { %v1667_v21 = vmul.f32 %v1665_v18, %v1659_v20  ;;  %1731 = vrot.lane.b32.xlu0 %v1729_v17, %s3288_s20 }
0x180f   : > { %1669 = vrot.lane.b32.xlu1 %v1667_v21, %s3288_s20 }
0x187f   : > { %v1732_v42 = vpop.permute.xlu0 %1731 }
0x1880   : > { %v3901_v23 = vadd.f32 %v1732_v42, %v1724_v24 }
0x1881   : > { %v1670_v44 = vpop.permute.xlu1 %1669 }
0x1882   : > { %2982 = vtanh.f32 %v3901_v23  ;;  %v3905_v45 = vadd.f32 %v1670_v44, %v1662_v26 }
0x1884   : > { %2984 = vtanh.f32 %v3905_v45 }
0x1888   : > { %v2983_v19 = vpop.eup %2982 }
0x1889   : > { %1737 = vrot.lane.b32.xlu2 %v2983_v19, %s3288_s20 }
0x188a   : > { %v2985_v2 = vpop.eup %2984 }
0x188b   : > { %1675 = vrot.lane.b32.xlu0 %v2985_v2, %s3288_s20 }
0x18e3   : > { %v1738_v3 = vpop.permute.xlu2 %1737 }
0x18e4   : > { %v1740_v35 = vmul.f32 %v1738_v3, %v1721_v15 }
0x18e6   : > { %1742 = vrot.lane.b32.xlu1 %v1740_v35, %s3289_s21  ;;  %v3087_v35 = vld [vmem:[#allocation5 + $0x38] sm:$0xff] }
0x18fd   : > { %v1676_v25 = vpop.permute.xlu0 %1675 }
0x18fe   : > { %v1678_v22 = vmul.f32 %v1676_v25, %v1659_v20  ;;  %v3088_v25 = vld [vmem:[#allocation5 + $0x30] sm:$0xff] }
0x1900   : > { %1746 = vrot.lane.b32.xlu2 %v1678_v22, %s3290_s26  ;;  %v3089_v22 = vld [vmem:[#allocation5 + $0x28] sm:$0xff] }
0x1958   : > { %v1743_v28 = vpop.permute.xlu1 %1742 }
0x1959   : > { %2703 = vmatmul.msk.f32.vlgmr.msra.gmra.mxu0 %vm357_vm1, %v1743_v28 }
0x195a   : > { %v1747_v4 = vpop.permute.xlu2 %1746  ;;  %2350 = vmatpush.msra.mxu0 %v3711_v36  ;;  %v2702_v36 = vld [vmem:[%s3425_s30 + $0x58] sm:$0xff] }
0x195b   : > { %v1749_v31 = vsel %vm357_vm1, %v1743_v28, %v1747_v4  ;;  %v2707_v28 = vld [vmem:[%s3425_s30 + $0x60] sm:$0xff] }
0x195c   : > { %2700 = vmatmul.msk.f32.vlgmr.msrb.gmra.mxu2 %vm435_vm6, %v1749_v31  ;;  %2351 = vmatpush.msra.mxu0 %v3717_v49 }
0x195d   : > { %2285 = vmatpush.msrb.mxu2 %v3733_v50 }
0x195e   : > { %2352 = vmatpush.msra.mxu0 %v3723_v43 }
0x195f   : > { %2286 = vmatpush.msrb.mxu2 %v3736_v51 }
0x1960   : > { %2353 = vmatpush.msra.mxu0 %v3729_v27 }
0x1961   : > { %2287 = vmatpush.msrb.mxu2 %v3739_v1 }
0x1963   : > { %2288 = vmatpush.msrb.mxu2 %v3775_v46 }
0x1965   : > { %2289 = vmatpush.msrb.mxu2 %v3778_v30 }
0x1967   : > { %2290 = vmatpush.msrb.mxu2 %v3781_v47 }
0x1969   : > { %2291 = vmatpush.msrb.mxu2 %v3784_v34 }
0x196b   : > { %2292 = vmatpush.msrb.mxu2 %v3787_v29 }
0x19d6   : > { %v1831_v49 = vpop.f32.mrf.mxu0 }
0x19d7   : > { %v1834_v50 = vadd.f32 %v2702_v36, %v1831_v49 }
0x19d9   : > { %2986 = vtanh.f32 %v1834_v50  ;;  %v2704_v32 = vmul.f32 -1.442695, %v1834_v50 }
0x19df   : > { %v2987_v43 = vpop.eup %2986  ;;  %v1770_v51 = vpop.f32.mrf.mxu2 }
0x19e0   : > { %v1771_v27 = vadd.f32 %v3795_v33, %v1770_v51  ;;  %1857 = vrot.lane.b32.xlu0 %v2987_v43, %s3288_s20 }
0x19e2   : > { %2988 = vtanh.f32 %v1771_v27  ;;  %v2701_v37 = vmul.f32 -1.442695, %v1771_v27 }
0x19e3   : > { %2990 = vpow2.f32 %v2704_v32 }
0x19e4   : > { %2992 = vpow2.f32 %v2701_v37 }
0x19e8   : > { %v2989_v1 = vpop.eup %2988 }
0x19e9   : > { %1795 = vrot.lane.b32.xlu1 %v2989_v1, %s3288_s20  ;;  %v2991_v38 = vpop.eup %2990 }
0x19ea   : > { %v1838_v39 = vadd.f32 1.0, %v2991_v38  ;;  %v2993_v40 = vpop.eup %2992 }
0x19eb   : > { %v1776_v52 = vadd.f32 1.0, %v2993_v40 }
0x19ec   : > { %2994 = vrcp.f32 %v1838_v39  ;;  %v1850_v58 = vand.u32 2147483648, %v1838_v39  ;;  %vm1844_vm3 = vweird.f32 %v1838_v39  ;;  %v1848_v60 = vand.u32 2147483647, %v1838_v39 }
0x19ed   : > { %2996 = vrcp.f32 %v1776_v52  ;;  %v1788_v8 = vand.u32 2147483648, %v1776_v52  ;;  %vm1782_vm8 = vweird.f32 %v1776_v52  ;;  %v1786_v9 = vand.u32 2147483647, %v1776_v52 }
0x19ee   : > { %v1851_v62 = vor.u32 1.1754944e-38, %v1850_v58  ;;  %vm1849_vm5 = vcmp.eq.f32.partialorder %v1848_v60, 8.507059e+37 }
0x19ef   : > { %v1789_v11 = vor.u32 1.1754944e-38, %v1788_v8  ;;  %vm1787_vm10 = vcmp.eq.f32.partialorder %v1786_v9, 8.507059e+37 }
0x19f2   : > { %v2995_v41 = vpop.eup %2994 }
0x19f3   : > { %v1840_v48 = vmul.f32 %v2995_v41, %v1838_v39  ;;  %v2997_v54 = vpop.eup %2996  ;;  %vm1845_vm2 = vweird.f32 %v2995_v41 }
0x19f4   : > { %v1778_v56 = vmul.f32 %v2997_v54, %v1776_v52  ;;  %vm1846_vm4 = vmor %vm1844_vm3, %vm1845_vm2  ;;  %vm1783_vm7 = vweird.f32 %v2997_v54 }
0x19f5   : > { %v1841_v53 = vsub.f32 1.0, %v1840_v48  ;;  %vm1784_vm9 = vmor %vm1782_vm8, %vm1783_vm7 }
0x19f6   : > { %v1779_v59 = vsub.f32 1.0, %v1778_v56 }
0x19f7   : > { %v1842_v55 = vmul.f32 %v2995_v41, %v1841_v53 }
0x19f8   : > { %v1780_v63 = vmul.f32 %v2997_v54, %v1779_v59 }
0x19f9   : > { %v1843_v57 = vadd.f32 %v2995_v41, %v1842_v55 }
0x19fa   : > { %v1781_v7 = vadd.f32 %v2997_v54, %v1780_v63 }
0x19fb   : > { %v1847_v61 = vsel %vm1846_vm4, %v2995_v41, %v1843_v57 }
0x19fc   : > { %v1852_v0 = vsel %vm1849_vm5, %v1851_v62, %v1847_v61  ;;  %v1785_v10 = vsel %vm1784_vm9, %v2997_v54, %v1781_v7 }
0x19fd   : > { %v1790_v13 = vsel %vm1787_vm10, %v1789_v11, %v1785_v10  ;;  %v1855_v15 = vmul.f32 %v1852_v0, %v3901_v23 }
0x19fe   : > { %v1793_v20 = vmul.f32 %v1790_v13, %v3905_v45 }
0x1a52   : > { %v1858_v5 = vpop.permute.xlu0 %1857 }
0x1a53   : > { %v1860_v6 = vmul.f32 %v1858_v5, %v1852_v0 }
0x1a55   : > { %1862 = vrot.lane.b32.xlu2 %v1860_v6, %s3288_s20 }
0x1a5b   : > { %v1796_v12 = vpop.permute.xlu1 %1795 }
0x1a5c   : > { %v1798_v14 = vmul.f32 %v1796_v12, %v1790_v13 }
0x1a5e   : > { %1800 = vrot.lane.b32.xlu0 %v1798_v14, %s3288_s20 }
0x1aaf   : > { %v1863_v16 = vpop.permute.xlu2 %1862 }
0x1ab0   : > { %v3934_v17 = vadd.f32 %v1863_v16, %v1855_v15 }
0x1ab2   : > { %2998 = vtanh.f32 %v3934_v17 }
0x1ab8   : > { %v2999_v18 = vpop.eup %2998 }
0x1ab9   : > { %1868 = vrot.lane.b32.xlu1 %v2999_v18, %s3288_s20 }
0x1ad0   : > { %v1801_v21 = vpop.permute.xlu0 %1800 }
0x1ad1   : > { %v3939_v24 = vadd.f32 %v1801_v21, %v1793_v20 }
0x1ad3   : > { %3000 = vtanh.f32 %v3939_v24 }
0x1ad9   : > { %v3001_v42 = vpop.eup %3000 }
0x1ada   : > { %1806 = vrot.lane.b32.xlu2 %v3001_v42, %s3288_s20 }
0x1b2b   : > { %v1869_v26 = vpop.permute.xlu1 %1868 }
0x1b2c   : > { %v1871_v23 = vmul.f32 %v1869_v26, %v1852_v0 }
0x1b2e   : > { %1873 = vrot.lane.b32.xlu0 %v1871_v23, %s3289_s21 }
0x1b34   : > { %v1807_v44 = vpop.permute.xlu2 %1806 }
0x1b35   : > { %v1809_v19 = vmul.f32 %v1807_v44, %v1790_v13 }
0x1b37   : > { %1877 = vrot.lane.b32.xlu1 %v1809_v19, %s3290_s26  ;;  %v3979_v19 = vld [vmem:[%s4103_s3] ss:$0 sm:$0xff] }
0x1ba0   : > { %v1874_v2 = vpop.permute.xlu0 %1873 }
0x1ba1   : > { %2708 = vmatmul.msk.f32.vlgmr.msra.gmra.mxu3 %vm357_vm1, %v1874_v2 }
0x1ba9   : > { %v1878_v45 = vpop.permute.xlu1 %1877 }
0x1baa   : > { %v1880_v3 = vsel %vm357_vm1, %v1874_v2, %v1878_v45 }
0x1bab   : > { %2705 = vmatmul.msk.f32.vlgmr.msra.gmra.mxu1 %vm435_vm6, %v1880_v3 }
0x1bac   : > { %2416 = vmatpush.msra.mxu1 %v3087_v35 }
0x1bae   : > { %2417 = vmatpush.msra.mxu1 %v3088_v25 }
0x1bb0   : > { %2418 = vmatpush.msra.mxu1 %v3089_v22 }
0x1bb2   : > { %2419 = vmatpush.msra.mxu1 %v3775_v46 }
0x1bb4   : > { %2420 = vmatpush.msra.mxu1 %v3778_v30 }
0x1bb6   : > { %2421 = vmatpush.msra.mxu1 %v3781_v47 }
0x1bb8   : > { %2422 = vmatpush.msra.mxu1 %v3784_v34 }
0x1bba   : > { %2423 = vmatpush.msra.mxu1 %v3787_v29 }
0x1c24   : > { %v1962_v4 = vpop.f32.mrf.mxu3 }
0x1c25   : > { %v1965_v31 = vadd.f32 %v2707_v28, %v1962_v4 }
0x1c27   : > { %3002 = vtanh.f32 %v1965_v31  ;;  %v2709_v30 = vmul.f32 -1.442695, %v1965_v31 }
0x1c28   : > { %v1901_v36 = vpop.f32.mrf.mxu1 }
0x1c29   : > { %v1902_v49 = vadd.f32 %v3795_v33, %v1901_v36 }
0x1c2b   : > { %3004 = vtanh.f32 %v1902_v49  ;;  %v2706_v51 = vmul.f32 -1.442695, %v1902_v49 }
0x1c2c   : > { %3006 = vpow2.f32 %v2709_v30 }
0x1c2d   : > { %v3003_v50 = vpop.eup %3002 }
0x1c2e   : > { %1988 = vrot.lane.b32.xlu2 %v3003_v50, %s3288_s20 }
0x1c31   : > { %v3005_v46 = vpop.eup %3004 }
0x1c32   : > { %1926 = vrot.lane.b32.xlu0 %v3005_v46, %s3288_s20  ;;  %v3007_v47 = vpop.eup %3006 }
0x1c33   : > { %v1969_v34 = vadd.f32 1.0, %v3007_v47 }
0x1c35   : > { %3008 = vrcp.f32 %v1969_v34  ;;  %v1981_v37 = vand.u32 2147483648, %v1969_v34  ;;  %vm1975_vm12 = vweird.f32 %v1969_v34  ;;  %v1979_v38 = vand.u32 2147483647, %v1969_v34 }
0x1c36   : > { %3010 = vpow2.f32 %v2706_v51 }
0x1c37   : > { %v1982_v52 = vor.u32 1.1754944e-38, %v1981_v37  ;;  %vm1980_vm14 = vcmp.eq.f32.partialorder %v1979_v38, 8.507059e+37 }
0x1c3b   : > { %v3009_v29 = vpop.eup %3008 }
0x1c3c   : > { %v1971_v43 = vmul.f32 %v3009_v29, %v1969_v34  ;;  %v3011_v32 = vpop.eup %3010  ;;  %vm1976_vm11 = vweird.f32 %v3009_v29 }
0x1c3d   : > { %v1907_v39 = vadd.f32 1.0, %v3011_v32  ;;  %vm1977_vm13 = vmor %vm1975_vm12, %vm1976_vm11 }
0x1c3e   : > { %v1972_v27 = vsub.f32 1.0, %v1971_v43 }
0x1c3f   : > { %3012 = vrcp.f32 %v1907_v39  ;;  %v1919_v59 = vand.u32 2147483648, %v1907_v39  ;;  %vm1913_vm0 = vweird.f32 %v1907_v39  ;;  %v1917_v60 = vand.u32 2147483647, %v1907_v39 }
0x1c40   : > { %v1973_v1 = vmul.f32 %v3009_v29, %v1972_v27 }
0x1c41   : > { %v1920_v62 = vor.u32 1.1754944e-38, %v1919_v59  ;;  %vm1918_vm3 = vcmp.eq.f32.partialorder %v1917_v60, 8.507059e+37 }
0x1c42   : > { %v1974_v33 = vadd.f32 %v3009_v29, %v1973_v1 }
0x1c44   : > { %v1978_v40 = vsel %vm1977_vm13, %v3009_v29, %v1974_v33 }
0x1c45   : > { %v1983_v48 = vsel %vm1980_vm14, %v1982_v52, %v1978_v40  ;;  %v3013_v54 = vpop.eup %3012 }
0x1c46   : > { %v1909_v55 = vmul.f32 %v3013_v54, %v1907_v39  ;;  %vm1914_vm15 = vweird.f32 %v3013_v54  ;;  %v1986_v6 = vmul.f32 %v1983_v48, %v3934_v17 }
0x1c47   : > { %vm1915_vm2 = vmor %vm1913_vm0, %vm1914_vm15 }
0x1c48   : > { %v1910_v56 = vsub.f32 1.0, %v1909_v55 }
0x1c4a   : > { %v1911_v57 = vmul.f32 %v3013_v54, %v1910_v56 }
0x1c4c   : > { %v1912_v58 = vadd.f32 %v3013_v54, %v1911_v57 }
0x1c4e   : > { %v1916_v61 = vsel %vm1915_vm2, %v3013_v54, %v1912_v58 }
0x1c4f   : > { %v1921_v0 = vsel %vm1918_vm3, %v1920_v62, %v1916_v61 }
0x1c50   : > { %v1924_v9 = vmul.f32 %v1921_v0, %v3939_v24  ;;  %v2712_v24 = vld [vmem:[%s3425_s30 + $0x68] sm:$0xff] }
0x1c88   : > { %v1989_v41 = vpop.permute.xlu2 %1988 }
0x1c89   : > { %v1991_v53 = vmul.f32 %v1989_v41, %v1983_v48 }
0x1c8b   : > { %1993 = vrot.lane.b32.xlu1 %v1991_v53, %s3288_s20 }
0x1ca4   : > { %v1927_v63 = vpop.permute.xlu0 %1926 }
0x1ca5   : > { %v1929_v5 = vmul.f32 %v1927_v63, %v1921_v0 }
0x1ca7   : > { %1931 = vrot.lane.b32.xlu2 %v1929_v5, %s3288_s20 }
0x1cfd   : > { %v1994_v7 = vpop.permute.xlu1 %1993 }
0x1cfe   : > { %v3960_v8 = vadd.f32 %v1994_v7, %v1986_v6 }
0x1d00   : > { %3014 = vtanh.f32 %v3960_v8 }
0x1d01   : > { %v1932_v10 = vpop.permute.xlu2 %1931 }
0x1d02   : > { %v3964_v11 = vadd.f32 %v1932_v10, %v1924_v9  ;;  %v2717_v10 = vld [vmem:[%s3425_s30 + $0x70] sm:$0xff] }
0x1d04   : > { %3016 = vtanh.f32 %v3964_v11 }
0x1d06   : > { %v3015_v12 = vpop.eup %3014 }
0x1d07   : > { %1999 = vrot.lane.b32.xlu0 %v3015_v12, %s3288_s20 }
0x1d0a   : > { %v3017_v13 = vpop.eup %3016 }
0x1d0b   : > { %1937 = vrot.lane.b32.xlu1 %v3017_v13, %s3288_s20 }
0x1d79   : > { %v2000_v14 = vpop.permute.xlu0 %1999 }
0x1d7a   : > { %v2002_v15 = vmul.f32 %v2000_v14, %v1983_v48 }
0x1d7c   : > { %2004 = vrot.lane.b32.xlu2 %v2002_v15, %s3289_s21 }
0x1d7d   : > { %v1938_v16 = vpop.permute.xlu1 %1937 }
0x1d7e   : > { %v1940_v17 = vmul.f32 %v1938_v16, %v1921_v0 }
0x1d80   : > { %2008 = vrot.lane.b32.xlu0 %v1940_v17, %s3290_s26 }
0x1dd6   : > { %v2005_v18 = vpop.permute.xlu2 %2004 }
0x1dd7   : > { %2713 = vmatmul.msk.f32.vlgmr.msra.gmra.mxu2 %vm357_vm1, %v2005_v18 }
0x1df2   : > { %v2009_v20 = vpop.permute.xlu0 %2008 }
0x1df3   : > { %v2011_v21 = vsel %vm357_vm1, %v2005_v18, %v2009_v20 }
0x1df4   : > { %2710 = vmatmul.msk.f32.vlgmr.msrb.gmra.mxu0 %vm435_vm6, %v2011_v21 }
0x1e5a   : > { %v2093_v42 = vpop.f32.mrf.mxu2 }
0x1e5b   : > { %v2096_v26 = vadd.f32 %v2712_v24, %v2093_v42 }
0x1e5d   : > { %3018 = vtanh.f32 %v2096_v26  ;;  %v2714_v3 = vmul.f32 -1.442695, %v2096_v26 }
0x1e63   : > { %v3019_v23 = vpop.eup %3018 }
0x1e64   : > { %2119 = vrot.lane.b32.xlu2 %v3019_v23, %s3288_s20 }
0x1e71   : > { %v2032_v44 = vpop.f32.mrf.mxu0 }
0x1e72   : > { %v2033_v2 = vadd.f32 %v3979_v19, %v2032_v44 }
0x1e74   : > { %3020 = vtanh.f32 %v2033_v2  ;;  %v2711_v43 = vmul.f32 -1.442695, %v2033_v2 }
0x1e75   : > { %3022 = vpow2.f32 %v2714_v3 }
0x1e7a   : > { %v3021_v45 = vpop.eup %3020 }
0x1e7b   : > { %2057 = vrot.lane.b32.xlu1 %v3021_v45, %s3288_s20  ;;  %v3023_v35 = vpop.eup %3022 }
0x1e7c   : > { %v2100_v25 = vadd.f32 1.0, %v3023_v35 }
0x1e7e   : > { %3024 = vrcp.f32 %v2100_v25  ;;  %v2112_v49 = vand.u32 2147483648, %v2100_v25  ;;  %vm2106_vm5 = vweird.f32 %v2100_v25  ;;  %v2110_v50 = vand.u32 2147483647, %v2100_v25 }
0x1e7f   : > { %3026 = vpow2.f32 %v2711_v43 }
0x1e80   : > { %v2113_v30 = vor.u32 1.1754944e-38, %v2112_v49  ;;  %vm2111_vm8 = vcmp.eq.f32.partialorder %v2110_v50, 8.507059e+37 }
0x1e84   : > { %v3025_v22 = vpop.eup %3024 }
0x1e85   : > { %v2102_v28 = vmul.f32 %v3025_v22, %v2100_v25  ;;  %vm2107_vm4 = vweird.f32 %v3025_v22  ;;  %v3027_v51 = vpop.eup %3026 }
0x1e86   : > { %vm2108_vm7 = vmor %vm2106_vm5, %vm2107_vm4  ;;  %v2038_v27 = vadd.f32 1.0, %v3027_v51 }
0x1e87   : > { %v2103_v4 = vsub.f32 1.0, %v2102_v28 }
0x1e88   : > { %3028 = vrcp.f32 %v2038_v27  ;;  %v2050_v39 = vand.u32 2147483648, %v2038_v27  ;;  %vm2044_vm10 = vweird.f32 %v2038_v27  ;;  %v2048_v40 = vand.u32 2147483647, %v2038_v27 }
0x1e89   : > { %v2104_v31 = vmul.f32 %v3025_v22, %v2103_v4 }
0x1e8a   : > { %v2051_v41 = vor.u32 1.1754944e-38, %v2050_v39  ;;  %vm2049_vm12 = vcmp.eq.f32.partialorder %v2048_v40, 8.507059e+37 }
0x1e8b   : > { %v2105_v36 = vadd.f32 %v3025_v22, %v2104_v31 }
0x1e8d   : > { %v2109_v46 = vsel %vm2108_vm7, %v3025_v22, %v2105_v36 }
0x1e8e   : > { %v2114_v34 = vsel %vm2111_vm8, %v2113_v30, %v2109_v46  ;;  %v3029_v1 = vpop.eup %3028 }
0x1e8f   : > { %v2040_v32 = vmul.f32 %v3029_v1, %v2038_v27  ;;  %vm2045_vm9 = vweird.f32 %v3029_v1  ;;  %v2117_v55 = vmul.f32 %v2114_v34, %v3960_v8 }
0x1e90   : > { %vm2046_vm11 = vmor %vm2044_vm10, %vm2045_vm9 }
0x1e91   : > { %v2041_v33 = vsub.f32 1.0, %v2040_v32 }
0x1e93   : > { %v2042_v37 = vmul.f32 %v3029_v1, %v2041_v33 }
0x1e95   : > { %v2043_v38 = vadd.f32 %v3029_v1, %v2042_v37 }
0x1e97   : > { %v2047_v52 = vsel %vm2046_vm11, %v3029_v1, %v2043_v38 }
0x1e98   : > { %v2052_v53 = vsel %vm2049_vm12, %v2051_v41, %v2047_v52 }
0x1e99   : > { %v2055_v59 = vmul.f32 %v2052_v53, %v3964_v11 }
0x1ebe   : > { %v2120_v47 = vpop.permute.xlu2 %2119 }
0x1ebf   : > { %v2122_v29 = vmul.f32 %v2120_v47, %v2114_v34 }
0x1ec1   : > { %2124 = vrot.lane.b32.xlu1 %v2122_v29, %s3288_s20 }
0x1eed   : > { %v2058_v48 = vpop.permute.xlu1 %2057 }
0x1eee   : > { %v2060_v54 = vmul.f32 %v2058_v48, %v2052_v53 }
0x1ef0   : > { %2062 = vrot.lane.b32.xlu0 %v2060_v54, %s3288_s20 }
0x1f33   : > { %v2125_v56 = vpop.permute.xlu1 %2124 }
0x1f34   : > { %v3986_v57 = vadd.f32 %v2125_v56, %v2117_v55 }
0x1f36   : > { %3030 = vtanh.f32 %v3986_v57 }
0x1f3c   : > { %v3031_v58 = vpop.eup %3030 }
0x1f3d   : > { %2130 = vrot.lane.b32.xlu0 %v3031_v58, %s3288_s20 }
0x1f62   : > { %v2063_v60 = vpop.permute.xlu0 %2062 }
0x1f63   : > { %v3991_v61 = vadd.f32 %v2063_v60, %v2055_v59  ;;  %v2722_v59 = vld [vmem:[%s3425_s30 + $0x78] sm:$0xff] }
0x1f65   : > { %3032 = vtanh.f32 %v3991_v61 }
0x1f6b   : > { %v3033_v62 = vpop.eup %3032 }
0x1f6c   : > { %2068 = vrot.lane.b32.xlu2 %v3033_v62, %s3288_s20 }
0x1faf   : > { %v2131_v63 = vpop.permute.xlu0 %2130 }
0x1fb0   : > { %v2133_v0 = vmul.f32 %v2131_v63, %v2114_v34 }
0x1fb2   : > { %2135 = vrot.lane.b32.xlu1 %v2133_v0, %s3289_s21 }
0x1fc6   : > { %v2069_v5 = vpop.permute.xlu2 %2068 }
0x1fc7   : > { %v2071_v6 = vmul.f32 %v2069_v5, %v2052_v53 }
0x1fc9   : > { %2139 = vrot.lane.b32.xlu2 %v2071_v6, %s3290_s26 }
0x2023   : > { %v2140_v7 = vpop.permute.xlu2 %2139 }
0x2024   : > { %v2136_v8 = vpop.permute.xlu1 %2135 }
0x2025   : > { %v2142_v9 = vsel %vm357_vm1, %v2136_v8, %v2140_v7  ;;  %2718 = vmatmul.msk.f32.vlgmr.msrb.gmra.mxu1 %vm357_vm1, %v2136_v8 }
0x2026   : > { %2715 = vmatmul.msk.f32.vlgmr.msrb.gmra.mxu3 %vm435_vm6, %v2142_v9 }
0x20a2   : > { %v2224_v11 = vpop.f32.mrf.mxu1 }
0x20a3   : > { %v2227_v12 = vadd.f32 %v2717_v10, %v2224_v11 }
0x20a5   : > { %3034 = vtanh.f32 %v2227_v12  ;;  %v2719_v17 = vmul.f32 -1.442695, %v2227_v12 }
0x20a9   : > { %v2163_v13 = vpop.f32.mrf.mxu3 }
0x20aa   : > { %v2164_v14 = vadd.f32 %v3979_v19, %v2163_v13 }
0x20ab   : > { %v3035_v15 = vpop.eup %3034 }
0x20ac   : > { %3036 = vtanh.f32 %v2164_v14  ;;  %2250 = vrot.lane.b32.xlu1 %v3035_v15, %s3288_s20  ;;  %v2716_v18 = vmul.f32 -1.442695, %v2164_v14 }
0x20ad   : > { %3038 = vpow2.f32 %v2719_v17 }
0x20ae   : > { %3040 = vpow2.f32 %v2716_v18 }
0x20b2   : > { %v3037_v16 = vpop.eup %3036 }
0x20b3   : > { %2188 = vrot.lane.b32.xlu0 %v3037_v16, %s3288_s20  ;;  %v3039_v20 = vpop.eup %3038 }
0x20b4   : > { %v2231_v21 = vadd.f32 1.0, %v3039_v20  ;;  %v3041_v24 = vpop.eup %3040 }
0x20b5   : > { %v2169_v42 = vadd.f32 1.0, %v3041_v24 }
0x20b6   : > { %3042 = vrcp.f32 %v2231_v21  ;;  %v2243_v22 = vand.u32 2147483648, %v2231_v21  ;;  %vm2237_vm14 = vweird.f32 %v2231_v21  ;;  %v2241_v28 = vand.u32 2147483647, %v2231_v21 }
0x20b7   : > { %3044 = vrcp.f32 %v2169_v42  ;;  %v2181_v47 = vand.u32 2147483648, %v2169_v42  ;;  %vm2175_vm3 = vweird.f32 %v2169_v42  ;;  %v2179_v34 = vand.u32 2147483647, %v2169_v42 }
0x20b8   : > { %v2244_v36 = vor.u32 1.1754944e-38, %v2243_v22  ;;  %vm2242_vm0 = vcmp.eq.f32.partialorder %v2241_v28, 8.507059e+37 }
0x20b9   : > { %v2182_v43 = vor.u32 1.1754944e-38, %v2181_v47  ;;  %vm2180_vm5 = vcmp.eq.f32.partialorder %v2179_v34, 8.507059e+37 }
0x20bc   : > { %v3043_v26 = vpop.eup %3042 }
0x20bd   : > { %v2233_v23 = vmul.f32 %v3043_v26, %v2231_v21  ;;  %v3045_v44 = vpop.eup %3044  ;;  %vm2238_vm13 = vweird.f32 %v3043_v26 }
0x20be   : > { %v2171_v45 = vmul.f32 %v3045_v44, %v2169_v42  ;;  %vm2239_vm15 = vmor %vm2237_vm14, %vm2238_vm13  ;;  %vm2176_vm2 = vweird.f32 %v3045_v44 }
0x20bf   : > { %v2234_v2 = vsub.f32 1.0, %v2233_v23  ;;  %vm2177_vm4 = vmor %vm2175_vm3, %vm2176_vm2 }
0x20c0   : > { %v2172_v35 = vsub.f32 1.0, %v2171_v45 }
0x20c1   : > { %v2235_v3 = vmul.f32 %v3043_v26, %v2234_v2 }
0x20c2   : > { %v2173_v4 = vmul.f32 %v3045_v44, %v2172_v35 }
0x20c3   : > { %v2236_v25 = vadd.f32 %v3043_v26, %v2235_v3 }
0x20c4   : > { %v2174_v46 = vadd.f32 %v3045_v44, %v2173_v4 }
0x20c5   : > { %v2240_v31 = vsel %vm2239_vm15, %v3043_v26, %v2236_v25 }
0x20c6   : > { %v2245_v50 = vsel %vm2242_vm0, %v2244_v36, %v2240_v31  ;;  %v2178_v29 = vsel %vm2177_vm4, %v3045_v44, %v2174_v46 }
0x20c7   : > { %v2183_v27 = vsel %vm2180_vm5, %v2182_v43, %v2178_v29  ;;  %v2248_v39 = vmul.f32 %v2245_v50, %v3986_v57 }
0x20c8   : > { %v2186_v32 = vmul.f32 %v2183_v27, %v3991_v61 }
0x211e   : > { %v2251_v49 = vpop.permute.xlu1 %2250 }
0x211f   : > { %v2253_v30 = vmul.f32 %v2251_v49, %v2245_v50 }
0x2121   : > { %2255 = vrot.lane.b32.xlu0 %v2253_v30, %s3288_s20 }
0x2125   : > { %v2189_v51 = vpop.permute.xlu0 %2188 }
0x2126   : > { %v2191_v1 = vmul.f32 %v2189_v51, %v2183_v27 }
0x2128   : > { %2193 = vrot.lane.b32.xlu2 %v2191_v1, %s3288_s20 }
0x2182   : > { %v2194_v33 = vpop.permute.xlu2 %2193 }
0x2183   : > { %v4007_v37 = vadd.f32 %v2194_v33, %v2186_v32 }
0x2185   : > { %3046 = vtanh.f32 %v4007_v37 }
0x218b   : > { %v3047_v38 = vpop.eup %3046 }
0x218c   : > { %2199 = vrot.lane.b32.xlu1 %v3047_v38, %s3288_s20 }
0x2193   : > { %v2256_v40 = vpop.permute.xlu0 %2255 }
0x2194   : > { %v4012_v52 = vadd.f32 %v2256_v40, %v2248_v39 }
0x2196   : > { %3048 = vtanh.f32 %v4012_v52 }
0x219c   : > { %v3049_v41 = vpop.eup %3048 }
0x219d   : > { %2261 = vrot.lane.b32.xlu2 %v3049_v41, %s3288_s20 }
0x21f7   : > { %v2262_v48 = vpop.permute.xlu2 %2261 }
0x21f8   : > { %v2264_v53 = vmul.f32 %v2262_v48, %v2245_v50 }
0x21fa   : > { %2266 = vrot.lane.b32.xlu0 %v2264_v53, %s3289_s21 }
0x21fe   : > { %v2200_v54 = vpop.permute.xlu1 %2199 }
0x21ff   : > { %v2202_v55 = vmul.f32 %v2200_v54, %v2183_v27 }
0x2201   : > { %2270 = vrot.lane.b32.xlu1 %v2202_v55, %s3290_s26 }
0x226c   : > { %v2267_v56 = vpop.permute.xlu0 %2266 }
0x226d   : > { %2723 = vmatmul.msk.f32.vlgmr.msra.gmra.mxu0 %vm357_vm1, %v2267_v56 }
0x2273   : > { %v2271_v57 = vpop.permute.xlu1 %2270 }
0x2274   : > { %v2273_v58 = vsel %vm357_vm1, %v2267_v56, %v2271_v57 }
0x2275   : > { %2720 = vmatmul.msk.f32.vlgmr.msrb.gmra.mxu2 %vm435_vm6, %v2273_v58 }
0x22ea   : > { %v2355_v60 = vpop.f32.mrf.mxu0 }
0x22eb   : > { %v2358_v61 = vadd.f32 %v2722_v59, %v2355_v60 }
0x22ed   : > { %3050 = vtanh.f32 %v2358_v61  ;;  %v2724_v8 = vmul.f32 -1.442695, %v2358_v61 }
0x22f3   : > { %v3051_v62 = vpop.eup %3050 }
0x22f4   : > { %2381 = vrot.lane.b32.xlu0 %v3051_v62, %s3288_s20 }
0x22f8   : > { %v2294_v63 = vpop.f32.mrf.mxu2 }
0x22f9   : > { %v2295_v0 = vadd.f32 %v3979_v19, %v2294_v63 }
0x22fb   : > { %3052 = vtanh.f32 %v2295_v0  ;;  %v2721_v6 = vmul.f32 -1.442695, %v2295_v0 }
0x22fd   : > { %3054 = vpow2.f32 %v2721_v6 }
0x22fe   : > { %3056 = vpow2.f32 %v2724_v8 }
0x2301   : > { %v3053_v5 = vpop.eup %3052 }
0x2302   : > { %2319 = vrot.lane.b32.xlu2 %v3053_v5, %s3288_s20 }
0x2303   : > { %v3055_v7 = vpop.eup %3054 }
0x2304   : > { %v2300_v9 = vadd.f32 1.0, %v3055_v7  ;;  %v3057_v10 = vpop.eup %3056 }
0x2305   : > { %v2362_v12 = vadd.f32 1.0, %v3057_v10 }
0x2306   : > { %3058 = vrcp.f32 %v2300_v9  ;;  %v2312_v20 = vand.u32 2147483648, %v2300_v9  ;;  %vm2306_vm8 = vweird.f32 %v2300_v9  ;;  %v2310_v21 = vand.u32 2147483647, %v2300_v9 }
0x2307   : > { %3060 = vrcp.f32 %v2362_v12  ;;  %v2374_v35 = vand.u32 2147483648, %v2362_v12  ;;  %vm2368_vm12 = vweird.f32 %v2362_v12  ;;  %v2372_v25 = vand.u32 2147483647, %v2362_v12 }
0x2308   : > { %v2313_v26 = vor.u32 1.1754944e-38, %v2312_v20  ;;  %vm2311_vm10 = vcmp.eq.f32.partialorder %v2310_v21, 8.507059e+37 }
0x2309   : > { %v2375_v28 = vor.u32 1.1754944e-38, %v2374_v35  ;;  %vm2373_vm14 = vcmp.eq.f32.partialorder %v2372_v25, 8.507059e+37 }
0x230c   : > { %v3059_v11 = vpop.eup %3058 }
0x230d   : > { %v2302_v13 = vmul.f32 %v3059_v11, %v2300_v9  ;;  %v3061_v15 = vpop.eup %3060  ;;  %vm2307_vm7 = vweird.f32 %v3059_v11 }
0x230e   : > { %v2364_v17 = vmul.f32 %v3061_v15, %v2362_v12  ;;  %vm2308_vm9 = vmor %vm2306_vm8, %vm2307_vm7  ;;  %vm2369_vm11 = vweird.f32 %v3061_v15 }
0x230f   : > { %v2303_v14 = vsub.f32 1.0, %v2302_v13  ;;  %vm2370_vm13 = vmor %vm2368_vm12, %vm2369_vm11 }
0x2310   : > { %v2365_v24 = vsub.f32 1.0, %v2364_v17 }
0x2311   : > { %v2304_v16 = vmul.f32 %v3059_v11, %v2303_v14 }
0x2312   : > { %v2366_v23 = vmul.f32 %v3061_v15, %v2365_v24 }
0x2313   : > { %v2305_v18 = vadd.f32 %v3059_v11, %v2304_v16 }
0x2314   : > { %v2367_v3 = vadd.f32 %v3061_v15, %v2366_v23 }
0x2315   : > { %v2309_v42 = vsel %vm2308_vm9, %v3059_v11, %v2305_v18 }
0x2316   : > { %v2314_v2 = vsel %vm2311_vm10, %v2313_v26, %v2309_v42  ;;  %v2371_v22 = vsel %vm2370_vm13, %v3061_v15, %v2367_v3 }
0x2317   : > { %v2376_v31 = vsel %vm2373_vm14, %v2375_v28, %v2371_v22  ;;  %v2317_v47 = vmul.f32 %v2314_v2, %v4007_v37 }
0x2318   : > { %v2379_v49 = vmul.f32 %v2376_v31, %v4012_v52 }
0x235c   : > { %v2320_v44 = vpop.permute.xlu2 %2319 }
0x235d   : > { %v2322_v45 = vmul.f32 %v2320_v44, %v2314_v2 }
0x235f   : > { %2324 = vrot.lane.b32.xlu1 %v2322_v45, %s3288_s20 }
0x2366   : > { %v2382_v4 = vpop.permute.xlu0 %2381 }
0x2367   : > { %v2384_v36 = vmul.f32 %v2382_v4, %v2376_v31 }
0x2369   : > { %2386 = vrot.lane.b32.xlu2 %v2384_v36, %s3288_s20 }
0x23c3   : > { %v2387_v50 = vpop.permute.xlu2 %2386 }
0x23c4   : > { %v2389_v46 = vadd.f32 %v2387_v50, %v2379_v49 }
0x23c6   : > { %3062 = vtanh.f32 %v2389_v46 }
0x23cc   : > { %v3063_v30 = vpop.eup %3062 }
0x23cd   : > { %2392 = vrot.lane.b32.xlu1 %v3063_v30, %s3288_s20 }
0x23d1   : > { %v2325_v34 = vpop.permute.xlu1 %2324 }
0x23d2   : > { %v2327_v29 = vadd.f32 %v2325_v34, %v2317_v47 }
0x23d4   : > { %3064 = vtanh.f32 %v2327_v29 }
0x23da   : > { %v3065_v43 = vpop.eup %3064 }
0x23db   : > { %2330 = vrot.lane.b32.xlu0 %v3065_v43, %s3288_s20 }
0x243f   : > { %v2393_v51 = vpop.permute.xlu1 %2392 }
0x2440   : > { %v2395_v27 = vmul.f32 %v2393_v51, %v2376_v31 }
0x2442   : > { %2397 = vrot.lane.b32.xlu2 %v2395_v27, %s3289_s21 }
0x244d   : > { %v2331_v1 = vpop.permute.xlu0 %2330 }
0x244e   : > { %v2333_v32 = vmul.f32 %v2331_v1, %v2314_v2 }
0x2450   : > { %2401 = vrot.lane.b32.xlu0 %v2333_v32, %s3290_s26 }
0x249c   : > { %v2398_v33 = vpop.permute.xlu2 %2397 }
0x249d   : > { %2465 = vst.msk [vmem:[#allocation7] sm:$0xff] %vm357_vm1, %v2398_v33 }
0x24c2   : > { %v2402_v38 = vpop.permute.xlu0 %2401 }
0x24c3   : > { %v2404_v37 = vsel %vm357_vm1, %v2398_v33, %v2402_v38 }
0x24c4   : > { %2725 = vmatmul.msk.f32.vlgmr.msra.gmra.mxu1 %vm435_vm6, %v2404_v37 }
0x2541   : > { %v2425_v39 = vpop.f32.mrf.mxu1 }
0x2542   : > { %v2426_v40 = vadd.f32 %v3979_v19, %v2425_v39 }
0x2544   : > { %3066 = vtanh.f32 %v2426_v40  ;;  %v2726_v41 = vmul.f32 -1.442695, %v2426_v40 }
0x2546   : > { %3068 = vpow2.f32 %v2726_v41 }
0x254a   : > { %v3067_v52 = vpop.eup %3066 }
0x254b   : > { %2450 = vrot.lane.b32.xlu1 %v3067_v52, %s3288_s20 }
0x254c   : > { %v3069_v48 = vpop.eup %3068 }
0x254d   : > { %v2431_v53 = vadd.f32 1.0, %v3069_v48 }
0x254f   : > { %3070 = vrcp.f32 %v2431_v53  ;;  %v2443_v59 = vand.u32 2147483648, %v2431_v53  ;;  %vm2437_vm15 = vweird.f32 %v2431_v53  ;;  %v2441_v19 = vand.u32 2147483647, %v2431_v53 }
0x2551   : > { %v2444_v61 = vor.u32 1.1754944e-38, %v2443_v59  ;;  %vm2442_vm2 = vcmp.eq.f32.partialorder %v2441_v19, 8.507059e+37 }
0x2553   : > { %2467 = vrot.lane.b32.xlu1 %v2389_v46, %s3290_s26 }
0x2555   : > { %v3071_v54 = vpop.eup %3070 }
0x2556   : > { %v2433_v55 = vmul.f32 %v3071_v54, %v2431_v53  ;;  %vm2438_vm6 = vweird.f32 %v3071_v54 }
0x2557   : > { %vm2439_vm0 = vmor %vm2437_vm15, %vm2438_vm6 }
0x2558   : > { %v2434_v56 = vsub.f32 1.0, %v2433_v55 }
0x255a   : > { %v2435_v57 = vmul.f32 %v3071_v54, %v2434_v56 }
0x255c   : > { %v2436_v58 = vadd.f32 %v3071_v54, %v2435_v57 }
0x255e   : > { %v2440_v60 = vsel %vm2439_vm0, %v3071_v54, %v2436_v58 }
0x255f   : > { %v2445_v63 = vsel %vm2442_vm2, %v2444_v61, %v2440_v60 }
0x2560   : > { %v2448_v6 = vmul.f32 %v2445_v63, %v2327_v29 }
0x25bd   : > { %v2451_v62 = vpop.permute.xlu1 %2450 }
0x25be   : > { %v2453_v0 = vmul.f32 %v2451_v62, %v2445_v63 }
0x25c0   : > { %2455 = vrot.lane.b32.xlu2 %v2453_v0, %s3288_s20 }
0x25c5   : > { %v2468_v5 = vpop.permute.xlu1 %2467 }
0x25c6   : > { %2470 = vst.msk [vmem:[#allocation8] sm:$0xff] %vm357_vm1, %v2468_v5 }
0x261a   : > { %v2456_v7 = vpop.permute.xlu2 %2455 }
0x261b   : > { %v2458_v8 = vadd.f32 %v2456_v7, %v2448_v6 }
0x261d   : > { %3072 = vtanh.f32 %v2458_v8 }
0x2623   : > { %v3073_v9 = vpop.eup %3072 }
0x2624   : > { %2461 = vrot.lane.b32.xlu0 %v3073_v9, %s3288_s20 }
0x262c   : > { %2477 = vrot.lane.b32.xlu0 %v2458_v8, %s3290_s26 }
0x2696   : > { %v2462_v10 = vpop.permute.xlu0 %2461 }
0x2697   : > { %v2464_v11 = vmul.f32 %v2462_v10, %v2445_v63 }
0x2699   : > { %2472 = vrot.lane.b32.xlu2 %v2464_v11, %s3289_s21 }
0x269e   : > { %v2478_v12 = vpop.permute.xlu0 %2477 }
0x269f   : > { %2480 = vst.msk [vmem:[#allocation8 + $0x8] sm:$0xff] %vm357_vm1, %v2478_v12 }
0x26f0   : > { %2484 = sbr.rel (%p2727_p1) target bundleno = 10110 (0x277e), region = 60 }
0x26f3   : > { %v2473_v13 = vpop.permute.xlu2 %2472 }
0x26f4   : > { %2475 = vst.msk [vmem:[#allocation7 + $0x8] sm:$0xff] %vm357_vm1, %v2473_v13 }
0x26f5   : > { %v2488_v14 = vld [vmem:[%s4104_s4 + $0x18] sm:$0xff]  ;;  %v2487_v15 = vld [vmem:[%s4104_s4 + $0x10] sm:$0xff]  ;;  %v2486_v16 = vld [vmem:[%s4104_s4 + $0x8] sm:$0xff]  ;;  %vm2515_vm3 = vcmask 130048  }
0x26f6   : > { %2507 = vmatpush.msra.mxu0 %v2488_v14  ;;  %v2485_v17 = vld [vmem:[%s4104_s4] sm:$0xff] }
0x26f7   : > { %v3091_v18 = vld [vmem:[%s4105_s5] ss:$0 sm:$0xff] }
0x26f8   : > { %2508 = vmatpush.msra.mxu0 %v2487_v15 }
0x26fa   : > { %2509 = vmatpush.msra.mxu0 %v2486_v16 }
0x26fc   : > { %2510 = vmatpush.msra.mxu0 %v2485_v17 }
0x26fd   : > { %2728 = vmatmul.msk.f32.vlgmr.msra.gmra.mxu0 %vm357_vm1, %v2473_v13 }
0x277a   : > { %v2512_v20 = vpop.f32.mrf.mxu0 }
0x277b   : > { %v2513_v21 = vadd.f32 %v3091_v18, %v2512_v20 }
0x277d   : > { %2516 = vst.msk [vmem:[#allocation10] sm:$0xff] %vm2515_vm3, %v2513_v21 }
0x277e PF: > { %p2767_p4 = scmp.eq.s32.totalorder %s3360_s9, 1  ;;  %s3291_s2 = smov [#allocation8]  }
0x277f   : > { %s2536_s14 = sshll.u32 %s3291_s2, 4  ;;  %s2538_s19 = sshll.u32 %s4107_s7, 4  ;;  %s2537_s14 = int_to_ptr.vmem [resolvable:$true] %s2536_s14  ;;  %s2539_s19 = int_to_ptr.hbm [resolvable:$true] %s2538_s19 }
0x2780   : > { %s3292_s15 = smov 128   ;;  %s3293_s13 = smov 8  }
0x2781   : > { %2747 = dma.vmem_to_hbm [thread:$0]  (%p2767_p4), %s2537_s14, 256, %s2539_s19, [#allocation9], %s3292_s15, %s3292_s15, %s3293_s13  }
0x2782   : > { %s2524_s24 = sshll.u32 %s4106_s6, 4  ;;  %s3294_s20 = smov [#allocation7]   ;;  %s2525_s24 = int_to_ptr.hbm [resolvable:$true] %s2524_s24 }
0x2783   : > { %s2522_s25 = sshll.u32 %s3294_s20, 4  ;;  %s3295_s26 = smov [#allocation10]   ;;  %s2523_s25 = int_to_ptr.vmem [resolvable:$true] %s2522_s25 }
0x2784   : > { %2745 = dma.vmem_to_hbm [thread:$0]  (%p2767_p4), %s2523_s25, 256, %s2525_s24, [#allocation4], %s3292_s15, %s3292_s15, %s3293_s13  }
0x2785   : > { %s2551_s21 = sshll.u32 %s3295_s26, 4  ;;  %s2553_s11 = sshll.u32 %s4108_s8, 4  ;;  %s2552_s21 = int_to_ptr.vmem [resolvable:$true] %s2551_s21  ;;  %s2554_s11 = int_to_ptr.hbm [resolvable:$true] %s2553_s11 }
0x2786   : > { %2749 = dma.vmem_to_hbm [thread:$0]  (%p2767_p4), %s2552_s21, 128, %s2554_s11, [#allocation9]  }
0x2787   : > { %3261 = dma.done.wait (%p2767_p4), [#allocation4], 256  }
0x2788   : > { %3263 = vsyncadd (%p2767_p4), [#allocation4], 4294967040 }
0x2789   : > { %3265 = dma.done.wait (%p2767_p4), [#allocation9], 384  }
0x278a   : > { %3267 = vsyncadd (%p2767_p4), [#allocation9], 4294966912 }
0x278b PF: > { %p22_p5 = scmp.ge.s32.totalorder %s3385_s17, 4   ;;  %s4114_s27 = smov %s3274_s28 }
0x278c   : > { %s4115_s28 = smov %s3278_s29  ;;  %s4116_s29 = smov %s3398_s22 }
0x278d   : > { %s4117_s30 = smov %s3385_s17  ;;  %24 = sbr.rel (!%p22_p5) target bundleno = 8 (0x8), region = 126 }
0x2792   :  { %2577 = vsyncpa [#allocation3], 1 }
0x2793   :  { %2579 = vsyncpa [#allocation3 + $0x1], 1 }
0x2794   :  { %2580 = vsyncpa [#allocation6], 1 }
0x2795   :  { %2581 = vsyncpa [#allocation4], 1 }
0x2796   :  { %2583 = vsyncpa [#allocation4 + $0x1], 1 }
0x2797   :  { %2584 = vsyncpa [#allocation9], 1 }

</bundles_post_ra>
